<compile_context>
chip_gen: v6e
topology: v6e:2x2x1
jax: 0.10.0
libtpu: 0.0.40
codegen_flags: <defaults>
</compile_context>

<pallas_src>
import functools

import jax
import jax.numpy as jnp
from jax.experimental import pallas as pl
from jax.experimental.pallas import tpu as pltpu


# ----------------------------------------------------------------------------
# In-kernel helpers (operate on values already resident on-chip)
# ----------------------------------------------------------------------------
def _edge_masks(W, P):
    """Boolean (1, P) lane masks valid for the kx==0 / kx==2 taps."""
    col = jax.lax.broadcasted_iota(jnp.int32, (1, P), 1) % W
    return (col != 0), (col != W - 1)


def _conv3x3_flat(x_cf, w9, b_col, *, W, mask_l, mask_r):
    """3x3, stride-1, pad-1 conv on a channels-first, spatially-flat activation.

    x_cf:   (Cin, P)  bf16 activation, P = H*W (pixels on the lane axis)
    w9:     (9, Cout, Cin) bf16 weights, tap index t = ky*3 + kx
    b_col:  (Cout, 1) f32 bias
    mask_l/mask_r: (1, P) bool lane masks (pre-computed once per domain)
    returns (Cout, P) float32

    The 9 taps are static shifted slices of a zero-extended flat buffer
    (flattened-conv trick); taps with kx != 1 additionally mask pixels that
    would wrap across image rows.  Each tap is consumed immediately by an
    accumulating MXU dot, so no 9x-replicated im2col matrix ever exists.
    """
    Cin, P = x_cf.shape
    Cout = w9.shape[1]
    zpad = jnp.zeros((Cin, W + 1), x_cf.dtype)
    xp = jnp.concatenate([zpad, x_cf, zpad], axis=1)          # (Cin, P + 2W + 2)

    # Hoisted mask broadcasts (JAX does not CSE broadcast_in_dim).
    ml = jnp.broadcast_to(mask_l, (Cin, P)).astype(x_cf.dtype)
    mr = jnp.broadcast_to(mask_r, (Cin, P)).astype(x_cf.dtype)

    acc = jnp.broadcast_to(b_col, (Cout, P)).astype(jnp.float32)
    for ky in range(3):
        for kx in range(3):
            s = ky * W + kx                                   # static slice start
            t = xp[:, s:s + P]
            if kx == 0:                                       # left-edge wrap
                t = t * ml
            elif kx == 2:                                     # right-edge wrap
                t = t * mr
            acc = acc + jnp.dot(w9[ky * 3 + kx], t,
                                preferred_element_type=jnp.float32)
    return acc                                                # (Cout, P) f32


# ----------------------------------------------------------------------------
# The single fused Pallas kernel
# ----------------------------------------------------------------------------
def _locate_kernel(lf_ref, pf_ref, pft_ref,
                   mw1_ref, mb1_ref, mw2_ref, mb2_ref,
                   hmw1_ref, hmb1_ref, hmw2_ref, hmb2_ref,
                   big_ref, pm_ref, *, H, W, h, w):
    """One batch element: correlation + hm_layer, mnt_layer(large), mnt_layer(patch).

    lf_ref:  (C, P)   f32   large-scale feature, P = H*W
    pf_ref:  (C, hw)  f32   patch feature (channels-first)
    pft_ref: (hw, C)  f32   patch feature transposed (for the correlation)
    m*_ref / hm*_ref: packed conv weights (9, Cout, Cin) bf16, biases (Cout,1) f32
    big_ref: (2, P)   f32   row 0 = hm, row 1 = org_mnt (packed, lane-dense)
    pm_ref:  (1, hw)  f32   patch_mnt
    """
    P, hw = H * W, h * w

    # f32 in HBM -> bf16 matmul operands on the VPU (no extra HBM pass).
    lf = lf_ref[...].astype(jnp.bfloat16)        # (C,  P)
    pf = pf_ref[...].astype(jnp.bfloat16)        # (C,  hw)
    pft = pft_ref[...].astype(jnp.bfloat16)      # (hw, C)

    ml_P, mr_P = _edge_masks(W, P)               # large-image pixel domain
    ml_q, mr_q = _edge_masks(w, hw)              # patch pixel domain

    # --- hm branch: correlation (einsum 'bcde,bchw->bhwde') + conv+ReLU+conv --
    # coh[k, p] = sum_c patch[c, k] * large[c, p];  k = h_i*w + w_i, p = d*W + e
    coh = jnp.dot(pft, lf, preferred_element_type=jnp.float32)   # (hw, P) f32
    # Documented precision tradeoff: bf16 correlation operands + bf16 coh for
    # the hm convs -> hm checked at a looser (3e-1) tolerance below.
    coh = coh.astype(jnp.bfloat16)
    y = _conv3x3_flat(coh, hmw1_ref[...], hmb1_ref[...],
                      W=W, mask_l=ml_P, mask_r=mr_P)
    y = jnp.maximum(y, 0.0).astype(jnp.bfloat16)
    hm = _conv3x3_flat(y, hmw2_ref[...], hmb2_ref[...],
                       W=W, mask_l=ml_P, mask_r=mr_P)            # (1, P) f32

    # --- org_mnt branch: conv3x3(C->8)+ReLU -> conv3x3(8->1)+Sigmoid ---------
    y = _conv3x3_flat(lf, mw1_ref[...], mb1_ref[...],
                      W=W, mask_l=ml_P, mask_r=mr_P)
    y = jnp.maximum(y, 0.0).astype(jnp.bfloat16)
    org = jax.nn.sigmoid(
        _conv3x3_flat(y, mw2_ref[...], mb2_ref[...],
                      W=W, mask_l=ml_P, mask_r=mr_P))            # (1, P) f32

    # --- patch_mnt branch (same mnt weights, patch spatial domain) -----------
    yq = _conv3x3_flat(pf, mw1_ref[...], mb1_ref[...],
                       W=w, mask_l=ml_q, mask_r=mr_q)
    yq = jnp.maximum(yq, 0.0).astype(jnp.bfloat16)
    pm = jax.nn.sigmoid(
        _conv3x3_flat(yq, mw2_ref[...], mb2_ref[...],
                      W=w, mask_l=ml_q, mask_r=mr_q))            # (1, hw) f32

    # Packed, lane-dense stores.
    big_ref[...] = jnp.concatenate([hm, org], axis=0).astype(big_ref.dtype)
    pm_ref[...] = pm.astype(pm_ref.dtype)


# ----------------------------------------------------------------------------
# Wrapper around the single pallas_call
# ----------------------------------------------------------------------------
def _pack_conv_weight(wt):
    """(Cout, Cin, 3, 3) -> (9, Cout, Cin), tap index t = ky*3 + kx."""
    cout, cin = wt.shape[0], wt.shape[1]
    return jnp.transpose(wt, (2, 3, 0, 1)).reshape(9, cout, cin)


@jax.jit
def locate_net_forward(params, large_scale_feature, patch_feature):
    """Inputs/outputs in PyTorch NCHW layout.

    large_scale_feature: (B, 16, H, W)   -- hrnet_high(image)
    patch_feature:       (B, 16, h, w)   -- hrnet_low(patch)
    returns (hm, org_mnt, patch_mnt): (B,1,H,W), (B,1,H,W), (B,1,h,w)
    """
    B, C, H, W = large_scale_feature.shape
    _, _, h, w = patch_feature.shape
    P, hw = H * W, h * w
    C1 = params["mnt_w1"].shape[0]                 # mid channels (8)

    # Flat, channels-first views (free reshapes of contiguous NCHW); f32 in HBM.
    lf = large_scale_feature.reshape(B, C, P)
    pf = patch_feature.reshape(B, C, hw)
    pft = jnp.transpose(pf, (0, 2, 1))             # (B, hw, C) -- tiny

    mw1 = _pack_conv_weight(params["mnt_w1"]).astype(jnp.bfloat16)   # (9, C1, C)
    mb1 = params["mnt_b1"].reshape(C1, 1).astype(jnp.float32)
    mw2 = _pack_conv_weight(params["mnt_w2"]).astype(jnp.bfloat16)   # (9, 1, C1)
    mb2 = params["mnt_b2"].reshape(1, 1).astype(jnp.float32)
    hmw1 = _pack_conv_weight(params["hm_w1"]).astype(jnp.bfloat16)   # (9, C1, hw)
    hmb1 = params["hm_b1"].reshape(C1, 1).astype(jnp.float32)
    hmw2 = _pack_conv_weight(params["hm_w2"]).astype(jnp.bfloat16)   # (9, 1, C1)
    hmb2 = params["hm_b2"].reshape(1, 1).astype(jnp.float32)

    big, pm = pl.pallas_call(
        functools.partial(_locate_kernel, H=H, W=W, h=h, w=w),
        out_shape=(jax.ShapeDtypeStruct((B, 2, P), jnp.float32),
                   jax.ShapeDtypeStruct((B, 1, hw), jnp.float32)),
        grid=(B,),
        in_specs=[
            pl.BlockSpec((None, C, P), lambda bi: (bi, 0, 0)),
            pl.BlockSpec((None, C, hw), lambda bi: (bi, 0, 0)),
            pl.BlockSpec((None, hw, C), lambda bi: (bi, 0, 0)),
            pl.BlockSpec((9, C1, C), lambda bi: (0, 0, 0)),
            pl.BlockSpec((C1, 1), lambda bi: (0, 0)),
            pl.BlockSpec((9, 1, C1), lambda bi: (0, 0, 0)),
            pl.BlockSpec((1, 1), lambda bi: (0, 0)),
            pl.BlockSpec((9, C1, hw), lambda bi: (0, 0, 0)),
            pl.BlockSpec((C1, 1), lambda bi: (0, 0)),
            pl.BlockSpec((9, 1, C1), lambda bi: (0, 0, 0)),
            pl.BlockSpec((1, 1), lambda bi: (0, 0)),
        ],
        out_specs=(pl.BlockSpec((None, 2, P), lambda bi: (bi, 0, 0)),
                   pl.BlockSpec((None, 1, hw), lambda bi: (bi, 0, 0))),
        compiler_params=pltpu.CompilerParams(
            dimension_semantics=("parallel",),      # v7x: one batch elem per TC
            vmem_limit_bytes=32 * 1024 * 1024),
    )(lf, pf, pft, mw1, mb1, mw2, mb2, hmw1, hmb1, hmw2, hmb2)

    hm = big[:, 0:1, :].reshape(B, 1, H, W)
    org_mnt = big[:, 1:2, :].reshape(B, 1, H, W)
    patch_mnt = pm.reshape(B, 1, h, w)
    return hm, org_mnt, patch_mnt


# ----------------------------------------------------------------------------
# Parameters and pure-JAX reference
# ----------------------------------------------------------------------------
def init_params(key, channel_num, final_feature_channel):
    """Deterministic synthetic parameters matching the PyTorch layer shapes."""
    ks = jax.random.split(key, 8)
    n = lambda k, s: 0.1 * jax.random.normal(k, s, jnp.float32)
    return {
        # mnt_layer: Conv2d(16, 8, 3) -> ReLU -> Conv2d(8, 1, 3) -> Sigmoid
        "mnt_w1": n(ks[0], (8, channel_num, 3, 3)),
        "mnt_b1": n(ks[1], (8,)),
        "mnt_w2": n(ks[2], (1, 8, 3, 3)),
        "mnt_b2": n(ks[3], (1,)),
        # hm_layer: Conv2d(final_feature_channel, 8, 3) -> ReLU -> Conv2d(8, 1, 3)
        "hm_w1": n(ks[4], (8, final_feature_channel, 3, 3)),
        "hm_b1": n(ks[5], (8,)),
        "hm_w2": n(ks[6], (1, 8, 3, 3)),
        "hm_b2": n(ks[7], (1,)),
    }


def _reference_forward(params, large, patch):
    """Pure-JAX (XLA) f32 reference of the same forward pass."""
    def conv3(x, w, b):
        y = jax.lax.conv_general_dilated(
            x, w, window_strides=(1, 1), padding=((1, 1), (1, 1)),
            dimension_numbers=("NCHW", "OIHW", "NCHW"))
        return y + b.reshape(1, -1, 1, 1)

    def mnt(x):
        y = jax.nn.relu(conv3(x, params["mnt_w1"], params["mnt_b1"]))
        return jax.nn.sigmoid(conv3(y, params["mnt_w2"], params["mnt_b2"]))

    org = mnt(large)
    pm = mnt(patch)
    B, _, H, W = large.shape
    _, _, h, w = patch.shape
    coh = jnp.einsum("bcde,bchw->bhwde", large, patch).reshape(B, h * w, H, W)
    y = jax.nn.relu(conv3(coh, params["hm_w1"], params["hm_b1"]))
    hm = conv3(y, params["hm_w2"], params["hm_b2"])
    return hm, org, pm


if __name__ == "__main__":
    # Small, shape-consistent configuration:
    #   cfg.TRAIN.PATCH_SIZE = 32 => final_feature_channel = (32/8)**2 = 16
    #   channel_num = 16 (fixed in the module)
    B = 2
    channel_num = 16
    H = W = 16            # large-scale feature spatial size
    h = w = 4             # patch feature spatial size (h*w == final_feature_channel)
    final_feature_channel = h * w

    key = jax.random.PRNGKey(0)
    k_lf, k_pf, k_params = jax.random.split(key, 3)

    # TODO(synk): HRNet backbones are not defined in the provided source; use
    # deterministic random tensors standing in for their feature outputs.
    large_scale_feature = jax.random.normal(
        k_lf, (B, channel_num, H, W), jnp.float32)
    patch_feature = jax.random.normal(
        k_pf, (B, channel_num, h, w), jnp.float32)

    params = init_params(k_params, channel_num, final_feature_channel)

    hm, org_mnt, patch_mnt = locate_net_forward(
        params, large_scale_feature, patch_feature)
    jax.block_until_ready((hm, org_mnt, patch_mnt))

    # Shape / sanity checks.
    assert hm.shape == (B, 1, H, W)
    assert org_mnt.shape == (B, 1, H, W)
    assert patch_mnt.shape == (B, 1, h, w)
    assert bool(jnp.all(jnp.isfinite(hm)))
    assert bool(jnp.all((org_mnt >= 0.0) & (org_mnt <= 1.0)))
    assert bool(jnp.all((patch_mnt >= 0.0) & (patch_mnt <= 1.0)))

    # Numerical check against a pure-JAX reference (bf16 matmul operands in the
    # Pallas path => loose-but-meaningful tolerances; hm tolerance reflects the
    # documented bf16 correlation/coh tradeoff).
    hm_r, org_r, pm_r = _reference_forward(
        params, large_scale_feature, patch_feature)
    err_hm = float(jnp.max(jnp.abs(hm - hm_r)))
    err_org = float(jnp.max(jnp.abs(org_mnt - org_r)))
    err_pm = float(jnp.max(jnp.abs(patch_mnt - pm_r)))
    assert err_org < 5e-2, f"org_mnt max err {err_org}"
    assert err_pm < 5e-2, f"patch_mnt max err {err_pm}"
    assert err_hm < 3e-1, f"hm max err {err_hm}"

    print("KERNEL_OK")
</pallas_src>

<mosaic_0001>
module attributes {stable_mosaic.version = 11 : i64} {
  func.func @_locate_kernel(%arg0: i32, %arg1: memref<1x16x256xf32, #tpu.memory_space<vmem>>, %arg2: memref<1x16x16xf32, #tpu.memory_space<vmem>>, %arg3: memref<1x16x16xf32, #tpu.memory_space<vmem>>, %arg4: memref<9x8x16xbf16, #tpu.memory_space<vmem>>, %arg5: memref<8x1xf32, #tpu.memory_space<vmem>>, %arg6: memref<9x1x8xbf16, #tpu.memory_space<vmem>>, %arg7: memref<1x1xf32, #tpu.memory_space<vmem>>, %arg8: memref<9x8x16xbf16, #tpu.memory_space<vmem>>, %arg9: memref<8x1xf32, #tpu.memory_space<vmem>>, %arg10: memref<9x1x8xbf16, #tpu.memory_space<vmem>>, %arg11: memref<1x1xf32, #tpu.memory_space<vmem>>, %arg12: memref<1x2x256xf32, #tpu.memory_space<vmem>>, %arg13: memref<1x1x16xf32, #tpu.memory_space<vmem>>) attributes {dimension_semantics = [#tpu.dimension_semantics<parallel>], iteration_bounds = array<i64: 2>, scalar_prefetch = 0 : i64, scratch_operands = 0 : i64, tpu.core_type = #tpu.core_type<tc>, window_params = [{transform_indices = @transform_0, window_bounds = array<i64: 1, 16, 256>}, {transform_indices = @transform_1, window_bounds = array<i64: 1, 16, 16>}, {transform_indices = @transform_2, window_bounds = array<i64: 1, 16, 16>}, {pipeline_mode = #tpu.pipeline_mode<synchronous>, transform_indices = @transform_3, window_bounds = array<i64: 9, 8, 16>}, {pipeline_mode = #tpu.pipeline_mode<synchronous>, transform_indices = @transform_4, window_bounds = array<i64: 8, 1>}, {pipeline_mode = #tpu.pipeline_mode<synchronous>, transform_indices = @transform_5, window_bounds = array<i64: 9, 1, 8>}, {pipeline_mode = #tpu.pipeline_mode<synchronous>, transform_indices = @transform_6, window_bounds = array<i64: 1, 1>}, {pipeline_mode = #tpu.pipeline_mode<synchronous>, transform_indices = @transform_7, window_bounds = array<i64: 9, 8, 16>}, {pipeline_mode = #tpu.pipeline_mode<synchronous>, transform_indices = @transform_8, window_bounds = array<i64: 8, 1>}, {pipeline_mode = #tpu.pipeline_mode<synchronous>, transform_indices = @transform_9, window_bounds = array<i64: 9, 1, 8>}, {pipeline_mode = #tpu.pipeline_mode<synchronous>, transform_indices = @transform_10, window_bounds = array<i64: 1, 1>}, {transform_indices = @transform_11, window_bounds = array<i64: 1, 2, 256>}, {transform_indices = @transform_12, window_bounds = array<i64: 1, 1, 16>}]} {
    %c0 = arith.constant 0 : index
    %c0_0 = arith.constant 0 : index
    %c0_1 = arith.constant 0 : index
    %0 = vector.load %arg1[%c0, %c0_0, %c0_1] : memref<1x16x256xf32, #tpu.memory_space<vmem>>, vector<1x16x256xf32>
    %1 = vector.shape_cast %0 : vector<1x16x256xf32> to vector<16x256xf32>
    %2 = arith.truncf %1 : vector<16x256xf32> to vector<16x256xbf16>
    %c0_2 = arith.constant 0 : index
    %c0_3 = arith.constant 0 : index
    %c0_4 = arith.constant 0 : index
    %3 = vector.load %arg2[%c0_2, %c0_3, %c0_4] : memref<1x16x16xf32, #tpu.memory_space<vmem>>, vector<1x16x16xf32>
    %4 = vector.shape_cast %3 : vector<1x16x16xf32> to vector<16x16xf32>
    %5 = arith.truncf %4 : vector<16x16xf32> to vector<16x16xbf16>
    %c0_5 = arith.constant 0 : index
    %c0_6 = arith.constant 0 : index
    %c0_7 = arith.constant 0 : index
    %6 = vector.load %arg3[%c0_5, %c0_6, %c0_7] : memref<1x16x16xf32, #tpu.memory_space<vmem>>, vector<1x16x16xf32>
    %7 = vector.shape_cast %6 : vector<1x16x16xf32> to vector<16x16xf32>
    %8 = arith.truncf %7 : vector<16x16xf32> to vector<16x16xbf16>
    %9 = tpu.iota {dimensions = array<i32: 1>} : vector<1x256xi32>
    %c16_i32 = arith.constant 16 : i32
    %c0_i32 = arith.constant 0 : i32
    %10 = arith.cmpi eq, %c16_i32, %c0_i32 : i32
    %c1_i32 = arith.constant 1 : i32
    %11 = arith.select %10, %c1_i32, %c16_i32 : i32
    %12 = vector.broadcast %11 : i32 to vector<1x256xi32>
    %13 = arith.remsi %9, %12 : vector<1x256xi32>
    %c0_i32_8 = arith.constant 0 : i32
    %14 = vector.broadcast %c0_i32_8 : i32 to vector<1x256xi32>
    %15 = arith.cmpi ne, %13, %14 : vector<1x256xi32>
    %c0_i32_9 = arith.constant 0 : i32
    %16 = vector.broadcast %c0_i32_9 : i32 to vector<1x256xi32>
    %17 = arith.cmpi slt, %13, %16 : vector<1x256xi32>
    %c0_i32_10 = arith.constant 0 : i32
    %18 = arith.cmpi slt, %11, %c0_i32_10 : i32
    %19 = vector.broadcast %18 : i1 to vector<1x256xi1>
    %20 = vector.broadcast %19 : vector<1x256xi1> to vector<1x256xi1>
    %21 = arith.xori %17, %20 : vector<1x256xi1>
    %22 = arith.andi %21, %15 : vector<1x256xi1>
    %23 = vector.broadcast %11 : i32 to vector<1x256xi32>
    %24 = arith.addi %13, %23 : vector<1x256xi32>
    %25 = arith.select %22, %24, %13 : vector<1x256xi1>, vector<1x256xi32>
    %c0_i32_11 = arith.constant 0 : i32
    %26 = vector.broadcast %c0_i32_11 : i32 to vector<1x256xi32>
    %27 = arith.cmpi ne, %25, %26 : vector<1x256xi32>
    %c15_i32 = arith.constant 15 : i32
    %28 = vector.broadcast %c15_i32 : i32 to vector<1x256xi32>
    %29 = arith.cmpi ne, %25, %28 : vector<1x256xi32>
    %30 = tpu.iota {dimensions = array<i32: 1>} : vector<1x16xi32>
    %c4_i32 = arith.constant 4 : i32
    %c0_i32_12 = arith.constant 0 : i32
    %31 = arith.cmpi eq, %c4_i32, %c0_i32_12 : i32
    %c1_i32_13 = arith.constant 1 : i32
    %32 = arith.select %31, %c1_i32_13, %c4_i32 : i32
    %33 = vector.broadcast %32 : i32 to vector<1x16xi32>
    %34 = arith.remsi %30, %33 : vector<1x16xi32>
    %c0_i32_14 = arith.constant 0 : i32
    %35 = vector.broadcast %c0_i32_14 : i32 to vector<1x16xi32>
    %36 = arith.cmpi ne, %34, %35 : vector<1x16xi32>
    %c0_i32_15 = arith.constant 0 : i32
    %37 = vector.broadcast %c0_i32_15 : i32 to vector<1x16xi32>
    %38 = arith.cmpi slt, %34, %37 : vector<1x16xi32>
    %c0_i32_16 = arith.constant 0 : i32
    %39 = arith.cmpi slt, %32, %c0_i32_16 : i32
    %40 = vector.broadcast %39 : i1 to vector<1x16xi1>
    %41 = vector.broadcast %40 : vector<1x16xi1> to vector<1x16xi1>
    %42 = arith.xori %38, %41 : vector<1x16xi1>
    %43 = arith.andi %42, %36 : vector<1x16xi1>
    %44 = vector.broadcast %32 : i32 to vector<1x16xi32>
    %45 = arith.addi %34, %44 : vector<1x16xi32>
    %46 = arith.select %43, %45, %34 : vector<1x16xi1>, vector<1x16xi32>
    %c0_i32_17 = arith.constant 0 : i32
    %47 = vector.broadcast %c0_i32_17 : i32 to vector<1x16xi32>
    %48 = arith.cmpi ne, %46, %47 : vector<1x16xi32>
    %c3_i32 = arith.constant 3 : i32
    %49 = vector.broadcast %c3_i32 : i32 to vector<1x16xi32>
    %50 = arith.cmpi ne, %46, %49 : vector<1x16xi32>
    %cst = arith.constant dense<0.000000e+00> : vector<16x256xf32>
    %51 = tpu.matmul %8, %2, %cst {dimension_numbers = #tpu.dot_dimension_numbers<[1], [0], [0], [1], [0, 0, 1, 1], [], []>} : vector<16x16xbf16>, vector<16x256xbf16>, vector<16x256xf32> -> vector<16x256xf32>
    %52 = arith.truncf %51 : vector<16x256xf32> to vector<16x256xbf16>
    %c0_18 = arith.constant 0 : index
    %c0_19 = arith.constant 0 : index
    %c0_20 = arith.constant 0 : index
    %53 = vector.load %arg8[%c0_18, %c0_19, %c0_20] : memref<9x8x16xbf16, #tpu.memory_space<vmem>>, vector<9x8x16xbf16>
    %c0_21 = arith.constant 0 : index
    %c0_22 = arith.constant 0 : index
    %54 = vector.load %arg9[%c0_21, %c0_22] : memref<8x1xf32, #tpu.memory_space<vmem>>, vector<8x1xf32>
    %cst_23 = arith.constant 0.000000e+00 : bf16
    %55 = vector.broadcast %cst_23 : bf16 to vector<16x17xbf16>
    %56 = tpu.concatenate %55, %52, %55 in 1 : vector<16x17xbf16>, vector<16x256xbf16>, vector<16x17xbf16> -> vector<16x290xbf16>
    %57 = vector.shape_cast %27 : vector<1x256xi1> to vector<1x256xi1>
    %58 = vector.broadcast %57 : vector<1x256xi1> to vector<16x256xi1>
    %59 = arith.extui %58 : vector<16x256xi1> to vector<16x256xi32>
    %60 = arith.sitofp %59 : vector<16x256xi32> to vector<16x256xf32>
    %61 = arith.truncf %60 : vector<16x256xf32> to vector<16x256xbf16>
    %62 = vector.shape_cast %29 : vector<1x256xi1> to vector<1x256xi1>
    %63 = vector.broadcast %62 : vector<1x256xi1> to vector<16x256xi1>
    %64 = arith.extui %63 : vector<16x256xi1> to vector<16x256xi32>
    %65 = arith.sitofp %64 : vector<16x256xi32> to vector<16x256xf32>
    %66 = arith.truncf %65 : vector<16x256xf32> to vector<16x256xbf16>
    %67 = vector.shape_cast %54 : vector<8x1xf32> to vector<8x1xf32>
    %68 = vector.broadcast %67 : vector<8x1xf32> to vector<8x256xf32>
    %69 = vector.extract_strided_slice %56 {offsets = [0, 0], sizes = [16, 256], strides = [1, 1]} : vector<16x290xbf16> to vector<16x256xbf16>
    %70 = arith.mulf %69, %61 : vector<16x256xbf16>
    %71 = vector.extract_strided_slice %53 {offsets = [0, 0, 0], sizes = [1, 8, 16], strides = [1, 1, 1]} : vector<9x8x16xbf16> to vector<1x8x16xbf16>
    %72 = vector.shape_cast %71 : vector<1x8x16xbf16> to vector<8x16xbf16>
    %cst_24 = arith.constant dense<0.000000e+00> : vector<8x256xf32>
    %73 = tpu.matmul %72, %70, %cst_24 {dimension_numbers = #tpu.dot_dimension_numbers<[1], [0], [0], [1], [0, 0, 1, 1], [], []>} : vector<8x16xbf16>, vector<16x256xbf16>, vector<8x256xf32> -> vector<8x256xf32>
    %74 = arith.addf %68, %73 : vector<8x256xf32>
    %75 = vector.extract_strided_slice %56 {offsets = [0, 1], sizes = [16, 256], strides = [1, 1]} : vector<16x290xbf16> to vector<16x256xbf16>
    %76 = vector.extract_strided_slice %53 {offsets = [1, 0, 0], sizes = [1, 8, 16], strides = [1, 1, 1]} : vector<9x8x16xbf16> to vector<1x8x16xbf16>
    %77 = vector.shape_cast %76 : vector<1x8x16xbf16> to vector<8x16xbf16>
    %cst_25 = arith.constant dense<0.000000e+00> : vector<8x256xf32>
    %78 = tpu.matmul %77, %75, %cst_25 {dimension_numbers = #tpu.dot_dimension_numbers<[1], [0], [0], [1], [0, 0, 1, 1], [], []>} : vector<8x16xbf16>, vector<16x256xbf16>, vector<8x256xf32> -> vector<8x256xf32>
    %79 = arith.addf %74, %78 : vector<8x256xf32>
    %80 = vector.extract_strided_slice %56 {offsets = [0, 2], sizes = [16, 256], strides = [1, 1]} : vector<16x290xbf16> to vector<16x256xbf16>
    %81 = arith.mulf %80, %66 : vector<16x256xbf16>
    %82 = vector.extract_strided_slice %53 {offsets = [2, 0, 0], sizes = [1, 8, 16], strides = [1, 1, 1]} : vector<9x8x16xbf16> to vector<1x8x16xbf16>
    %83 = vector.shape_cast %82 : vector<1x8x16xbf16> to vector<8x16xbf16>
    %cst_26 = arith.constant dense<0.000000e+00> : vector<8x256xf32>
    %84 = tpu.matmul %83, %81, %cst_26 {dimension_numbers = #tpu.dot_dimension_numbers<[1], [0], [0], [1], [0, 0, 1, 1], [], []>} : vector<8x16xbf16>, vector<16x256xbf16>, vector<8x256xf32> -> vector<8x256xf32>
    %85 = arith.addf %79, %84 : vector<8x256xf32>
    %86 = vector.extract_strided_slice %56 {offsets = [0, 16], sizes = [16, 256], strides = [1, 1]} : vector<16x290xbf16> to vector<16x256xbf16>
    %87 = arith.mulf %86, %61 : vector<16x256xbf16>
    %88 = vector.extract_strided_slice %53 {offsets = [3, 0, 0], sizes = [1, 8, 16], strides = [1, 1, 1]} : vector<9x8x16xbf16> to vector<1x8x16xbf16>
    %89 = vector.shape_cast %88 : vector<1x8x16xbf16> to vector<8x16xbf16>
    %cst_27 = arith.constant dense<0.000000e+00> : vector<8x256xf32>
    %90 = tpu.matmul %89, %87, %cst_27 {dimension_numbers = #tpu.dot_dimension_numbers<[1], [0], [0], [1], [0, 0, 1, 1], [], []>} : vector<8x16xbf16>, vector<16x256xbf16>, vector<8x256xf32> -> vector<8x256xf32>
    %91 = arith.addf %85, %90 : vector<8x256xf32>
    %92 = vector.extract_strided_slice %56 {offsets = [0, 17], sizes = [16, 256], strides = [1, 1]} : vector<16x290xbf16> to vector<16x256xbf16>
    %93 = vector.extract_strided_slice %53 {offsets = [4, 0, 0], sizes = [1, 8, 16], strides = [1, 1, 1]} : vector<9x8x16xbf16> to vector<1x8x16xbf16>
    %94 = vector.shape_cast %93 : vector<1x8x16xbf16> to vector<8x16xbf16>
    %cst_28 = arith.constant dense<0.000000e+00> : vector<8x256xf32>
    %95 = tpu.matmul %94, %92, %cst_28 {dimension_numbers = #tpu.dot_dimension_numbers<[1], [0], [0], [1], [0, 0, 1, 1], [], []>} : vector<8x16xbf16>, vector<16x256xbf16>, vector<8x256xf32> -> vector<8x256xf32>
    %96 = arith.addf %91, %95 : vector<8x256xf32>
    %97 = vector.extract_strided_slice %56 {offsets = [0, 18], sizes = [16, 256], strides = [1, 1]} : vector<16x290xbf16> to vector<16x256xbf16>
    %98 = arith.mulf %97, %66 : vector<16x256xbf16>
    %99 = vector.extract_strided_slice %53 {offsets = [5, 0, 0], sizes = [1, 8, 16], strides = [1, 1, 1]} : vector<9x8x16xbf16> to vector<1x8x16xbf16>
    %100 = vector.shape_cast %99 : vector<1x8x16xbf16> to vector<8x16xbf16>
    %cst_29 = arith.constant dense<0.000000e+00> : vector<8x256xf32>
    %101 = tpu.matmul %100, %98, %cst_29 {dimension_numbers = #tpu.dot_dimension_numbers<[1], [0], [0], [1], [0, 0, 1, 1], [], []>} : vector<8x16xbf16>, vector<16x256xbf16>, vector<8x256xf32> -> vector<8x256xf32>
    %102 = arith.addf %96, %101 : vector<8x256xf32>
    %103 = vector.extract_strided_slice %56 {offsets = [0, 32], sizes = [16, 256], strides = [1, 1]} : vector<16x290xbf16> to vector<16x256xbf16>
    %104 = arith.mulf %103, %61 : vector<16x256xbf16>
    %105 = vector.extract_strided_slice %53 {offsets = [6, 0, 0], sizes = [1, 8, 16], strides = [1, 1, 1]} : vector<9x8x16xbf16> to vector<1x8x16xbf16>
    %106 = vector.shape_cast %105 : vector<1x8x16xbf16> to vector<8x16xbf16>
    %cst_30 = arith.constant dense<0.000000e+00> : vector<8x256xf32>
    %107 = tpu.matmul %106, %104, %cst_30 {dimension_numbers = #tpu.dot_dimension_numbers<[1], [0], [0], [1], [0, 0, 1, 1], [], []>} : vector<8x16xbf16>, vector<16x256xbf16>, vector<8x256xf32> -> vector<8x256xf32>
    %108 = arith.addf %102, %107 : vector<8x256xf32>
    %109 = vector.extract_strided_slice %56 {offsets = [0, 33], sizes = [16, 256], strides = [1, 1]} : vector<16x290xbf16> to vector<16x256xbf16>
    %110 = vector.extract_strided_slice %53 {offsets = [7, 0, 0], sizes = [1, 8, 16], strides = [1, 1, 1]} : vector<9x8x16xbf16> to vector<1x8x16xbf16>
    %111 = vector.shape_cast %110 : vector<1x8x16xbf16> to vector<8x16xbf16>
    %cst_31 = arith.constant dense<0.000000e+00> : vector<8x256xf32>
    %112 = tpu.matmul %111, %109, %cst_31 {dimension_numbers = #tpu.dot_dimension_numbers<[1], [0], [0], [1], [0, 0, 1, 1], [], []>} : vector<8x16xbf16>, vector<16x256xbf16>, vector<8x256xf32> -> vector<8x256xf32>
    %113 = arith.addf %108, %112 : vector<8x256xf32>
    %114 = vector.extract_strided_slice %56 {offsets = [0, 34], sizes = [16, 256], strides = [1, 1]} : vector<16x290xbf16> to vector<16x256xbf16>
    %115 = arith.mulf %114, %66 : vector<16x256xbf16>
    %116 = vector.extract_strided_slice %53 {offsets = [8, 0, 0], sizes = [1, 8, 16], strides = [1, 1, 1]} : vector<9x8x16xbf16> to vector<1x8x16xbf16>
    %117 = vector.shape_cast %116 : vector<1x8x16xbf16> to vector<8x16xbf16>
    %cst_32 = arith.constant dense<0.000000e+00> : vector<8x256xf32>
    %118 = tpu.matmul %117, %115, %cst_32 {dimension_numbers = #tpu.dot_dimension_numbers<[1], [0], [0], [1], [0, 0, 1, 1], [], []>} : vector<8x16xbf16>, vector<16x256xbf16>, vector<8x256xf32> -> vector<8x256xf32>
    %119 = arith.addf %113, %118 : vector<8x256xf32>
    %cst_33 = arith.constant 0.000000e+00 : f32
    %120 = vector.broadcast %cst_33 : f32 to vector<8x256xf32>
    %121 = arith.maximumf %119, %120 : vector<8x256xf32>
    %122 = arith.truncf %121 : vector<8x256xf32> to vector<8x256xbf16>
    %c0_34 = arith.constant 0 : index
    %c0_35 = arith.constant 0 : index
    %c0_36 = arith.constant 0 : index
    %123 = vector.load %arg10[%c0_34, %c0_35, %c0_36] : memref<9x1x8xbf16, #tpu.memory_space<vmem>>, vector<9x1x8xbf16>
    %c0_37 = arith.constant 0 : index
    %c0_38 = arith.constant 0 : index
    %124 = vector.load %arg11[%c0_37, %c0_38] : memref<1x1xf32, #tpu.memory_space<vmem>>, vector<1x1xf32>
    %cst_39 = arith.constant 0.000000e+00 : bf16
    %125 = vector.broadcast %cst_39 : bf16 to vector<8x17xbf16>
    %126 = tpu.concatenate %125, %122, %125 in 1 : vector<8x17xbf16>, vector<8x256xbf16>, vector<8x17xbf16> -> vector<8x290xbf16>
    %127 = vector.shape_cast %27 : vector<1x256xi1> to vector<1x256xi1>
    %128 = vector.broadcast %127 : vector<1x256xi1> to vector<8x256xi1>
    %129 = arith.extui %128 : vector<8x256xi1> to vector<8x256xi32>
    %130 = arith.sitofp %129 : vector<8x256xi32> to vector<8x256xf32>
    %131 = arith.truncf %130 : vector<8x256xf32> to vector<8x256xbf16>
    %132 = vector.shape_cast %29 : vector<1x256xi1> to vector<1x256xi1>
    %133 = vector.broadcast %132 : vector<1x256xi1> to vector<8x256xi1>
    %134 = arith.extui %133 : vector<8x256xi1> to vector<8x256xi32>
    %135 = arith.sitofp %134 : vector<8x256xi32> to vector<8x256xf32>
    %136 = arith.truncf %135 : vector<8x256xf32> to vector<8x256xbf16>
    %137 = vector.shape_cast %124 : vector<1x1xf32> to vector<1x1xf32>
    %138 = vector.broadcast %137 : vector<1x1xf32> to vector<1x256xf32>
    %139 = vector.extract_strided_slice %126 {offsets = [0, 0], sizes = [8, 256], strides = [1, 1]} : vector<8x290xbf16> to vector<8x256xbf16>
    %140 = arith.mulf %139, %131 : vector<8x256xbf16>
    %141 = vector.extract_strided_slice %123 {offsets = [0, 0, 0], sizes = [1, 1, 8], strides = [1, 1, 1]} : vector<9x1x8xbf16> to vector<1x1x8xbf16>
    %142 = vector.shape_cast %141 : vector<1x1x8xbf16> to vector<1x8xbf16>
    %cst_40 = arith.constant dense<0.000000e+00> : vector<1x256xf32>
    %143 = tpu.matmul %142, %140, %cst_40 {dimension_numbers = #tpu.dot_dimension_numbers<[1], [0], [0], [1], [0, 0, 1, 1], [], []>} : vector<1x8xbf16>, vector<8x256xbf16>, vector<1x256xf32> -> vector<1x256xf32>
    %144 = arith.addf %138, %143 : vector<1x256xf32>
    %145 = vector.extract_strided_slice %126 {offsets = [0, 1], sizes = [8, 256], strides = [1, 1]} : vector<8x290xbf16> to vector<8x256xbf16>
    %146 = vector.extract_strided_slice %123 {offsets = [1, 0, 0], sizes = [1, 1, 8], strides = [1, 1, 1]} : vector<9x1x8xbf16> to vector<1x1x8xbf16>
    %147 = vector.shape_cast %146 : vector<1x1x8xbf16> to vector<1x8xbf16>
    %cst_41 = arith.constant dense<0.000000e+00> : vector<1x256xf32>
    %148 = tpu.matmul %147, %145, %cst_41 {dimension_numbers = #tpu.dot_dimension_numbers<[1], [0], [0], [1], [0, 0, 1, 1], [], []>} : vector<1x8xbf16>, vector<8x256xbf16>, vector<1x256xf32> -> vector<1x256xf32>
    %149 = arith.addf %144, %148 : vector<1x256xf32>
    %150 = vector.extract_strided_slice %126 {offsets = [0, 2], sizes = [8, 256], strides = [1, 1]} : vector<8x290xbf16> to vector<8x256xbf16>
    %151 = arith.mulf %150, %136 : vector<8x256xbf16>
    %152 = vector.extract_strided_slice %123 {offsets = [2, 0, 0], sizes = [1, 1, 8], strides = [1, 1, 1]} : vector<9x1x8xbf16> to vector<1x1x8xbf16>
    %153 = vector.shape_cast %152 : vector<1x1x8xbf16> to vector<1x8xbf16>
    %cst_42 = arith.constant dense<0.000000e+00> : vector<1x256xf32>
    %154 = tpu.matmul %153, %151, %cst_42 {dimension_numbers = #tpu.dot_dimension_numbers<[1], [0], [0], [1], [0, 0, 1, 1], [], []>} : vector<1x8xbf16>, vector<8x256xbf16>, vector<1x256xf32> -> vector<1x256xf32>
    %155 = arith.addf %149, %154 : vector<1x256xf32>
    %156 = vector.extract_strided_slice %126 {offsets = [0, 16], sizes = [8, 256], strides = [1, 1]} : vector<8x290xbf16> to vector<8x256xbf16>
    %157 = arith.mulf %156, %131 : vector<8x256xbf16>
    %158 = vector.extract_strided_slice %123 {offsets = [3, 0, 0], sizes = [1, 1, 8], strides = [1, 1, 1]} : vector<9x1x8xbf16> to vector<1x1x8xbf16>
    %159 = vector.shape_cast %158 : vector<1x1x8xbf16> to vector<1x8xbf16>
    %cst_43 = arith.constant dense<0.000000e+00> : vector<1x256xf32>
    %160 = tpu.matmul %159, %157, %cst_43 {dimension_numbers = #tpu.dot_dimension_numbers<[1], [0], [0], [1], [0, 0, 1, 1], [], []>} : vector<1x8xbf16>, vector<8x256xbf16>, vector<1x256xf32> -> vector<1x256xf32>
    %161 = arith.addf %155, %160 : vector<1x256xf32>
    %162 = vector.extract_strided_slice %126 {offsets = [0, 17], sizes = [8, 256], strides = [1, 1]} : vector<8x290xbf16> to vector<8x256xbf16>
    %163 = vector.extract_strided_slice %123 {offsets = [4, 0, 0], sizes = [1, 1, 8], strides = [1, 1, 1]} : vector<9x1x8xbf16> to vector<1x1x8xbf16>
    %164 = vector.shape_cast %163 : vector<1x1x8xbf16> to vector<1x8xbf16>
    %cst_44 = arith.constant dense<0.000000e+00> : vector<1x256xf32>
    %165 = tpu.matmul %164, %162, %cst_44 {dimension_numbers = #tpu.dot_dimension_numbers<[1], [0], [0], [1], [0, 0, 1, 1], [], []>} : vector<1x8xbf16>, vector<8x256xbf16>, vector<1x256xf32> -> vector<1x256xf32>
    %166 = arith.addf %161, %165 : vector<1x256xf32>
    %167 = vector.extract_strided_slice %126 {offsets = [0, 18], sizes = [8, 256], strides = [1, 1]} : vector<8x290xbf16> to vector<8x256xbf16>
    %168 = arith.mulf %167, %136 : vector<8x256xbf16>
    %169 = vector.extract_strided_slice %123 {offsets = [5, 0, 0], sizes = [1, 1, 8], strides = [1, 1, 1]} : vector<9x1x8xbf16> to vector<1x1x8xbf16>
    %170 = vector.shape_cast %169 : vector<1x1x8xbf16> to vector<1x8xbf16>
    %cst_45 = arith.constant dense<0.000000e+00> : vector<1x256xf32>
    %171 = tpu.matmul %170, %168, %cst_45 {dimension_numbers = #tpu.dot_dimension_numbers<[1], [0], [0], [1], [0, 0, 1, 1], [], []>} : vector<1x8xbf16>, vector<8x256xbf16>, vector<1x256xf32> -> vector<1x256xf32>
    %172 = arith.addf %166, %171 : vector<1x256xf32>
    %173 = vector.extract_strided_slice %126 {offsets = [0, 32], sizes = [8, 256], strides = [1, 1]} : vector<8x290xbf16> to vector<8x256xbf16>
    %174 = arith.mulf %173, %131 : vector<8x256xbf16>
    %175 = vector.extract_strided_slice %123 {offsets = [6, 0, 0], sizes = [1, 1, 8], strides = [1, 1, 1]} : vector<9x1x8xbf16> to vector<1x1x8xbf16>
    %176 = vector.shape_cast %175 : vector<1x1x8xbf16> to vector<1x8xbf16>
    %cst_46 = arith.constant dense<0.000000e+00> : vector<1x256xf32>
    %177 = tpu.matmul %176, %174, %cst_46 {dimension_numbers = #tpu.dot_dimension_numbers<[1], [0], [0], [1], [0, 0, 1, 1], [], []>} : vector<1x8xbf16>, vector<8x256xbf16>, vector<1x256xf32> -> vector<1x256xf32>
    %178 = arith.addf %172, %177 : vector<1x256xf32>
    %179 = vector.extract_strided_slice %126 {offsets = [0, 33], sizes = [8, 256], strides = [1, 1]} : vector<8x290xbf16> to vector<8x256xbf16>
    %180 = vector.extract_strided_slice %123 {offsets = [7, 0, 0], sizes = [1, 1, 8], strides = [1, 1, 1]} : vector<9x1x8xbf16> to vector<1x1x8xbf16>
    %181 = vector.shape_cast %180 : vector<1x1x8xbf16> to vector<1x8xbf16>
    %cst_47 = arith.constant dense<0.000000e+00> : vector<1x256xf32>
    %182 = tpu.matmul %181, %179, %cst_47 {dimension_numbers = #tpu.dot_dimension_numbers<[1], [0], [0], [1], [0, 0, 1, 1], [], []>} : vector<1x8xbf16>, vector<8x256xbf16>, vector<1x256xf32> -> vector<1x256xf32>
    %183 = arith.addf %178, %182 : vector<1x256xf32>
    %184 = vector.extract_strided_slice %126 {offsets = [0, 34], sizes = [8, 256], strides = [1, 1]} : vector<8x290xbf16> to vector<8x256xbf16>
    %185 = arith.mulf %184, %136 : vector<8x256xbf16>
    %186 = vector.extract_strided_slice %123 {offsets = [8, 0, 0], sizes = [1, 1, 8], strides = [1, 1, 1]} : vector<9x1x8xbf16> to vector<1x1x8xbf16>
    %187 = vector.shape_cast %186 : vector<1x1x8xbf16> to vector<1x8xbf16>
    %cst_48 = arith.constant dense<0.000000e+00> : vector<1x256xf32>
    %188 = tpu.matmul %187, %185, %cst_48 {dimension_numbers = #tpu.dot_dimension_numbers<[1], [0], [0], [1], [0, 0, 1, 1], [], []>} : vector<1x8xbf16>, vector<8x256xbf16>, vector<1x256xf32> -> vector<1x256xf32>
    %189 = arith.addf %183, %188 : vector<1x256xf32>
    %c0_49 = arith.constant 0 : index
    %c0_50 = arith.constant 0 : index
    %c0_51 = arith.constant 0 : index
    %190 = vector.load %arg4[%c0_49, %c0_50, %c0_51] : memref<9x8x16xbf16, #tpu.memory_space<vmem>>, vector<9x8x16xbf16>
    %c0_52 = arith.constant 0 : index
    %c0_53 = arith.constant 0 : index
    %191 = vector.load %arg5[%c0_52, %c0_53] : memref<8x1xf32, #tpu.memory_space<vmem>>, vector<8x1xf32>
    %cst_54 = arith.constant 0.000000e+00 : bf16
    %192 = vector.broadcast %cst_54 : bf16 to vector<16x17xbf16>
    %193 = tpu.concatenate %192, %2, %192 in 1 : vector<16x17xbf16>, vector<16x256xbf16>, vector<16x17xbf16> -> vector<16x290xbf16>
    %194 = vector.shape_cast %27 : vector<1x256xi1> to vector<1x256xi1>
    %195 = vector.broadcast %194 : vector<1x256xi1> to vector<16x256xi1>
    %196 = arith.extui %195 : vector<16x256xi1> to vector<16x256xi32>
    %197 = arith.sitofp %196 : vector<16x256xi32> to vector<16x256xf32>
    %198 = arith.truncf %197 : vector<16x256xf32> to vector<16x256xbf16>
    %199 = vector.shape_cast %29 : vector<1x256xi1> to vector<1x256xi1>
    %200 = vector.broadcast %199 : vector<1x256xi1> to vector<16x256xi1>
    %201 = arith.extui %200 : vector<16x256xi1> to vector<16x256xi32>
    %202 = arith.sitofp %201 : vector<16x256xi32> to vector<16x256xf32>
    %203 = arith.truncf %202 : vector<16x256xf32> to vector<16x256xbf16>
    %204 = vector.shape_cast %191 : vector<8x1xf32> to vector<8x1xf32>
    %205 = vector.broadcast %204 : vector<8x1xf32> to vector<8x256xf32>
    %206 = vector.extract_strided_slice %193 {offsets = [0, 0], sizes = [16, 256], strides = [1, 1]} : vector<16x290xbf16> to vector<16x256xbf16>
    %207 = arith.mulf %206, %198 : vector<16x256xbf16>
    %208 = vector.extract_strided_slice %190 {offsets = [0, 0, 0], sizes = [1, 8, 16], strides = [1, 1, 1]} : vector<9x8x16xbf16> to vector<1x8x16xbf16>
    %209 = vector.shape_cast %208 : vector<1x8x16xbf16> to vector<8x16xbf16>
    %cst_55 = arith.constant dense<0.000000e+00> : vector<8x256xf32>
    %210 = tpu.matmul %209, %207, %cst_55 {dimension_numbers = #tpu.dot_dimension_numbers<[1], [0], [0], [1], [0, 0, 1, 1], [], []>} : vector<8x16xbf16>, vector<16x256xbf16>, vector<8x256xf32> -> vector<8x256xf32>
    %211 = arith.addf %205, %210 : vector<8x256xf32>
    %212 = vector.extract_strided_slice %193 {offsets = [0, 1], sizes = [16, 256], strides = [1, 1]} : vector<16x290xbf16> to vector<16x256xbf16>
    %213 = vector.extract_strided_slice %190 {offsets = [1, 0, 0], sizes = [1, 8, 16], strides = [1, 1, 1]} : vector<9x8x16xbf16> to vector<1x8x16xbf16>
    %214 = vector.shape_cast %213 : vector<1x8x16xbf16> to vector<8x16xbf16>
    %cst_56 = arith.constant dense<0.000000e+00> : vector<8x256xf32>
    %215 = tpu.matmul %214, %212, %cst_56 {dimension_numbers = #tpu.dot_dimension_numbers<[1], [0], [0], [1], [0, 0, 1, 1], [], []>} : vector<8x16xbf16>, vector<16x256xbf16>, vector<8x256xf32> -> vector<8x256xf32>
    %216 = arith.addf %211, %215 : vector<8x256xf32>
    %217 = vector.extract_strided_slice %193 {offsets = [0, 2], sizes = [16, 256], strides = [1, 1]} : vector<16x290xbf16> to vector<16x256xbf16>
    %218 = arith.mulf %217, %203 : vector<16x256xbf16>
    %219 = vector.extract_strided_slice %190 {offsets = [2, 0, 0], sizes = [1, 8, 16], strides = [1, 1, 1]} : vector<9x8x16xbf16> to vector<1x8x16xbf16>
    %220 = vector.shape_cast %219 : vector<1x8x16xbf16> to vector<8x16xbf16>
    %cst_57 = arith.constant dense<0.000000e+00> : vector<8x256xf32>
    %221 = tpu.matmul %220, %218, %cst_57 {dimension_numbers = #tpu.dot_dimension_numbers<[1], [0], [0], [1], [0, 0, 1, 1], [], []>} : vector<8x16xbf16>, vector<16x256xbf16>, vector<8x256xf32> -> vector<8x256xf32>
    %222 = arith.addf %216, %221 : vector<8x256xf32>
    %223 = vector.extract_strided_slice %193 {offsets = [0, 16], sizes = [16, 256], strides = [1, 1]} : vector<16x290xbf16> to vector<16x256xbf16>
    %224 = arith.mulf %223, %198 : vector<16x256xbf16>
    %225 = vector.extract_strided_slice %190 {offsets = [3, 0, 0], sizes = [1, 8, 16], strides = [1, 1, 1]} : vector<9x8x16xbf16> to vector<1x8x16xbf16>
    %226 = vector.shape_cast %225 : vector<1x8x16xbf16> to vector<8x16xbf16>
    %cst_58 = arith.constant dense<0.000000e+00> : vector<8x256xf32>
    %227 = tpu.matmul %226, %224, %cst_58 {dimension_numbers = #tpu.dot_dimension_numbers<[1], [0], [0], [1], [0, 0, 1, 1], [], []>} : vector<8x16xbf16>, vector<16x256xbf16>, vector<8x256xf32> -> vector<8x256xf32>
    %228 = arith.addf %222, %227 : vector<8x256xf32>
    %229 = vector.extract_strided_slice %193 {offsets = [0, 17], sizes = [16, 256], strides = [1, 1]} : vector<16x290xbf16> to vector<16x256xbf16>
    %230 = vector.extract_strided_slice %190 {offsets = [4, 0, 0], sizes = [1, 8, 16], strides = [1, 1, 1]} : vector<9x8x16xbf16> to vector<1x8x16xbf16>
    %231 = vector.shape_cast %230 : vector<1x8x16xbf16> to vector<8x16xbf16>
    %cst_59 = arith.constant dense<0.000000e+00> : vector<8x256xf32>
    %232 = tpu.matmul %231, %229, %cst_59 {dimension_numbers = #tpu.dot_dimension_numbers<[1], [0], [0], [1], [0, 0, 1, 1], [], []>} : vector<8x16xbf16>, vector<16x256xbf16>, vector<8x256xf32> -> vector<8x256xf32>
    %233 = arith.addf %228, %232 : vector<8x256xf32>
    %234 = vector.extract_strided_slice %193 {offsets = [0, 18], sizes = [16, 256], strides = [1, 1]} : vector<16x290xbf16> to vector<16x256xbf16>
    %235 = arith.mulf %234, %203 : vector<16x256xbf16>
    %236 = vector.extract_strided_slice %190 {offsets = [5, 0, 0], sizes = [1, 8, 16], strides = [1, 1, 1]} : vector<9x8x16xbf16> to vector<1x8x16xbf16>
    %237 = vector.shape_cast %236 : vector<1x8x16xbf16> to vector<8x16xbf16>
    %cst_60 = arith.constant dense<0.000000e+00> : vector<8x256xf32>
    %238 = tpu.matmul %237, %235, %cst_60 {dimension_numbers = #tpu.dot_dimension_numbers<[1], [0], [0], [1], [0, 0, 1, 1], [], []>} : vector<8x16xbf16>, vector<16x256xbf16>, vector<8x256xf32> -> vector<8x256xf32>
    %239 = arith.addf %233, %238 : vector<8x256xf32>
    %240 = vector.extract_strided_slice %193 {offsets = [0, 32], sizes = [16, 256], strides = [1, 1]} : vector<16x290xbf16> to vector<16x256xbf16>
    %241 = arith.mulf %240, %198 : vector<16x256xbf16>
    %242 = vector.extract_strided_slice %190 {offsets = [6, 0, 0], sizes = [1, 8, 16], strides = [1, 1, 1]} : vector<9x8x16xbf16> to vector<1x8x16xbf16>
    %243 = vector.shape_cast %242 : vector<1x8x16xbf16> to vector<8x16xbf16>
    %cst_61 = arith.constant dense<0.000000e+00> : vector<8x256xf32>
    %244 = tpu.matmul %243, %241, %cst_61 {dimension_numbers = #tpu.dot_dimension_numbers<[1], [0], [0], [1], [0, 0, 1, 1], [], []>} : vector<8x16xbf16>, vector<16x256xbf16>, vector<8x256xf32> -> vector<8x256xf32>
    %245 = arith.addf %239, %244 : vector<8x256xf32>
    %246 = vector.extract_strided_slice %193 {offsets = [0, 33], sizes = [16, 256], strides = [1, 1]} : vector<16x290xbf16> to vector<16x256xbf16>
    %247 = vector.extract_strided_slice %190 {offsets = [7, 0, 0], sizes = [1, 8, 16], strides = [1, 1, 1]} : vector<9x8x16xbf16> to vector<1x8x16xbf16>
    %248 = vector.shape_cast %247 : vector<1x8x16xbf16> to vector<8x16xbf16>
    %cst_62 = arith.constant dense<0.000000e+00> : vector<8x256xf32>
    %249 = tpu.matmul %248, %246, %cst_62 {dimension_numbers = #tpu.dot_dimension_numbers<[1], [0], [0], [1], [0, 0, 1, 1], [], []>} : vector<8x16xbf16>, vector<16x256xbf16>, vector<8x256xf32> -> vector<8x256xf32>
    %250 = arith.addf %245, %249 : vector<8x256xf32>
    %251 = vector.extract_strided_slice %193 {offsets = [0, 34], sizes = [16, 256], strides = [1, 1]} : vector<16x290xbf16> to vector<16x256xbf16>
    %252 = arith.mulf %251, %203 : vector<16x256xbf16>
    %253 = vector.extract_strided_slice %190 {offsets = [8, 0, 0], sizes = [1, 8, 16], strides = [1, 1, 1]} : vector<9x8x16xbf16> to vector<1x8x16xbf16>
    %254 = vector.shape_cast %253 : vector<1x8x16xbf16> to vector<8x16xbf16>
    %cst_63 = arith.constant dense<0.000000e+00> : vector<8x256xf32>
    %255 = tpu.matmul %254, %252, %cst_63 {dimension_numbers = #tpu.dot_dimension_numbers<[1], [0], [0], [1], [0, 0, 1, 1], [], []>} : vector<8x16xbf16>, vector<16x256xbf16>, vector<8x256xf32> -> vector<8x256xf32>
    %256 = arith.addf %250, %255 : vector<8x256xf32>
    %cst_64 = arith.constant 0.000000e+00 : f32
    %257 = vector.broadcast %cst_64 : f32 to vector<8x256xf32>
    %258 = arith.maximumf %256, %257 : vector<8x256xf32>
    %259 = arith.truncf %258 : vector<8x256xf32> to vector<8x256xbf16>
    %c0_65 = arith.constant 0 : index
    %c0_66 = arith.constant 0 : index
    %c0_67 = arith.constant 0 : index
    %260 = vector.load %arg6[%c0_65, %c0_66, %c0_67] : memref<9x1x8xbf16, #tpu.memory_space<vmem>>, vector<9x1x8xbf16>
    %c0_68 = arith.constant 0 : index
    %c0_69 = arith.constant 0 : index
    %261 = vector.load %arg7[%c0_68, %c0_69] : memref<1x1xf32, #tpu.memory_space<vmem>>, vector<1x1xf32>
    %cst_70 = arith.constant 0.000000e+00 : bf16
    %262 = vector.broadcast %cst_70 : bf16 to vector<8x17xbf16>
    %263 = tpu.concatenate %262, %259, %262 in 1 : vector<8x17xbf16>, vector<8x256xbf16>, vector<8x17xbf16> -> vector<8x290xbf16>
    %264 = vector.shape_cast %27 : vector<1x256xi1> to vector<1x256xi1>
    %265 = vector.broadcast %264 : vector<1x256xi1> to vector<8x256xi1>
    %266 = arith.extui %265 : vector<8x256xi1> to vector<8x256xi32>
    %267 = arith.sitofp %266 : vector<8x256xi32> to vector<8x256xf32>
    %268 = arith.truncf %267 : vector<8x256xf32> to vector<8x256xbf16>
    %269 = vector.shape_cast %29 : vector<1x256xi1> to vector<1x256xi1>
    %270 = vector.broadcast %269 : vector<1x256xi1> to vector<8x256xi1>
    %271 = arith.extui %270 : vector<8x256xi1> to vector<8x256xi32>
    %272 = arith.sitofp %271 : vector<8x256xi32> to vector<8x256xf32>
    %273 = arith.truncf %272 : vector<8x256xf32> to vector<8x256xbf16>
    %274 = vector.shape_cast %261 : vector<1x1xf32> to vector<1x1xf32>
    %275 = vector.broadcast %274 : vector<1x1xf32> to vector<1x256xf32>
    %276 = vector.extract_strided_slice %263 {offsets = [0, 0], sizes = [8, 256], strides = [1, 1]} : vector<8x290xbf16> to vector<8x256xbf16>
    %277 = arith.mulf %276, %268 : vector<8x256xbf16>
    %278 = vector.extract_strided_slice %260 {offsets = [0, 0, 0], sizes = [1, 1, 8], strides = [1, 1, 1]} : vector<9x1x8xbf16> to vector<1x1x8xbf16>
    %279 = vector.shape_cast %278 : vector<1x1x8xbf16> to vector<1x8xbf16>
    %cst_71 = arith.constant dense<0.000000e+00> : vector<1x256xf32>
    %280 = tpu.matmul %279, %277, %cst_71 {dimension_numbers = #tpu.dot_dimension_numbers<[1], [0], [0], [1], [0, 0, 1, 1], [], []>} : vector<1x8xbf16>, vector<8x256xbf16>, vector<1x256xf32> -> vector<1x256xf32>
    %281 = arith.addf %275, %280 : vector<1x256xf32>
    %282 = vector.extract_strided_slice %263 {offsets = [0, 1], sizes = [8, 256], strides = [1, 1]} : vector<8x290xbf16> to vector<8x256xbf16>
    %283 = vector.extract_strided_slice %260 {offsets = [1, 0, 0], sizes = [1, 1, 8], strides = [1, 1, 1]} : vector<9x1x8xbf16> to vector<1x1x8xbf16>
    %284 = vector.shape_cast %283 : vector<1x1x8xbf16> to vector<1x8xbf16>
    %cst_72 = arith.constant dense<0.000000e+00> : vector<1x256xf32>
    %285 = tpu.matmul %284, %282, %cst_72 {dimension_numbers = #tpu.dot_dimension_numbers<[1], [0], [0], [1], [0, 0, 1, 1], [], []>} : vector<1x8xbf16>, vector<8x256xbf16>, vector<1x256xf32> -> vector<1x256xf32>
    %286 = arith.addf %281, %285 : vector<1x256xf32>
    %287 = vector.extract_strided_slice %263 {offsets = [0, 2], sizes = [8, 256], strides = [1, 1]} : vector<8x290xbf16> to vector<8x256xbf16>
    %288 = arith.mulf %287, %273 : vector<8x256xbf16>
    %289 = vector.extract_strided_slice %260 {offsets = [2, 0, 0], sizes = [1, 1, 8], strides = [1, 1, 1]} : vector<9x1x8xbf16> to vector<1x1x8xbf16>
    %290 = vector.shape_cast %289 : vector<1x1x8xbf16> to vector<1x8xbf16>
    %cst_73 = arith.constant dense<0.000000e+00> : vector<1x256xf32>
    %291 = tpu.matmul %290, %288, %cst_73 {dimension_numbers = #tpu.dot_dimension_numbers<[1], [0], [0], [1], [0, 0, 1, 1], [], []>} : vector<1x8xbf16>, vector<8x256xbf16>, vector<1x256xf32> -> vector<1x256xf32>
    %292 = arith.addf %286, %291 : vector<1x256xf32>
    %293 = vector.extract_strided_slice %263 {offsets = [0, 16], sizes = [8, 256], strides = [1, 1]} : vector<8x290xbf16> to vector<8x256xbf16>
    %294 = arith.mulf %293, %268 : vector<8x256xbf16>
    %295 = vector.extract_strided_slice %260 {offsets = [3, 0, 0], sizes = [1, 1, 8], strides = [1, 1, 1]} : vector<9x1x8xbf16> to vector<1x1x8xbf16>
    %296 = vector.shape_cast %295 : vector<1x1x8xbf16> to vector<1x8xbf16>
    %cst_74 = arith.constant dense<0.000000e+00> : vector<1x256xf32>
    %297 = tpu.matmul %296, %294, %cst_74 {dimension_numbers = #tpu.dot_dimension_numbers<[1], [0], [0], [1], [0, 0, 1, 1], [], []>} : vector<1x8xbf16>, vector<8x256xbf16>, vector<1x256xf32> -> vector<1x256xf32>
    %298 = arith.addf %292, %297 : vector<1x256xf32>
    %299 = vector.extract_strided_slice %263 {offsets = [0, 17], sizes = [8, 256], strides = [1, 1]} : vector<8x290xbf16> to vector<8x256xbf16>
    %300 = vector.extract_strided_slice %260 {offsets = [4, 0, 0], sizes = [1, 1, 8], strides = [1, 1, 1]} : vector<9x1x8xbf16> to vector<1x1x8xbf16>
    %301 = vector.shape_cast %300 : vector<1x1x8xbf16> to vector<1x8xbf16>
    %cst_75 = arith.constant dense<0.000000e+00> : vector<1x256xf32>
    %302 = tpu.matmul %301, %299, %cst_75 {dimension_numbers = #tpu.dot_dimension_numbers<[1], [0], [0], [1], [0, 0, 1, 1], [], []>} : vector<1x8xbf16>, vector<8x256xbf16>, vector<1x256xf32> -> vector<1x256xf32>
    %303 = arith.addf %298, %302 : vector<1x256xf32>
    %304 = vector.extract_strided_slice %263 {offsets = [0, 18], sizes = [8, 256], strides = [1, 1]} : vector<8x290xbf16> to vector<8x256xbf16>
    %305 = arith.mulf %304, %273 : vector<8x256xbf16>
    %306 = vector.extract_strided_slice %260 {offsets = [5, 0, 0], sizes = [1, 1, 8], strides = [1, 1, 1]} : vector<9x1x8xbf16> to vector<1x1x8xbf16>
    %307 = vector.shape_cast %306 : vector<1x1x8xbf16> to vector<1x8xbf16>
    %cst_76 = arith.constant dense<0.000000e+00> : vector<1x256xf32>
    %308 = tpu.matmul %307, %305, %cst_76 {dimension_numbers = #tpu.dot_dimension_numbers<[1], [0], [0], [1], [0, 0, 1, 1], [], []>} : vector<1x8xbf16>, vector<8x256xbf16>, vector<1x256xf32> -> vector<1x256xf32>
    %309 = arith.addf %303, %308 : vector<1x256xf32>
    %310 = vector.extract_strided_slice %263 {offsets = [0, 32], sizes = [8, 256], strides = [1, 1]} : vector<8x290xbf16> to vector<8x256xbf16>
    %311 = arith.mulf %310, %268 : vector<8x256xbf16>
    %312 = vector.extract_strided_slice %260 {offsets = [6, 0, 0], sizes = [1, 1, 8], strides = [1, 1, 1]} : vector<9x1x8xbf16> to vector<1x1x8xbf16>
    %313 = vector.shape_cast %312 : vector<1x1x8xbf16> to vector<1x8xbf16>
    %cst_77 = arith.constant dense<0.000000e+00> : vector<1x256xf32>
    %314 = tpu.matmul %313, %311, %cst_77 {dimension_numbers = #tpu.dot_dimension_numbers<[1], [0], [0], [1], [0, 0, 1, 1], [], []>} : vector<1x8xbf16>, vector<8x256xbf16>, vector<1x256xf32> -> vector<1x256xf32>
    %315 = arith.addf %309, %314 : vector<1x256xf32>
    %316 = vector.extract_strided_slice %263 {offsets = [0, 33], sizes = [8, 256], strides = [1, 1]} : vector<8x290xbf16> to vector<8x256xbf16>
    %317 = vector.extract_strided_slice %260 {offsets = [7, 0, 0], sizes = [1, 1, 8], strides = [1, 1, 1]} : vector<9x1x8xbf16> to vector<1x1x8xbf16>
    %318 = vector.shape_cast %317 : vector<1x1x8xbf16> to vector<1x8xbf16>
    %cst_78 = arith.constant dense<0.000000e+00> : vector<1x256xf32>
    %319 = tpu.matmul %318, %316, %cst_78 {dimension_numbers = #tpu.dot_dimension_numbers<[1], [0], [0], [1], [0, 0, 1, 1], [], []>} : vector<1x8xbf16>, vector<8x256xbf16>, vector<1x256xf32> -> vector<1x256xf32>
    %320 = arith.addf %315, %319 : vector<1x256xf32>
    %321 = vector.extract_strided_slice %263 {offsets = [0, 34], sizes = [8, 256], strides = [1, 1]} : vector<8x290xbf16> to vector<8x256xbf16>
    %322 = arith.mulf %321, %273 : vector<8x256xbf16>
    %323 = vector.extract_strided_slice %260 {offsets = [8, 0, 0], sizes = [1, 1, 8], strides = [1, 1, 1]} : vector<9x1x8xbf16> to vector<1x1x8xbf16>
    %324 = vector.shape_cast %323 : vector<1x1x8xbf16> to vector<1x8xbf16>
    %cst_79 = arith.constant dense<0.000000e+00> : vector<1x256xf32>
    %325 = tpu.matmul %324, %322, %cst_79 {dimension_numbers = #tpu.dot_dimension_numbers<[1], [0], [0], [1], [0, 0, 1, 1], [], []>} : vector<1x8xbf16>, vector<8x256xbf16>, vector<1x256xf32> -> vector<1x256xf32>
    %326 = arith.addf %320, %325 : vector<1x256xf32>
    %327 = arith.negf %326 : vector<1x256xf32>
    %328 = math.exp %327 : vector<1x256xf32>
    %cst_80 = arith.constant 1.000000e+00 : f32
    %329 = vector.broadcast %cst_80 : f32 to vector<1x256xf32>
    %330 = arith.addf %329, %328 : vector<1x256xf32>
    %331 = arith.divf %329, %330 : vector<1x256xf32>
    %c0_81 = arith.constant 0 : index
    %c0_82 = arith.constant 0 : index
    %c0_83 = arith.constant 0 : index
    %332 = vector.load %arg4[%c0_81, %c0_82, %c0_83] : memref<9x8x16xbf16, #tpu.memory_space<vmem>>, vector<9x8x16xbf16>
    %c0_84 = arith.constant 0 : index
    %c0_85 = arith.constant 0 : index
    %333 = vector.load %arg5[%c0_84, %c0_85] : memref<8x1xf32, #tpu.memory_space<vmem>>, vector<8x1xf32>
    %cst_86 = arith.constant 0.000000e+00 : bf16
    %334 = vector.broadcast %cst_86 : bf16 to vector<16x5xbf16>
    %335 = tpu.concatenate %334, %5, %334 in 1 : vector<16x5xbf16>, vector<16x16xbf16>, vector<16x5xbf16> -> vector<16x26xbf16>
    %336 = vector.shape_cast %48 : vector<1x16xi1> to vector<1x16xi1>
    %337 = vector.broadcast %336 : vector<1x16xi1> to vector<16x16xi1>
    %338 = arith.extui %337 : vector<16x16xi1> to vector<16x16xi32>
    %339 = arith.sitofp %338 : vector<16x16xi32> to vector<16x16xf32>
    %340 = arith.truncf %339 : vector<16x16xf32> to vector<16x16xbf16>
    %341 = vector.shape_cast %50 : vector<1x16xi1> to vector<1x16xi1>
    %342 = vector.broadcast %341 : vector<1x16xi1> to vector<16x16xi1>
    %343 = arith.extui %342 : vector<16x16xi1> to vector<16x16xi32>
    %344 = arith.sitofp %343 : vector<16x16xi32> to vector<16x16xf32>
    %345 = arith.truncf %344 : vector<16x16xf32> to vector<16x16xbf16>
    %346 = vector.shape_cast %333 : vector<8x1xf32> to vector<8x1xf32>
    %347 = vector.broadcast %346 : vector<8x1xf32> to vector<8x16xf32>
    %348 = vector.extract_strided_slice %335 {offsets = [0, 0], sizes = [16, 16], strides = [1, 1]} : vector<16x26xbf16> to vector<16x16xbf16>
    %349 = arith.mulf %348, %340 : vector<16x16xbf16>
    %350 = vector.extract_strided_slice %332 {offsets = [0, 0, 0], sizes = [1, 8, 16], strides = [1, 1, 1]} : vector<9x8x16xbf16> to vector<1x8x16xbf16>
    %351 = vector.shape_cast %350 : vector<1x8x16xbf16> to vector<8x16xbf16>
    %cst_87 = arith.constant dense<0.000000e+00> : vector<8x16xf32>
    %352 = tpu.matmul %351, %349, %cst_87 {dimension_numbers = #tpu.dot_dimension_numbers<[1], [0], [0], [1], [0, 0, 1, 1], [], []>} : vector<8x16xbf16>, vector<16x16xbf16>, vector<8x16xf32> -> vector<8x16xf32>
    %353 = arith.addf %347, %352 : vector<8x16xf32>
    %354 = vector.extract_strided_slice %335 {offsets = [0, 1], sizes = [16, 16], strides = [1, 1]} : vector<16x26xbf16> to vector<16x16xbf16>
    %355 = vector.extract_strided_slice %332 {offsets = [1, 0, 0], sizes = [1, 8, 16], strides = [1, 1, 1]} : vector<9x8x16xbf16> to vector<1x8x16xbf16>
    %356 = vector.shape_cast %355 : vector<1x8x16xbf16> to vector<8x16xbf16>
    %cst_88 = arith.constant dense<0.000000e+00> : vector<8x16xf32>
    %357 = tpu.matmul %356, %354, %cst_88 {dimension_numbers = #tpu.dot_dimension_numbers<[1], [0], [0], [1], [0, 0, 1, 1], [], []>} : vector<8x16xbf16>, vector<16x16xbf16>, vector<8x16xf32> -> vector<8x16xf32>
    %358 = arith.addf %353, %357 : vector<8x16xf32>
    %359 = vector.extract_strided_slice %335 {offsets = [0, 2], sizes = [16, 16], strides = [1, 1]} : vector<16x26xbf16> to vector<16x16xbf16>
    %360 = arith.mulf %359, %345 : vector<16x16xbf16>
    %361 = vector.extract_strided_slice %332 {offsets = [2, 0, 0], sizes = [1, 8, 16], strides = [1, 1, 1]} : vector<9x8x16xbf16> to vector<1x8x16xbf16>
    %362 = vector.shape_cast %361 : vector<1x8x16xbf16> to vector<8x16xbf16>
    %cst_89 = arith.constant dense<0.000000e+00> : vector<8x16xf32>
    %363 = tpu.matmul %362, %360, %cst_89 {dimension_numbers = #tpu.dot_dimension_numbers<[1], [0], [0], [1], [0, 0, 1, 1], [], []>} : vector<8x16xbf16>, vector<16x16xbf16>, vector<8x16xf32> -> vector<8x16xf32>
    %364 = arith.addf %358, %363 : vector<8x16xf32>
    %365 = vector.extract_strided_slice %335 {offsets = [0, 4], sizes = [16, 16], strides = [1, 1]} : vector<16x26xbf16> to vector<16x16xbf16>
    %366 = arith.mulf %365, %340 : vector<16x16xbf16>
    %367 = vector.extract_strided_slice %332 {offsets = [3, 0, 0], sizes = [1, 8, 16], strides = [1, 1, 1]} : vector<9x8x16xbf16> to vector<1x8x16xbf16>
    %368 = vector.shape_cast %367 : vector<1x8x16xbf16> to vector<8x16xbf16>
    %cst_90 = arith.constant dense<0.000000e+00> : vector<8x16xf32>
    %369 = tpu.matmul %368, %366, %cst_90 {dimension_numbers = #tpu.dot_dimension_numbers<[1], [0], [0], [1], [0, 0, 1, 1], [], []>} : vector<8x16xbf16>, vector<16x16xbf16>, vector<8x16xf32> -> vector<8x16xf32>
    %370 = arith.addf %364, %369 : vector<8x16xf32>
    %371 = vector.extract_strided_slice %335 {offsets = [0, 5], sizes = [16, 16], strides = [1, 1]} : vector<16x26xbf16> to vector<16x16xbf16>
    %372 = vector.extract_strided_slice %332 {offsets = [4, 0, 0], sizes = [1, 8, 16], strides = [1, 1, 1]} : vector<9x8x16xbf16> to vector<1x8x16xbf16>
    %373 = vector.shape_cast %372 : vector<1x8x16xbf16> to vector<8x16xbf16>
    %cst_91 = arith.constant dense<0.000000e+00> : vector<8x16xf32>
    %374 = tpu.matmul %373, %371, %cst_91 {dimension_numbers = #tpu.dot_dimension_numbers<[1], [0], [0], [1], [0, 0, 1, 1], [], []>} : vector<8x16xbf16>, vector<16x16xbf16>, vector<8x16xf32> -> vector<8x16xf32>
    %375 = arith.addf %370, %374 : vector<8x16xf32>
    %376 = vector.extract_strided_slice %335 {offsets = [0, 6], sizes = [16, 16], strides = [1, 1]} : vector<16x26xbf16> to vector<16x16xbf16>
    %377 = arith.mulf %376, %345 : vector<16x16xbf16>
    %378 = vector.extract_strided_slice %332 {offsets = [5, 0, 0], sizes = [1, 8, 16], strides = [1, 1, 1]} : vector<9x8x16xbf16> to vector<1x8x16xbf16>
    %379 = vector.shape_cast %378 : vector<1x8x16xbf16> to vector<8x16xbf16>
    %cst_92 = arith.constant dense<0.000000e+00> : vector<8x16xf32>
    %380 = tpu.matmul %379, %377, %cst_92 {dimension_numbers = #tpu.dot_dimension_numbers<[1], [0], [0], [1], [0, 0, 1, 1], [], []>} : vector<8x16xbf16>, vector<16x16xbf16>, vector<8x16xf32> -> vector<8x16xf32>
    %381 = arith.addf %375, %380 : vector<8x16xf32>
    %382 = vector.extract_strided_slice %335 {offsets = [0, 8], sizes = [16, 16], strides = [1, 1]} : vector<16x26xbf16> to vector<16x16xbf16>
    %383 = arith.mulf %382, %340 : vector<16x16xbf16>
    %384 = vector.extract_strided_slice %332 {offsets = [6, 0, 0], sizes = [1, 8, 16], strides = [1, 1, 1]} : vector<9x8x16xbf16> to vector<1x8x16xbf16>
    %385 = vector.shape_cast %384 : vector<1x8x16xbf16> to vector<8x16xbf16>
    %cst_93 = arith.constant dense<0.000000e+00> : vector<8x16xf32>
    %386 = tpu.matmul %385, %383, %cst_93 {dimension_numbers = #tpu.dot_dimension_numbers<[1], [0], [0], [1], [0, 0, 1, 1], [], []>} : vector<8x16xbf16>, vector<16x16xbf16>, vector<8x16xf32> -> vector<8x16xf32>
    %387 = arith.addf %381, %386 : vector<8x16xf32>
    %388 = vector.extract_strided_slice %335 {offsets = [0, 9], sizes = [16, 16], strides = [1, 1]} : vector<16x26xbf16> to vector<16x16xbf16>
    %389 = vector.extract_strided_slice %332 {offsets = [7, 0, 0], sizes = [1, 8, 16], strides = [1, 1, 1]} : vector<9x8x16xbf16> to vector<1x8x16xbf16>
    %390 = vector.shape_cast %389 : vector<1x8x16xbf16> to vector<8x16xbf16>
    %cst_94 = arith.constant dense<0.000000e+00> : vector<8x16xf32>
    %391 = tpu.matmul %390, %388, %cst_94 {dimension_numbers = #tpu.dot_dimension_numbers<[1], [0], [0], [1], [0, 0, 1, 1], [], []>} : vector<8x16xbf16>, vector<16x16xbf16>, vector<8x16xf32> -> vector<8x16xf32>
    %392 = arith.addf %387, %391 : vector<8x16xf32>
    %393 = vector.extract_strided_slice %335 {offsets = [0, 10], sizes = [16, 16], strides = [1, 1]} : vector<16x26xbf16> to vector<16x16xbf16>
    %394 = arith.mulf %393, %345 : vector<16x16xbf16>
    %395 = vector.extract_strided_slice %332 {offsets = [8, 0, 0], sizes = [1, 8, 16], strides = [1, 1, 1]} : vector<9x8x16xbf16> to vector<1x8x16xbf16>
    %396 = vector.shape_cast %395 : vector<1x8x16xbf16> to vector<8x16xbf16>
    %cst_95 = arith.constant dense<0.000000e+00> : vector<8x16xf32>
    %397 = tpu.matmul %396, %394, %cst_95 {dimension_numbers = #tpu.dot_dimension_numbers<[1], [0], [0], [1], [0, 0, 1, 1], [], []>} : vector<8x16xbf16>, vector<16x16xbf16>, vector<8x16xf32> -> vector<8x16xf32>
    %398 = arith.addf %392, %397 : vector<8x16xf32>
    %cst_96 = arith.constant 0.000000e+00 : f32
    %399 = vector.broadcast %cst_96 : f32 to vector<8x16xf32>
    %400 = arith.maximumf %398, %399 : vector<8x16xf32>
    %401 = arith.truncf %400 : vector<8x16xf32> to vector<8x16xbf16>
    %c0_97 = arith.constant 0 : index
    %c0_98 = arith.constant 0 : index
    %c0_99 = arith.constant 0 : index
    %402 = vector.load %arg6[%c0_97, %c0_98, %c0_99] : memref<9x1x8xbf16, #tpu.memory_space<vmem>>, vector<9x1x8xbf16>
    %c0_100 = arith.constant 0 : index
    %c0_101 = arith.constant 0 : index
    %403 = vector.load %arg7[%c0_100, %c0_101] : memref<1x1xf32, #tpu.memory_space<vmem>>, vector<1x1xf32>
    %cst_102 = arith.constant 0.000000e+00 : bf16
    %404 = vector.broadcast %cst_102 : bf16 to vector<8x5xbf16>
    %405 = tpu.concatenate %404, %401, %404 in 1 : vector<8x5xbf16>, vector<8x16xbf16>, vector<8x5xbf16> -> vector<8x26xbf16>
    %406 = vector.shape_cast %48 : vector<1x16xi1> to vector<1x16xi1>
    %407 = vector.broadcast %406 : vector<1x16xi1> to vector<8x16xi1>
    %408 = arith.extui %407 : vector<8x16xi1> to vector<8x16xi32>
    %409 = arith.sitofp %408 : vector<8x16xi32> to vector<8x16xf32>
    %410 = arith.truncf %409 : vector<8x16xf32> to vector<8x16xbf16>
    %411 = vector.shape_cast %50 : vector<1x16xi1> to vector<1x16xi1>
    %412 = vector.broadcast %411 : vector<1x16xi1> to vector<8x16xi1>
    %413 = arith.extui %412 : vector<8x16xi1> to vector<8x16xi32>
    %414 = arith.sitofp %413 : vector<8x16xi32> to vector<8x16xf32>
    %415 = arith.truncf %414 : vector<8x16xf32> to vector<8x16xbf16>
    %416 = vector.shape_cast %403 : vector<1x1xf32> to vector<1x1xf32>
    %417 = vector.broadcast %416 : vector<1x1xf32> to vector<1x16xf32>
    %418 = vector.extract_strided_slice %405 {offsets = [0, 0], sizes = [8, 16], strides = [1, 1]} : vector<8x26xbf16> to vector<8x16xbf16>
    %419 = arith.mulf %418, %410 : vector<8x16xbf16>
    %420 = vector.extract_strided_slice %402 {offsets = [0, 0, 0], sizes = [1, 1, 8], strides = [1, 1, 1]} : vector<9x1x8xbf16> to vector<1x1x8xbf16>
    %421 = vector.shape_cast %420 : vector<1x1x8xbf16> to vector<1x8xbf16>
    %cst_103 = arith.constant dense<0.000000e+00> : vector<1x16xf32>
    %422 = tpu.matmul %421, %419, %cst_103 {dimension_numbers = #tpu.dot_dimension_numbers<[1], [0], [0], [1], [0, 0, 1, 1], [], []>} : vector<1x8xbf16>, vector<8x16xbf16>, vector<1x16xf32> -> vector<1x16xf32>
    %423 = arith.addf %417, %422 : vector<1x16xf32>
    %424 = vector.extract_strided_slice %405 {offsets = [0, 1], sizes = [8, 16], strides = [1, 1]} : vector<8x26xbf16> to vector<8x16xbf16>
    %425 = vector.extract_strided_slice %402 {offsets = [1, 0, 0], sizes = [1, 1, 8], strides = [1, 1, 1]} : vector<9x1x8xbf16> to vector<1x1x8xbf16>
    %426 = vector.shape_cast %425 : vector<1x1x8xbf16> to vector<1x8xbf16>
    %cst_104 = arith.constant dense<0.000000e+00> : vector<1x16xf32>
    %427 = tpu.matmul %426, %424, %cst_104 {dimension_numbers = #tpu.dot_dimension_numbers<[1], [0], [0], [1], [0, 0, 1, 1], [], []>} : vector<1x8xbf16>, vector<8x16xbf16>, vector<1x16xf32> -> vector<1x16xf32>
    %428 = arith.addf %423, %427 : vector<1x16xf32>
    %429 = vector.extract_strided_slice %405 {offsets = [0, 2], sizes = [8, 16], strides = [1, 1]} : vector<8x26xbf16> to vector<8x16xbf16>
    %430 = arith.mulf %429, %415 : vector<8x16xbf16>
    %431 = vector.extract_strided_slice %402 {offsets = [2, 0, 0], sizes = [1, 1, 8], strides = [1, 1, 1]} : vector<9x1x8xbf16> to vector<1x1x8xbf16>
    %432 = vector.shape_cast %431 : vector<1x1x8xbf16> to vector<1x8xbf16>
    %cst_105 = arith.constant dense<0.000000e+00> : vector<1x16xf32>
    %433 = tpu.matmul %432, %430, %cst_105 {dimension_numbers = #tpu.dot_dimension_numbers<[1], [0], [0], [1], [0, 0, 1, 1], [], []>} : vector<1x8xbf16>, vector<8x16xbf16>, vector<1x16xf32> -> vector<1x16xf32>
    %434 = arith.addf %428, %433 : vector<1x16xf32>
    %435 = vector.extract_strided_slice %405 {offsets = [0, 4], sizes = [8, 16], strides = [1, 1]} : vector<8x26xbf16> to vector<8x16xbf16>
    %436 = arith.mulf %435, %410 : vector<8x16xbf16>
    %437 = vector.extract_strided_slice %402 {offsets = [3, 0, 0], sizes = [1, 1, 8], strides = [1, 1, 1]} : vector<9x1x8xbf16> to vector<1x1x8xbf16>
    %438 = vector.shape_cast %437 : vector<1x1x8xbf16> to vector<1x8xbf16>
    %cst_106 = arith.constant dense<0.000000e+00> : vector<1x16xf32>
    %439 = tpu.matmul %438, %436, %cst_106 {dimension_numbers = #tpu.dot_dimension_numbers<[1], [0], [0], [1], [0, 0, 1, 1], [], []>} : vector<1x8xbf16>, vector<8x16xbf16>, vector<1x16xf32> -> vector<1x16xf32>
    %440 = arith.addf %434, %439 : vector<1x16xf32>
    %441 = vector.extract_strided_slice %405 {offsets = [0, 5], sizes = [8, 16], strides = [1, 1]} : vector<8x26xbf16> to vector<8x16xbf16>
    %442 = vector.extract_strided_slice %402 {offsets = [4, 0, 0], sizes = [1, 1, 8], strides = [1, 1, 1]} : vector<9x1x8xbf16> to vector<1x1x8xbf16>
    %443 = vector.shape_cast %442 : vector<1x1x8xbf16> to vector<1x8xbf16>
    %cst_107 = arith.constant dense<0.000000e+00> : vector<1x16xf32>
    %444 = tpu.matmul %443, %441, %cst_107 {dimension_numbers = #tpu.dot_dimension_numbers<[1], [0], [0], [1], [0, 0, 1, 1], [], []>} : vector<1x8xbf16>, vector<8x16xbf16>, vector<1x16xf32> -> vector<1x16xf32>
    %445 = arith.addf %440, %444 : vector<1x16xf32>
    %446 = vector.extract_strided_slice %405 {offsets = [0, 6], sizes = [8, 16], strides = [1, 1]} : vector<8x26xbf16> to vector<8x16xbf16>
    %447 = arith.mulf %446, %415 : vector<8x16xbf16>
    %448 = vector.extract_strided_slice %402 {offsets = [5, 0, 0], sizes = [1, 1, 8], strides = [1, 1, 1]} : vector<9x1x8xbf16> to vector<1x1x8xbf16>
    %449 = vector.shape_cast %448 : vector<1x1x8xbf16> to vector<1x8xbf16>
    %cst_108 = arith.constant dense<0.000000e+00> : vector<1x16xf32>
    %450 = tpu.matmul %449, %447, %cst_108 {dimension_numbers = #tpu.dot_dimension_numbers<[1], [0], [0], [1], [0, 0, 1, 1], [], []>} : vector<1x8xbf16>, vector<8x16xbf16>, vector<1x16xf32> -> vector<1x16xf32>
    %451 = arith.addf %445, %450 : vector<1x16xf32>
    %452 = vector.extract_strided_slice %405 {offsets = [0, 8], sizes = [8, 16], strides = [1, 1]} : vector<8x26xbf16> to vector<8x16xbf16>
    %453 = arith.mulf %452, %410 : vector<8x16xbf16>
    %454 = vector.extract_strided_slice %402 {offsets = [6, 0, 0], sizes = [1, 1, 8], strides = [1, 1, 1]} : vector<9x1x8xbf16> to vector<1x1x8xbf16>
    %455 = vector.shape_cast %454 : vector<1x1x8xbf16> to vector<1x8xbf16>
    %cst_109 = arith.constant dense<0.000000e+00> : vector<1x16xf32>
    %456 = tpu.matmul %455, %453, %cst_109 {dimension_numbers = #tpu.dot_dimension_numbers<[1], [0], [0], [1], [0, 0, 1, 1], [], []>} : vector<1x8xbf16>, vector<8x16xbf16>, vector<1x16xf32> -> vector<1x16xf32>
    %457 = arith.addf %451, %456 : vector<1x16xf32>
    %458 = vector.extract_strided_slice %405 {offsets = [0, 9], sizes = [8, 16], strides = [1, 1]} : vector<8x26xbf16> to vector<8x16xbf16>
    %459 = vector.extract_strided_slice %402 {offsets = [7, 0, 0], sizes = [1, 1, 8], strides = [1, 1, 1]} : vector<9x1x8xbf16> to vector<1x1x8xbf16>
    %460 = vector.shape_cast %459 : vector<1x1x8xbf16> to vector<1x8xbf16>
    %cst_110 = arith.constant dense<0.000000e+00> : vector<1x16xf32>
    %461 = tpu.matmul %460, %458, %cst_110 {dimension_numbers = #tpu.dot_dimension_numbers<[1], [0], [0], [1], [0, 0, 1, 1], [], []>} : vector<1x8xbf16>, vector<8x16xbf16>, vector<1x16xf32> -> vector<1x16xf32>
    %462 = arith.addf %457, %461 : vector<1x16xf32>
    %463 = vector.extract_strided_slice %405 {offsets = [0, 10], sizes = [8, 16], strides = [1, 1]} : vector<8x26xbf16> to vector<8x16xbf16>
    %464 = arith.mulf %463, %415 : vector<8x16xbf16>
    %465 = vector.extract_strided_slice %402 {offsets = [8, 0, 0], sizes = [1, 1, 8], strides = [1, 1, 1]} : vector<9x1x8xbf16> to vector<1x1x8xbf16>
    %466 = vector.shape_cast %465 : vector<1x1x8xbf16> to vector<1x8xbf16>
    %cst_111 = arith.constant dense<0.000000e+00> : vector<1x16xf32>
    %467 = tpu.matmul %466, %464, %cst_111 {dimension_numbers = #tpu.dot_dimension_numbers<[1], [0], [0], [1], [0, 0, 1, 1], [], []>} : vector<1x8xbf16>, vector<8x16xbf16>, vector<1x16xf32> -> vector<1x16xf32>
    %468 = arith.addf %462, %467 : vector<1x16xf32>
    %469 = arith.negf %468 : vector<1x16xf32>
    %470 = math.exp %469 : vector<1x16xf32>
    %cst_112 = arith.constant 1.000000e+00 : f32
    %471 = vector.broadcast %cst_112 : f32 to vector<1x16xf32>
    %472 = arith.addf %471, %470 : vector<1x16xf32>
    %473 = arith.divf %471, %472 : vector<1x16xf32>
    %474 = tpu.concatenate %189, %331 in 0 : vector<1x256xf32>, vector<1x256xf32> -> vector<2x256xf32>
    %c0_113 = arith.constant 0 : index
    %c0_114 = arith.constant 0 : index
    %c0_115 = arith.constant 0 : index
    %475 = vector.load %arg12[%c0_113, %c0_114, %c0_115] : memref<1x2x256xf32, #tpu.memory_space<vmem>>, vector<1x2x256xf32>
    %476 = vector.shape_cast %475 : vector<1x2x256xf32> to vector<2x256xf32>
    %477 = vector.shape_cast %474 : vector<2x256xf32> to vector<1x2x256xf32>
    tpu.vector_store %arg12[%c0_113, %c0_114, %c0_115], %477 {strides = array<i32>} : memref<1x2x256xf32, #tpu.memory_space<vmem>>, vector<1x2x256xf32>,
    %c0_116 = arith.constant 0 : index
    %c0_117 = arith.constant 0 : index
    %c0_118 = arith.constant 0 : index
    %478 = vector.load %arg13[%c0_116, %c0_117, %c0_118] : memref<1x1x16xf32, #tpu.memory_space<vmem>>, vector<1x1x16xf32>
    %479 = vector.shape_cast %478 : vector<1x1x16xf32> to vector<1x16xf32>
    %480 = vector.shape_cast %473 : vector<1x16xf32> to vector<1x1x16xf32>
    tpu.vector_store %arg13[%c0_116, %c0_117, %c0_118], %480 {strides = array<i32>} : memref<1x1x16xf32, #tpu.memory_space<vmem>>, vector<1x1x16xf32>,
    return
  }
  func.func @transform_0(%arg0: i32) -> (i32, i32, i32) {
    %c0_i32 = arith.constant 0 : i32
    %c0_i32_0 = arith.constant 0 : i32
    %c0_i32_1 = arith.constant 0 : i32
    return %arg0, %c0_i32, %c0_i32_0 : i32, i32, i32
  }
  func.func @transform_1(%arg0: i32) -> (i32, i32, i32) {
    %c0_i32 = arith.constant 0 : i32
    %c0_i32_0 = arith.constant 0 : i32
    %c0_i32_1 = arith.constant 0 : i32
    return %arg0, %c0_i32, %c0_i32_0 : i32, i32, i32
  }
  func.func @transform_2(%arg0: i32) -> (i32, i32, i32) {
    %c0_i32 = arith.constant 0 : i32
    %c0_i32_0 = arith.constant 0 : i32
    %c0_i32_1 = arith.constant 0 : i32
    return %arg0, %c0_i32, %c0_i32_0 : i32, i32, i32
  }
  func.func @transform_3(%arg0: i32) -> (i32, i32, i32) {
    %c0_i32 = arith.constant 0 : i32
    %c0_i32_0 = arith.constant 0 : i32
    %c0_i32_1 = arith.constant 0 : i32
    %c0_i32_2 = arith.constant 0 : i32
    return %c0_i32, %c0_i32_0, %c0_i32_1 : i32, i32, i32
  }
  func.func @transform_4(%arg0: i32) -> (i32, i32) {
    %c0_i32 = arith.constant 0 : i32
    %c0_i32_0 = arith.constant 0 : i32
    %c0_i32_1 = arith.constant 0 : i32
    return %c0_i32, %c0_i32_0 : i32, i32
  }
  func.func @transform_5(%arg0: i32) -> (i32, i32, i32) {
    %c0_i32 = arith.constant 0 : i32
    %c0_i32_0 = arith.constant 0 : i32
    %c0_i32_1 = arith.constant 0 : i32
    %c0_i32_2 = arith.constant 0 : i32
    return %c0_i32, %c0_i32_0, %c0_i32_1 : i32, i32, i32
  }
  func.func @transform_6(%arg0: i32) -> (i32, i32) {
    %c0_i32 = arith.constant 0 : i32
    %c0_i32_0 = arith.constant 0 : i32
    %c0_i32_1 = arith.constant 0 : i32
    return %c0_i32, %c0_i32_0 : i32, i32
  }
  func.func @transform_7(%arg0: i32) -> (i32, i32, i32) {
    %c0_i32 = arith.constant 0 : i32
    %c0_i32_0 = arith.constant 0 : i32
    %c0_i32_1 = arith.constant 0 : i32
    %c0_i32_2 = arith.constant 0 : i32
    return %c0_i32, %c0_i32_0, %c0_i32_1 : i32, i32, i32
  }
  func.func @transform_8(%arg0: i32) -> (i32, i32) {
    %c0_i32 = arith.constant 0 : i32
    %c0_i32_0 = arith.constant 0 : i32
    %c0_i32_1 = arith.constant 0 : i32
    return %c0_i32, %c0_i32_0 : i32, i32
  }
  func.func @transform_9(%arg0: i32) -> (i32, i32, i32) {
    %c0_i32 = arith.constant 0 : i32
    %c0_i32_0 = arith.constant 0 : i32
    %c0_i32_1 = arith.constant 0 : i32
    %c0_i32_2 = arith.constant 0 : i32
    return %c0_i32, %c0_i32_0, %c0_i32_1 : i32, i32, i32
  }
  func.func @transform_10(%arg0: i32) -> (i32, i32) {
    %c0_i32 = arith.constant 0 : i32
    %c0_i32_0 = arith.constant 0 : i32
    %c0_i32_1 = arith.constant 0 : i32
    return %c0_i32, %c0_i32_0 : i32, i32
  }
  func.func @transform_11(%arg0: i32) -> (i32, i32, i32) {
    %c0_i32 = arith.constant 0 : i32
    %c0_i32_0 = arith.constant 0 : i32
    %c0_i32_1 = arith.constant 0 : i32
    return %arg0, %c0_i32, %c0_i32_0 : i32, i32, i32
  }
  func.func @transform_12(%arg0: i32) -> (i32, i32, i32) {
    %c0_i32 = arith.constant 0 : i32
    %c0_i32_0 = arith.constant 0 : i32
    %c0_i32_1 = arith.constant 0 : i32
    return %arg0, %c0_i32, %c0_i32_0 : i32, i32, i32
  }
}

</mosaic_0001>

<bundles_post_ra>
// kernel: locate_net_forward.1
= control target key start
LH: loop header
LB: loop body
LE: loop exit
PB: predicated region body
PF: predicated region fallthrough
CT: control target
= control target key end

     0   :  { %s4398_s25 = smov 0   ;;  %s5393_s0 = inlined_call_operand.vmem [shape: f32[2,16,256], index: 0, kind: input, shape index: {}]   ;;  %s5394_s1 = inlined_call_operand.vmem [shape: f32[2,16,16], index: 1, kind: input, shape index: {}]   ;;  %s5395_s2 = inlined_call_operand.vmem [shape: f32[2,16,16], index: 2, kind: input, shape index: {}]   ;;  %s5396_s3 = inlined_call_operand.vmem [shape: bf16[9,8,16], index: 3, kind: input, shape index: {}]   ;;  %s5397_s4 = inlined_call_operand.vmem [shape: f32[8,1], index: 4, kind: input, shape index: {}]   ;;  %s5398_s5 = inlined_call_operand.vmem [shape: bf16[9,1,8], index: 5, kind: input, shape index: {}]   ;;  %s5399_s6 = inlined_call_operand.<no memory space> [shape: f32[1,1], index: 6, kind: input, shape index: {}]   ;;  %s5400_s7 = inlined_call_operand.vmem [shape: bf16[9,8,16], index: 7, kind: input, shape index: {}]   ;;  %s5401_s8 = inlined_call_operand.vmem [shape: f32[8,1], index: 8, kind: input, shape index: {}]   ;;  %s5402_s9 = inlined_call_operand.vmem [shape: bf16[9,1,8], index: 9, kind: input, shape index: {}]   ;;  %s5403_s11 = inlined_call_operand.vmem [shape: f32[2,2,256], index: 11, kind: output, shape index: {0}]   ;;  %s5404_s12 = inlined_call_operand.vmem [shape: f32[2,1,16], index: 12, kind: output, shape index: {1}]   ;;  %s5405_s10 = inlined_call_operand.<no memory space> [shape: f32[1,1], index: 10, kind: input, shape index: {}]  }
   0x1   :  { %v18_v0 = vstv %s5399_s6  ;;  %v20_v1 = vstv %s5405_s10 }
   0x2   :  { %19 = vst [vmem:[#allocation2] sm:$0x1] %v18_v0  ;;  %21 = vst [vmem:[#allocation3] sm:$0x1] %v20_v1 }
   0x3 LB: > { %s3995_s26 = sadd.s32 4294967295, %s4297_s25   ;;  %p3999_p0 = scmp.ge.s32.totalorder %s4297_s25, 1  ;;  %s4297_s25 = sphi %s4398_s25, %s27_s25  }
   0x4   : > { %p389_p1 = scmp.lt.s32.totalorder %s4297_s25, 3 }
   0x6   : > { %p390_p2 = pnand %p3999_p0, %p389_p1 }
   0x8   : > { %393 = sbr.rel (%p390_p2) target bundleno = 2246 (0x8c6), region = 64 }
   0xd   : > { %p444_p3 = scmp.lt.s32.totalorder %s3995_s26, 1  ;;  %v5406_v2 = vlaneseq  ;;  %v5407_v3 = vmov 0   ;;  %v5409_v12 = vmov 0.0   ;;  %vm525_vm3 = vcmask 130048   ;;  %s4301_s15 = smov 2  }
   0xe   : > { %561 = vmatprep.mubr.bf16.mxu0 %v5407_v3  ;;  %4277 = vset.pattern.permute.xlu0 %v5407_v3  ;;  %s4302_s16 = smov 16   ;;  %s4303_s17 = smov 18   ;;  %vm590_vm5 = vcmask 138240   ;;  %v574_v43 = vld [vmem:[%s5400_s7] sm:$0xf]  ;;  %vm739_vm6 = vcmask 15360  }
   0xf   : > { %s5443_s26 = smov (!%p444_p3, %s3995_s26), 1  ;;  %v4411_v4 = vand.u32 127, %v5406_v2  ;;  %663 = vmatprep.mubr.bf16.mxu1 %v5407_v3  ;;  %4278 = vset.pattern.permute.xlu1 %v5407_v3  ;;  %s4304_s18 = smov 32   ;;  %vm1014_vm7 = vcmask 261120   ;;  %vm942_vm8 = vcmask 146432   ;;  %vm1143_vm9 = vcmask 277504  }
  0x10   : > { %s4093_s6 = sshll.u32 %s5443_s26, 5  ;;  %s4094_s29 = sshll.u32 %s5443_s26, 4  ;;  %vm682_vm10 = vcmask 1039360   ;;  %vm756_vm11 = vcmask 1031168   ;;  %vm887_vm12 = vcmask 908288   ;;  %vm830_vm13 = vcmask 916480  }
  0x11   : > { %v487_v5 = vand.u32 15, %v4411_v4  ;;  %v482_v6 = vadd.s32 128, %v4411_v4  ;;  %s448_s28 = scalar_lea.vmem %s5393_s0, %s4093_s6  ;;  %s458_s14 = scalar_lea.vmem %s5395_s2, %s4094_s29  ;;  %vm959_vm14 = vcmask 900096   ;;  %vm1088_vm15 = vcmask 777216  }
  0x12   : > { %v469_v7 = vld [vmem:[%s448_s28 + $0x8] sm:$0xff]  ;;  %v471_v8 = vld [vmem:[%s448_s28 + $0x18] sm:$0xff]  ;;  %v468_v9 = vld [vmem:[%s448_s28] sm:$0xff]  ;;  %s4305_s19 = smov 34   ;;  %s4306_s20 = smov 17  }
  0x13   : > { %vm509_vm0 = vcmp.ne.s32.totalorder %v487_v5, 15  ;;  %v4422_v10 = vpack.c.bf16 %v471_v8, %v469_v7  ;;  %v470_v11 = vld [vmem:[%s448_s28 + $0x10] sm:$0xff]  ;;  %v494_v14 = vand.u32 15, %v482_v6  ;;  %v477_v16 = vld [vmem:[%s458_s14] sm:$0xff]  ;;  %v478_v17 = vld [vmem:[%s458_s14 + $0x8] sm:$0xff]  ;;  %vm507_vm4 = vcmp.ne.s32.totalorder %v487_v5, 0 }
  0x14   : > { %v4011_v13 = vsel %vm509_vm0, 1.0, %v5409_v12  ;;  %v4430_v15 = vpack.c.bf16 %v470_v11, %v468_v9  ;;  %v479_v19 = vpack.c.bf16 %v478_v17, %v477_v16  ;;  %v4009_v29 = vsel %vm507_vm4, 1.0, %v5409_v12  ;;  %s4307_s21 = smov 111   ;;  %s4308_s22 = smov 127   ;;  %v583_v9 = vld [vmem:[%s5401_s8] sm:$0xff] }
  0x15   : > { %v619_v18 = vpack.c.bf16 %v4011_v13, %v4011_v13  ;;  %543 = vmatprep.subr.bf16.mxu0 %v4422_v10  ;;  %vm510_vm1 = vcmp.ne.s32.totalorder %v494_v14, 15  ;;  %vm508_vm2 = vcmp.ne.s32.totalorder %v494_v14, 0  ;;  %v4446_v31 = vpack.c.bf16 %v4009_v29, %v4009_v29  ;;  %s4309_s6 = smov 126   ;;  %s4310_s10 = smov 112  }
  0x16   : > { %544 = vmatpush1.bf16.msra.mxu0 %v4430_v15  ;;  %v4012_v20 = vsel %vm510_vm1, 1.0, %v5409_v12  ;;  %v4010_v22 = vsel %vm508_vm2, 1.0, %v5409_v12  ;;  %s4311_s27 = smov 110   ;;  %s4312_s28 = smov 96   ;;  %vm1031_vm0 = vcmask 785408   ;;  %vm1160_vm1 = vcmask 769024  }
  0x17   : > { %735 = vrot.lane.b32.xlu1 %v619_v18, %s4301_s15  ;;  %v620_v21 = vpack.c.bf16 %v4012_v20, %v4012_v20  ;;  %v4439_v23 = vpack.c.bf16 %v4010_v22, %v4010_v22  ;;  %s4313_s30 = smov 95   ;;  %s4314_s13 = smov 94   ;;  %vm1254_vm2 = vcmask 1043456   ;;  %vm1250_vm4 = vcmask 64512  }
  0x18   : > { %s4318_s23 = smov 8   ;;  %s4319_s24 = smov 10  }
  0x19   : > { %4008 = vmatmul.mubr.msk.bf16.vlgmr.msra.gmra.mxu0 %vm525_vm3, %v479_v19  ;;  %v575_v19 = vld [vmem:[%s5400_s7 + $0x4] sm:$0xf] }
  0x1a   : > { %722 = vmatprep.mubr.bf16.mxu0 %v5407_v3 }
  0x1b   : > { %737 = vrot.lane.b32.xlu1 %v620_v21, %s4301_s15 }
  0x1f   : > { %811 = vrot.lane.b32.xlu1 %v4439_v23, %s4302_s16 }
  0x23   : > { %940 = vrot.lane.b32.xlu1 %v620_v21, %s4303_s17 }
  0x27   : > { %1012 = vrot.lane.b32.xlu1 %v4439_v23, %s4304_s18 }
  0x2b   : > { %1141 = vrot.lane.b32.xlu1 %v620_v21, %s4305_s19 }
  0x89   : > { %v4458_v34 = vpop.permute.xlu1 %735 }
  0x8d   : > { %v4483_v44 = vpop.permute.xlu1 %737 }
  0x8e   : > { %v4492_v46 = vsel %vm739_vm6, %v4458_v34, %v4483_v44 }
  0x91   : > { %v4499_v47 = vpop.permute.xlu1 %811 }
  0x95   : > { %v4513_v53 = vpop.permute.xlu1 %940 }
  0x99   : > { %v4528_v57 = vpop.permute.xlu1 %1012 }
  0x9d   : > { %v4551_v0 = vpop.permute.xlu1 %1141 }
  0xd9   : > { %v563_v24 = vpop.f32.mrf.mxu0 }
  0xdb   : > { %v565_v25 = vpop.f32.mrf.mxu0 }
  0xdd   : > { %v567_v26 = vpop.f32.mrf.mxu0 }
  0xde   : > { %v572_v27 = vpack.c.bf16 %v567_v26, %v563_v24 }
  0xdf   : > { %v569_v28 = vpop.f32.mrf.mxu0 }
  0xe0   : > { %586 = vrot.lane.b32.xlu0 %v572_v27, %s4306_s20  ;;  %v573_v30 = vpack.c.bf16 %v569_v28, %v565_v25 }
  0xe4   : > { %588 = vrot.lane.b32.xlu0 %v573_v30, %s4306_s20 }
  0xe8   : > { %809 = vrot.lane.b32.xlu0 %v4446_v31, %s4302_s16 }
  0xec   : > { %938 = vrot.lane.b32.xlu0 %v619_v18, %s4303_s17  ;;  %s453_s17 = scalar_lea.vmem %s5394_s1, %s4094_s29  ;;  %s4315_s29 = smov 5  }
  0xf0   : > { %1010 = vrot.lane.b32.xlu0 %v4446_v31, %s4304_s18  ;;  %s4316_s18 = smov 4  }
  0xf4   : > { %1139 = vrot.lane.b32.xlu0 %v619_v18, %s4305_s19  ;;  %s4317_s19 = smov 6  }
 0x152   : > { %v587_v32 = vpop.permute.xlu0 %586 }
 0x153   : > { %v4452_v33 = vsel %vm590_vm5, 0, %v587_v32 }
 0x154   : > { %881 = vrot.lane.b32.xlu1 %v4452_v33, %s4307_s21  ;;  %676 = vrot.lane.b32.xlu0 %v4452_v33, %s4308_s22  ;;  %v626_v39 = vmul.bf16 %v4446_v31, %v4452_v33  ;;  %v744_v41 = vmul.bf16 %v4458_v34, %v4452_v33 }
 0x156   : > { %v589_v35 = vpop.permute.xlu0 %588 }
 0x157   : > { %v4461_v36 = vsel %vm590_vm5, %v587_v32, %v589_v35  ;;  %v4464_v37 = vsel %vm590_vm5, %v589_v35, 0 }
 0x158   : > { %680 = vrot.lane.b32.xlu1 %v4464_v37, %s4308_s22  ;;  %678 = vrot.lane.b32.xlu0 %v4461_v36, %s4308_s22  ;;  %v627_v38 = vmul.bf16 %v4439_v23, %v4461_v36  ;;  %v745_v48 = vmul.bf16 %v4492_v46, %v4461_v36  ;;  %v746_v52 = vmul.bf16 %v4483_v44, %v4464_v37 }
 0x159   : > { %v820_v55 = vmul.bf16 %v4499_v47, %v4464_v37  ;;  %v949_v58 = vmul.bf16 %v4513_v53, %v4464_v37  ;;  %v1021_v1 = vmul.bf16 %v4528_v57, %v4464_v37  ;;  %v1150_v8 = vmul.bf16 %v4551_v0, %v4464_v37 }
 0x15a   : > { %645 = vmatprep.subr.bf16.mxu1 %v627_v38  ;;  %v4474_v40 = vpop.permute.xlu0 %809 }
 0x15b   : > { %646 = vmatpush1.bf16.msra.mxu1 %v626_v39  ;;  %v818_v42 = vmul.bf16 %v4474_v40, %v4452_v33  ;;  %v4519_v54 = vsel %vm525_vm3, %v4474_v40, %v4499_v47 }
 0x15c   : > { %750 = vrot.lane.b32.xlu1 %v744_v41, %s4309_s6  ;;  %v819_v56 = vmul.bf16 %v4519_v54, %v4461_v36  ;;  %v577_v41 = vld [vmem:[%s5400_s7 + $0xc] sm:$0xf] }
 0x15d   : > { %824 = vrot.lane.b32.xlu0 %v818_v42, %s4310_s10 }
 0x15e   : > { %v4487_v45 = vpop.permute.xlu0 %938  ;;  %4013 = vmatmul.mubr.msk.bf16.vlgmr.msra.gmra.mxu1 %vm525_vm3, %v574_v43 }
 0x15f   : > { %796 = vmatprep.mubr.bf16.mxu1 %v5407_v3  ;;  %v947_v50 = vmul.bf16 %v4487_v45, %v4452_v33  ;;  %v4539_v60 = vsel %vm942_vm8, %v4487_v45, %v4513_v53  ;;  %vm2994_vm8 = vcmask 171008  }
 0x160   : > { %883 = vrot.lane.b32.xlu1 %v4461_v36, %s4307_s21  ;;  %v948_v62 = vmul.bf16 %v4539_v60, %v4461_v36 }
 0x161   : > { %885 = vrot.lane.b32.xlu0 %v4464_v37, %s4307_s21 }
 0x162   : > { %v4503_v49 = vpop.permute.xlu0 %1010 }
 0x163   : > { %v1019_v51 = vmul.bf16 %v4503_v49, %v4452_v33  ;;  %v4534_v59 = vsel %vm1014_vm7, %v4503_v49, %v4528_v57 }
 0x164   : > { %752 = vrot.lane.b32.xlu1 %v745_v48, %s4309_s6  ;;  %v1020_v61 = vmul.bf16 %v4534_v59, %v4461_v36  ;;  %v578_v48 = vld [vmem:[%s5400_s7 + $0x10] sm:$0xf] }
 0x165   : > { %953 = vrot.lane.b32.xlu0 %v947_v50, %s4311_s27 }
 0x166   : > { %v4547_v63 = vpop.permute.xlu0 %1139 }
 0x167   : > { %v4557_v5 = vsel %vm1143_vm9, %v4547_v63, %v4551_v0  ;;  %v1148_v7 = vmul.bf16 %v4547_v63, %v4452_v33  ;;  %vm4326_vm9 = vmmov 0  }
 0x168   : > { %1025 = vrot.lane.b32.xlu1 %v1019_v51, %s4312_s28  ;;  %v1149_v6 = vmul.bf16 %v4557_v5, %v4461_v36 }
 0x169   : > { %754 = vrot.lane.b32.xlu0 %v746_v52, %s4309_s6 }
 0x16c   : > { %828 = vrot.lane.b32.xlu1 %v820_v55, %s4310_s10 }
 0x16d   : > { %826 = vrot.lane.b32.xlu0 %v819_v56, %s4310_s10  ;;  %v579_v56 = vld [vmem:[%s5400_s7 + $0x14] sm:$0xf] }
 0x170   : > { %957 = vrot.lane.b32.xlu1 %v949_v58, %s4311_s27 }
 0x171   : > { %1084 = vrot.lane.b32.xlu0 %v4461_v36, %s4313_s30 }
 0x174   : > { %1027 = vrot.lane.b32.xlu1 %v1020_v61, %s4312_s28 }
 0x175   : > { %955 = vrot.lane.b32.xlu0 %v948_v62, %s4311_s27 }
 0x178   : > { %1086 = vrot.lane.b32.xlu1 %v4464_v37, %s4313_s30 }
 0x179   : > { %1029 = vrot.lane.b32.xlu0 %v1021_v1, %s4312_s28 }
 0x17c   : > { %1156 = vrot.lane.b32.xlu1 %v1149_v6, %s4314_s13 }
 0x17d   : > { %1082 = vrot.lane.b32.xlu0 %v4452_v33, %s4313_s30  ;;  %v576_v33 = vld [vmem:[%s5400_s7 + $0x8] sm:$0xf] }
 0x180   : > { %1154 = vrot.lane.b32.xlu1 %v1148_v7, %s4314_s13  ;;  %v580_v7 = vld [vmem:[%s5400_s7 + $0x18] sm:$0xf] }
 0x181   : > { %1158 = vrot.lane.b32.xlu0 %v1150_v8, %s4314_s13 }
 0x185   : > { %623 = vperm.xlu0 %4277, %v583_v9  }
 0x189   : > { %1828 = vrot.lane.b32.xlu0 %v4430_v15, %s4306_s20 }
 0x1c6   : > { %v882_v11 = vpop.permute.xlu1 %881  ;;  %v677_v13 = vpop.permute.xlu0 %676 }
 0x1ca   : > { %v681_v14 = vpop.permute.xlu1 %680  ;;  %v679_v16 = vpop.permute.xlu0 %678 }
 0x1cb   : > { %v684_v17 = vsel %vm682_vm10, %v679_v16, %v681_v14  ;;  %v683_v18 = vsel %vm682_vm10, %v677_v13, %v679_v16  ;;  %v581_v13 = vld [vmem:[%s5400_s7 + $0x1c] sm:$0xf] }
 0x1cc   : > { %704 = vmatprep.subr.bf16.mxu0 %v684_v17 }
 0x1cd   : > { %705 = vmatpush1.bf16.msra.mxu0 %v683_v18  ;;  %v582_v18 = vld [vmem:[%s5400_s7 + $0x20] sm:$0xf] }
 0x1ce   : > { %v751_v20 = vpop.permute.xlu1 %750 }
 0x1cf   : > { %v825_v21 = vpop.permute.xlu0 %824 }
 0x1d0   : > { %4014 = vmatmul.mubr.msk.bf16.vlgmr.msra.gmra.mxu0 %vm525_vm3, %v575_v19 }
 0x1d1   : > { %870 = vmatprep.mubr.bf16.mxu0 %v5407_v3 }
 0x1d2   : > { %v884_v15 = vpop.permute.xlu1 %883 }
 0x1d3   : > { %v886_v22 = vpop.permute.xlu0 %885  ;;  %v888_v38 = vsel %vm887_vm12, %v882_v11, %v884_v15 }
 0x1d4   : > { %v889_v32 = vsel %vm887_vm12, %v884_v15, %v886_v22 }
 0x1d6   : > { %v753_v24 = vpop.permute.xlu1 %752 }
 0x1d7   : > { %v954_v25 = vpop.permute.xlu0 %953  ;;  %v757_v29 = vsel %vm756_vm11, %v751_v20, %v753_v24 }
 0x1da   : > { %v1026_v26 = vpop.permute.xlu1 %1025 }
 0x1db   : > { %v755_v27 = vpop.permute.xlu0 %754 }
 0x1dc   : > { %v758_v28 = vsel %vm756_vm11, %v753_v24, %v755_v27 }
 0x1dd   : > { %778 = vmatprep.subr.bf16.mxu1 %v758_v28 }
 0x1de   : > { %v829_v30 = vpop.permute.xlu1 %828  ;;  %779 = vmatpush1.bf16.msra.mxu1 %v757_v29 }
 0x1df   : > { %909 = vmatprep.subr.bf16.mxu1 %v889_v32  ;;  %v827_v35 = vpop.permute.xlu0 %826 }
 0x1e0   : > { %v832_v36 = vsel %vm830_vm13, %v827_v35, %v829_v30  ;;  %v831_v37 = vsel %vm830_vm13, %v825_v21, %v827_v35 }
 0x1e1   : > { %4015 = vmatmul.mubr.msk.bf16.vlgmr.msra.gmra.mxu1 %vm525_vm3, %v576_v33  ;;  %852 = vmatprep.subr.bf16.mxu0 %v832_v36 }
 0x1e2   : > { %v958_v39 = vpop.permute.xlu1 %957  ;;  %853 = vmatpush1.bf16.msra.mxu0 %v831_v37  ;;  %910 = vmatpush1.bf16.msra.mxu1 %v888_v38 }
 0x1e3   : > { %v1085_v42 = vpop.permute.xlu0 %1084  ;;  %927 = vmatprep.mubr.bf16.mxu1 %v5407_v3 }
 0x1e5   : > { %4016 = vmatmul.mubr.msk.bf16.vlgmr.msra.gmra.mxu0 %vm525_vm3, %v577_v41 }
 0x1e6   : > { %v1028_v43 = vpop.permute.xlu1 %1027  ;;  %999 = vmatprep.mubr.bf16.mxu0 %v5407_v3 }
 0x1e7   : > { %v956_v50 = vpop.permute.xlu0 %955  ;;  %v1032_v1 = vsel %vm1031_vm0, %v1026_v26, %v1028_v43 }
 0x1e8   : > { %v961_v51 = vsel %vm959_vm14, %v956_v50, %v958_v39  ;;  %v960_v52 = vsel %vm959_vm14, %v954_v25, %v956_v50 }
 0x1e9   : > { %4017 = vmatmul.mubr.msk.bf16.vlgmr.msra.gmra.mxu1 %vm525_vm3, %v578_v48  ;;  %981 = vmatprep.subr.bf16.mxu0 %v961_v51 }
 0x1ea   : > { %v1087_v55 = vpop.permute.xlu1 %1086  ;;  %982 = vmatpush1.bf16.msra.mxu0 %v960_v52  ;;  %1071 = vmatprep.mubr.bf16.mxu1 %v5407_v3 }
 0x1eb   : > { %v1030_v58 = vpop.permute.xlu0 %1029  ;;  %v1090_v61 = vsel %vm1088_vm15, %v1085_v42, %v1087_v55 }
 0x1ec   : > { %1110 = vmatprep.subr.bf16.mxu0 %v1090_v61  ;;  %v1033_v62 = vsel %vm1031_vm0, %v1028_v43, %v1030_v58 }
 0x1ed   : > { %4018 = vmatmul.mubr.msk.bf16.vlgmr.msra.gmra.mxu0 %vm525_vm3, %v579_v56  ;;  %1053 = vmatprep.subr.bf16.mxu1 %v1033_v62 }
 0x1ee   : > { %v1157_v6 = vpop.permute.xlu1 %1156  ;;  %1054 = vmatpush1.bf16.msra.mxu1 %v1032_v1  ;;  %1128 = vmatprep.mubr.bf16.mxu0 %v5407_v3 }
 0x1ef   : > { %v1083_v8 = vpop.permute.xlu0 %1082 }
 0x1f0   : > { %v1089_v9 = vsel %vm1088_vm15, %v1083_v8, %v1085_v42 }
 0x1f1   : > { %4019 = vmatmul.mubr.msk.bf16.vlgmr.msra.gmra.mxu1 %vm525_vm3, %v580_v7  ;;  %1111 = vmatpush1.bf16.msra.mxu0 %v1089_v9 }
 0x1f2   : > { %v1155_v11 = vpop.permute.xlu1 %1154  ;;  %1200 = vmatprep.mubr.bf16.mxu1 %v5407_v3 }
 0x1f3   : > { %v1159_v14 = vpop.permute.xlu0 %1158  ;;  %v1161_v17 = vsel %vm1160_vm1, %v1155_v11, %v1157_v6 }
 0x1f4   : > { %v1162_v16 = vsel %vm1160_vm1, %v1157_v6, %v1159_v14 }
 0x1f5   : > { %4020 = vmatmul.mubr.msk.bf16.vlgmr.msra.gmra.mxu0 %vm525_vm3, %v581_v13  ;;  %1182 = vmatprep.subr.bf16.mxu1 %v1162_v16 }
 0x1f6   : > { %1183 = vmatpush1.bf16.msra.mxu1 %v1161_v17  ;;  %1293 = vmatprep.mubr.bf16.mxu0 %v5407_v3 }
 0x1f9   : > { %4021 = vmatmul.mubr.msk.bf16.vlgmr.msra.gmra.mxu1 %vm525_vm3, %v582_v18 }
 0x1fa   : > { %1355 = vmatprep.mubr.bf16.mxu1 %v5407_v3 }
 0x200   : > { %v624_v32 = vpop.permute.xlu0 %623 }
 0x21e   : > { %v665_v19 = vpop.f32.mrf.mxu1 }
 0x21f   : > { %v672_v36 = vadd.f32 %v665_v19, %v624_v32 }
 0x220   : > { %v667_v20 = vpop.f32.mrf.mxu1 }
 0x221   : > { %v673_v39 = vadd.f32 %v667_v20, %v624_v32 }
 0x222   : > { %v669_v21 = vpop.f32.mrf.mxu1 }
 0x224   : > { %v670_v15 = vpop.f32.mrf.mxu1 }
 0x290   : > { %v724_v22 = vpop.f32.mrf.mxu0 }
 0x291   : > { %v731_v43 = vadd.f32 %v724_v22, %v672_v36 }
 0x292   : > { %v726_v24 = vpop.f32.mrf.mxu0 }
 0x293   : > { %v732_v51 = vadd.f32 %v726_v24, %v673_v39 }
 0x294   : > { %v728_v25 = vpop.f32.mrf.mxu0 }
 0x296   : > { %v729_v26 = vpop.f32.mrf.mxu0 }
 0x2a1   : > { %v798_v27 = vpop.f32.mrf.mxu1 }
 0x2a2   : > { %v805_v52 = vadd.f32 %v798_v27, %v731_v43 }
 0x2a3   : > { %v800_v28 = vpop.f32.mrf.mxu1 }
 0x2a4   : > { %v806_v58 = vadd.f32 %v800_v28, %v732_v51 }
 0x2a5   : > { %v802_v29 = vpop.f32.mrf.mxu1  ;;  %v872_v30 = vpop.f32.mrf.mxu0 }
 0x2a6   : > { %v879_v61 = vadd.f32 %v872_v30, %v805_v52 }
 0x2a7   : > { %v803_v33 = vpop.f32.mrf.mxu1  ;;  %v874_v35 = vpop.f32.mrf.mxu0 }
 0x2a8   : > { %v880_v6 = vadd.f32 %v874_v35, %v806_v58 }
 0x2a9   : > { %v876_v37 = vpop.f32.mrf.mxu0  ;;  %v929_v38 = vpop.f32.mrf.mxu1 }
 0x2aa   : > { %v936_v7 = vadd.f32 %v929_v38, %v879_v61  ;;  %v1215_v61 = vld [vmem:[%s5402_s9] sm:$0x1] }
 0x2ab   : > { %v877_v41 = vpop.f32.mrf.mxu0  ;;  %v931_v42 = vpop.f32.mrf.mxu1 }
 0x2ac   : > { %v937_v11 = vadd.f32 %v931_v42, %v880_v6 }
 0x2ad   : > { %v933_v48 = vpop.f32.mrf.mxu1  ;;  %v1001_v50 = vpop.f32.mrf.mxu0 }
 0x2ae   : > { %v1008_v13 = vadd.f32 %v1001_v50, %v936_v7  ;;  %v1829_v50 = vpop.permute.xlu0 %1828 }
 0x2af   : > { %v934_v55 = vpop.f32.mrf.mxu1  ;;  %v1003_v56 = vpop.f32.mrf.mxu0 }
 0x2b0   : > { %v1009_v17 = vadd.f32 %v1003_v56, %v937_v11 }
 0x2b1   : > { %v1005_v62 = vpop.f32.mrf.mxu0  ;;  %v1073_v1 = vpop.f32.mrf.mxu1 }
 0x2b2   : > { %v1080_v18 = vadd.f32 %v1073_v1, %v1008_v13 }
 0x2b3   : > { %v1006_v8 = vpop.f32.mrf.mxu0  ;;  %v1075_v9 = vpop.f32.mrf.mxu1 }
 0x2b4   : > { %v1081_v21 = vadd.f32 %v1075_v9, %v1009_v17 }
 0x2b5   : > { %v1077_v14 = vpop.f32.mrf.mxu1  ;;  %v1130_v16 = vpop.f32.mrf.mxu0 }
 0x2b6   : > { %v1137_v15 = vadd.f32 %v1130_v16, %v1080_v18  ;;  %v4700_v18 = vsel %vm590_vm5, 0, %v1829_v50 }
 0x2b7   : > { %v1078_v19 = vpop.f32.mrf.mxu1  ;;  %v1132_v20 = vpop.f32.mrf.mxu0 }
 0x2b8   : > { %v1138_v25 = vadd.f32 %v1132_v20, %v1081_v21  ;;  %v1951_v20 = vmul.bf16 %v4700_v18, %v4458_v34 }
 0x2b9   : > { %v1134_v22 = vpop.f32.mrf.mxu0  ;;  %v1202_v24 = vpop.f32.mrf.mxu1 }
 0x2ba   : > { %v1209_v26 = vadd.f32 %v1202_v24, %v1137_v15 }
 0x2bb   : > { %v1135_v27 = vpop.f32.mrf.mxu0  ;;  %v1204_v28 = vpop.f32.mrf.mxu1 }
 0x2bc   : > { %v1211_v29 = vmax.f32 %v1209_v26, 0.0  ;;  %v1210_v30 = vadd.f32 %v1204_v28, %v1138_v25  ;;  %v2013_v27 = vmul.bf16 %v4700_v18, %v4474_v40 }
 0x2bd   : > { %v1206_v32 = vpop.f32.mrf.mxu1 }
 0x2be   : > { %v1213_v33 = vpack.c.bf16 %v1211_v29, %v1211_v29  ;;  %v1212_v35 = vmax.f32 %v1210_v30, 0.0  ;;  %v2193_v32 = vmul.bf16 %v4700_v18, %v4503_v49 }
 0x2bf   : > { %v1207_v36 = vpop.f32.mrf.mxu1 }
 0x2c0   : > { %1227 = vrot.lane.b32.xlu1 %v1213_v33, %s4306_s20  ;;  %v1214_v37 = vpack.c.bf16 %v1212_v35, %v1212_v35  ;;  %v2131_v33 = vmul.bf16 %v4700_v18, %v4487_v45 }
 0x2c4   : > { %1229 = vrot.lane.b32.xlu1 %v1214_v37, %s4306_s20  ;;  %v2311_v37 = vmul.bf16 %v4700_v18, %v4547_v63 }
 0x2c8   : > { %1830 = vrot.lane.b32.xlu1 %v4422_v10, %s4306_s20 }
 0x332   : > { %v1228_v38 = vpop.permute.xlu1 %1227 }
 0x333   : > { %v1234_v39 = vsel %vm590_vm5, 0, %v1228_v38 }
 0x334   : > { %1498 = vrot.lane.b32.xlu1 %v1234_v39, %s4307_s21  ;;  %v1248_v42 = vmul.bf16 %v1234_v39, %v4446_v31  ;;  %v1366_v52 = vmul.bf16 %v1234_v39, %v4458_v34  ;;  %v1624_v58 = vmul.bf16 %v1234_v39, %v4503_v49  ;;  %v1750_v62 = vmul.bf16 %v1234_v39, %v4547_v63 }
 0x335   : > { %v1432_v1 = vmul.bf16 %v1234_v39, %v4474_v40  ;;  %v1558_v8 = vmul.bf16 %v1234_v39, %v4487_v45 }
 0x336   : > { %v1230_v41 = vpop.permute.xlu1 %1229  ;;  %v1256_v51 = vsel %vm1254_vm2, %v1248_v42, 0 }
 0x337   : > { %v4642_v43 = vsel %vm590_vm5, %v1228_v38, %v1230_v41  ;;  %v1237_v56 = vsel %vm590_vm5, %v1230_v41, 0 }
 0x338   : > { %1308 = vrot.lane.b32.xlu1 %v4642_v43, %s4308_s22  ;;  %v1249_v48 = vmul.bf16 %v4642_v43, %v4439_v23  ;;  %v1368_v6 = vmul.bf16 %v1237_v56, %v4483_v44  ;;  %v1433_v7 = vmul.bf16 %v4642_v43, %v4519_v54  ;;  %v1559_v11 = vmul.bf16 %v4642_v43, %v4539_v60 }
 0x339   : > { %v1367_v13 = vmul.bf16 %v4642_v43, %v4492_v46  ;;  %v1434_v14 = vmul.bf16 %v1237_v56, %v4499_v47  ;;  %v1626_v17 = vmul.bf16 %v1237_v56, %v4528_v57  ;;  %v1560_v19 = vmul.bf16 %v1237_v56, %v4513_v53 }
 0x33a   : > { %4022 = vmatprep.subr.msk.bf16.mxu0 %vm1254_vm2, %v1249_v48  ;;  %v1831_v10 = vpop.permute.xlu1 %1830  ;;  %v1625_v21 = vmul.bf16 %v4642_v43, %v4534_v59  ;;  %v1752_v15 = vmul.bf16 %v1237_v56, %v4551_v0  ;;  %v1751_v25 = vmul.bf16 %v4642_v43, %v4557_v5 }
 0x33b   : > { %v4652_v55 = vsel %vm590_vm5, %v1829_v50, %v1831_v10  ;;  %1276 = vmatpush1.bf16.msra.mxu0 %v1256_v51  ;;  %v1838_v9 = vsel %vm590_vm5, %v1831_v10, 0 }
 0x33c   : > { %1372 = vrot.lane.b32.xlu1 %v1366_v52, %s4309_s6  ;;  %1897 = vrot.lane.b32.xlu0 %v4652_v55, %s4308_s22  ;;  %v1952_v16 = vmul.bf16 %v4652_v55, %v4492_v46  ;;  %v1953_v22 = vmul.bf16 %v1838_v9, %v4483_v44  ;;  %v2015_v24 = vmul.bf16 %v1838_v9, %v4499_v47 }
 0x33d   : > { %v2014_v26 = vmul.bf16 %v4652_v55, %v4519_v54  ;;  %v2133_v28 = vmul.bf16 %v1838_v9, %v4513_v53  ;;  %v2194_v29 = vmul.bf16 %v4652_v55, %v4534_v59  ;;  %v2132_v30 = vmul.bf16 %v4652_v55, %v4539_v60 }
 0x33e   : > { %4023 = vmatmul.mubr.msk.bf16.vlgmr.msra.gmra.mxu0 %vm1250_vm4, %v1215_v61  ;;  %v2195_v35 = vmul.bf16 %v1838_v9, %v4528_v57  ;;  %v2312_v36 = vmul.bf16 %v4652_v55, %v4557_v5  ;;  %v2313_v38 = vmul.bf16 %v1838_v9, %v4551_v0 }
 0x33f   : > { %1421 = vmatprep.mubr.bf16.mxu0 %v5407_v3 }
 0x340   : > { %1502 = vrot.lane.b32.xlu1 %v1237_v56, %s4307_s21  ;;  %1306 = vrot.lane.b32.xlu0 %v1234_v39, %s4308_s22 }
 0x344   : > { %1630 = vrot.lane.b32.xlu1 %v1624_v58, %s4312_s28  ;;  %1690 = vrot.lane.b32.xlu0 %v1234_v39, %s4313_s30  ;;  %v1825_v39 = vld [vmem:[%s5397_s4] sm:$0xff] }
 0x348   : > { %1692 = vrot.lane.b32.xlu1 %v4642_v43, %s4313_s30  ;;  %1310 = vrot.lane.b32.xlu0 %v1237_v56, %s4308_s22 }
 0x34c   : > { %1756 = vrot.lane.b32.xlu1 %v1750_v62, %s4314_s13  ;;  %1438 = vrot.lane.b32.xlu0 %v1432_v1, %s4310_s10 }
 0x350   : > { %1376 = vrot.lane.b32.xlu1 %v1368_v6, %s4309_s6  ;;  %1500 = vrot.lane.b32.xlu0 %v4642_v43, %s4307_s21  ;;  %v1216_v6 = vld [vmem:[%s5402_s9 + $0x1] sm:$0x1] }
 0x354   : > { %1440 = vrot.lane.b32.xlu1 %v1433_v7, %s4310_s10  ;;  %1564 = vrot.lane.b32.xlu0 %v1558_v8, %s4311_s27 }
 0x358   : > { %1899 = vrot.lane.b32.xlu1 %v1838_v9, %s4308_s22  ;;  %1694 = vrot.lane.b32.xlu0 %v1237_v56, %s4313_s30 }
 0x35c   : > { %1566 = vrot.lane.b32.xlu1 %v1559_v11, %s4311_s27  ;;  %1374 = vrot.lane.b32.xlu0 %v1367_v13, %s4309_s6 }
 0x360   : > { %1442 = vrot.lane.b32.xlu0 %v1434_v14, %s4310_s10  ;;  %1959 = vrot.lane.b32.xlu1 %v1952_v16, %s4309_s6 }
 0x364   : > { %1895 = vrot.lane.b32.xlu0 %v4700_v18, %s4308_s22  ;;  %1634 = vrot.lane.b32.xlu1 %v1626_v17, %s4312_s28 }
 0x368   : > { %1568 = vrot.lane.b32.xlu0 %v1560_v19, %s4311_s27  ;;  %1957 = vrot.lane.b32.xlu1 %v1951_v20, %s4309_s6 }
 0x36c   : > { %1632 = vrot.lane.b32.xlu0 %v1625_v21, %s4312_s28  ;;  %1760 = vrot.lane.b32.xlu1 %v1752_v15, %s4314_s13 }
 0x370   : > { %1961 = vrot.lane.b32.xlu0 %v1953_v22, %s4309_s6  ;;  %2023 = vrot.lane.b32.xlu1 %v2015_v24, %s4310_s10 }
 0x374   : > { %1758 = vrot.lane.b32.xlu0 %v1751_v25, %s4314_s13  ;;  %2077 = vrot.lane.b32.xlu1 %v4652_v55, %s4307_s21 }
 0x378   : > { %2021 = vrot.lane.b32.xlu0 %v2014_v26, %s4310_s10  ;;  %2075 = vrot.lane.b32.xlu1 %v4700_v18, %s4307_s21 }
 0x37c   : > { %2019 = vrot.lane.b32.xlu0 %v2013_v27, %s4310_s10  ;;  %2141 = vrot.lane.b32.xlu1 %v2133_v28, %s4311_s27  ;;  %v1217_v27 = vld [vmem:[%s5402_s9 + $0x2] sm:$0x1] }
 0x380   : > { %2079 = vrot.lane.b32.xlu0 %v1838_v9, %s4307_s21  ;;  %2201 = vrot.lane.b32.xlu1 %v2194_v29, %s4312_s28 }
 0x384   : > { %2139 = vrot.lane.b32.xlu0 %v2132_v30, %s4311_s27  ;;  %2199 = vrot.lane.b32.xlu1 %v2193_v32, %s4312_s28 }
 0x388   : > { %2137 = vrot.lane.b32.xlu0 %v2131_v33, %s4311_s27  ;;  %2259 = vrot.lane.b32.xlu1 %v1838_v9, %s4313_s30 }
 0x38c   : > { %2203 = vrot.lane.b32.xlu0 %v2195_v35, %s4312_s28  ;;  %2319 = vrot.lane.b32.xlu1 %v2312_v36, %s4314_s13  ;;  %v1218_v35 = vld [vmem:[%s5402_s9 + $0x3] sm:$0x1] }
 0x390   : > { %2257 = vrot.lane.b32.xlu0 %v4652_v55, %s4313_s30  ;;  %2317 = vrot.lane.b32.xlu1 %v2311_v37, %s4314_s13 }
 0x394   : > { %2255 = vrot.lane.b32.xlu0 %v4700_v18, %s4313_s30 }
 0x398   : > { %2321 = vrot.lane.b32.xlu0 %v2313_v38, %s4314_s13 }
 0x39c   : > { %1842 = vperm.xlu0 %4277, %v1825_v39   ;;  %v1219_v39 = vld [vmem:[%s5402_s9 + $0x4] sm:$0x1] }
 0x3a6   : > { %v1499_v41 = vpop.permute.xlu1 %1498 }
 0x3aa   : > { %v1309_v42 = vpop.permute.xlu1 %1308 }
 0x3ae   : > { %v1373_v43 = vpop.permute.xlu1 %1372  ;;  %v4765_v48 = vpop.permute.xlu0 %1897 }
 0x3b2   : > { %v1503_v50 = vpop.permute.xlu1 %1502  ;;  %v1307_v10 = vpop.permute.xlu0 %1306 }
 0x3b3   : > { %v1312_v56 = vsel %vm682_vm10, %v1307_v10, %v1309_v42 }
 0x3b4   : > { %v1318_v1 = vsel %vm1254_vm2, %v1312_v56, 0 }
 0x3b6   : > { %v4767_v51 = vpop.permute.xlu1 %1630  ;;  %v1691_v52 = vpop.permute.xlu0 %1690 }
 0x3ba   : > { %v1693_v58 = vpop.permute.xlu1 %1692  ;;  %v1311_v61 = vpop.permute.xlu0 %1310 }
 0x3bb   : > { %v1313_v62 = vsel %vm682_vm10, %v1309_v42, %v1311_v61  ;;  %v1696_v10 = vsel %vm1088_vm15, %v1691_v52, %v1693_v58  ;;  %v1220_v61 = vld [vmem:[%s5402_s9 + $0x5] sm:$0x1] }
 0x3bc   : > { %4024 = vmatprep.subr.msk.bf16.mxu1 %vm1254_vm2, %v1313_v62  ;;  %v1702_v52 = vsel %vm1254_vm2, %v1696_v10, 0 }
 0x3bd   : > { %1338 = vmatpush1.bf16.msra.mxu1 %v1318_v1 }
 0x3be   : > { %v4776_v7 = vpop.permute.xlu1 %1756  ;;  %v1439_v8 = vpop.permute.xlu0 %1438 }
 0x3c0   : > { %4025 = vmatmul.mubr.msk.bf16.vlgmr.msra.gmra.mxu1 %vm1250_vm4, %v1216_v6 }
 0x3c1   : > { %1487 = vmatprep.mubr.bf16.mxu1 %v5407_v3 }
 0x3c2   : > { %v1377_v9 = vpop.permute.xlu1 %1376  ;;  %v1501_v11 = vpop.permute.xlu0 %1500 }
 0x3c3   : > { %v1504_v24 = vsel %vm887_vm12, %v1499_v41, %v1501_v11  ;;  %v1505_v25 = vsel %vm887_vm12, %v1501_v11, %v1503_v50  ;;  %v1221_v11 = vld [vmem:[%s5402_s9 + $0x6] sm:$0x1] }
 0x3c4   : > { %v1510_v32 = vsel %vm1254_vm2, %v1504_v24, 0  ;;  %v1223_v24 = vld [vmem:[%s5402_s9 + $0x8] sm:$0x1] }
 0x3c6   : > { %v1441_v13 = vpop.permute.xlu1 %1440  ;;  %v1565_v14 = vpop.permute.xlu0 %1564 }
 0x3c7   : > { %v1444_v26 = vsel %vm830_vm13, %v1439_v8, %v1441_v13 }
 0x3c8   : > { %v1450_v33 = vsel %vm1254_vm2, %v1444_v26, 0 }
 0x3ca   : > { %v4780_v16 = vpop.permute.xlu1 %1899  ;;  %v1695_v17 = vpop.permute.xlu0 %1694 }
 0x3cb   : > { %v1697_v56 = vsel %vm1088_vm15, %v1693_v58, %v1695_v17 }
 0x3ce   : > { %v1567_v19 = vpop.permute.xlu1 %1566  ;;  %v1375_v20 = vpop.permute.xlu0 %1374 }
 0x3cf   : > { %v1378_v21 = vsel %vm756_vm11, %v1373_v43, %v1375_v20  ;;  %v1379_v15 = vsel %vm756_vm11, %v1375_v20, %v1377_v9  ;;  %v1570_v38 = vsel %vm959_vm14, %v1565_v14, %v1567_v19  ;;  %v1846_v9 = vmul.bf16 %v4652_v55, %v4439_v23  ;;  %v1222_v14 = vld [vmem:[%s5402_s9 + $0x7] sm:$0x1] }
 0x3d0   : > { %v1384_v22 = vsel %vm1254_vm2, %v1378_v21, 0  ;;  %4026 = vmatprep.subr.msk.bf16.mxu0 %vm1254_vm2, %v1379_v15  ;;  %v1576_v50 = vsel %vm1254_vm2, %v1570_v38, 0  ;;  %v1845_v21 = vmul.bf16 %v4700_v18, %v4446_v31 }
 0x3d1   : > { %1404 = vmatpush1.bf16.msra.mxu0 %v1384_v22 }
 0x3d2   : > { %4030 = vmatprep.subr.msk.bf16.mxu0 %vm1254_vm2, %v1505_v25  ;;  %v1443_v28 = vpop.permute.xlu0 %1442  ;;  %v4793_v29 = vpop.permute.xlu1 %1959 }
 0x3d3   : > { %v1445_v30 = vsel %vm830_vm13, %v1441_v13, %v1443_v28 }
 0x3d4   : > { %4027 = vmatmul.mubr.msk.bf16.vlgmr.msra.gmra.mxu0 %vm1250_vm4, %v1217_v27  ;;  %4028 = vmatprep.subr.msk.bf16.mxu1 %vm1254_vm2, %v1445_v30 }
 0x3d5   : > { %1470 = vmatpush1.bf16.msra.mxu1 %v1450_v33  ;;  %1530 = vmatpush1.bf16.msra.mxu0 %v1510_v32 }
 0x3d6   : > { %v1896_v36 = vpop.permute.xlu0 %1895  ;;  %v1635_v37 = vpop.permute.xlu1 %1634  ;;  %1547 = vmatprep.mubr.bf16.mxu0 %v5407_v3 }
 0x3d7   : > { %v1901_v26 = vsel %vm682_vm10, %v1896_v36, %v4765_v48 }
 0x3d8   : > { %4029 = vmatmul.mubr.msk.bf16.vlgmr.msra.gmra.mxu1 %vm1250_vm4, %v1218_v35 }
 0x3d9   : > { %1613 = vmatprep.mubr.bf16.mxu1 %v5407_v3 }
 0x3da   : > { %v1569_v41 = vpop.permute.xlu0 %1568  ;;  %v1958_v42 = vpop.permute.xlu1 %1957 }
 0x3db   : > { %v1571_v43 = vsel %vm959_vm14, %v1567_v19, %v1569_v41  ;;  %v1963_v32 = vsel %vm756_vm11, %v1958_v42, %v4793_v29 }
 0x3dc   : > { %4031 = vmatmul.mubr.msk.bf16.vlgmr.msra.gmra.mxu0 %vm1250_vm4, %v1219_v39  ;;  %4032 = vmatprep.subr.msk.bf16.mxu1 %vm1254_vm2, %v1571_v43  ;;  %v4893_v43 = vld [vmem:[%s5396_s3 + $0xc] sm:$0xf] }
 0x3dd   : > { %1596 = vmatpush1.bf16.msra.mxu1 %v1576_v50  ;;  %1679 = vmatprep.mubr.bf16.mxu0 %v5407_v3 }
 0x3de   : > { %4036 = vmatprep.subr.msk.bf16.mxu1 %vm1254_vm2, %v1697_v56  ;;  %v1633_v62 = vpop.permute.xlu0 %1632  ;;  %v1761_v1 = vpop.permute.xlu1 %1760 }
 0x3df   : > { %v1636_v6 = vsel %vm1031_vm0, %v4767_v51, %v1633_v62  ;;  %v1637_v8 = vsel %vm1031_vm0, %v1633_v62, %v1635_v37 }
 0x3e0   : > { %v1642_v58 = vsel %vm1254_vm2, %v1636_v6, 0  ;;  %4033 = vmatmul.mubr.msk.bf16.vlgmr.msra.gmra.mxu1 %vm1250_vm4, %v1220_v61  ;;  %4034 = vmatprep.subr.msk.bf16.mxu0 %vm1254_vm2, %v1637_v8  ;;  %v4902_v61 = vld [vmem:[%s5396_s3 + $0x10] sm:$0xf]  ;;  %v4912_v8 = vld [vmem:[%s5396_s3 + $0x14] sm:$0xf] }
 0x3e1   : > { %1662 = vmatpush1.bf16.msra.mxu0 %v1642_v58  ;;  %1722 = vmatpush1.bf16.msra.mxu1 %v1702_v52 }
 0x3e2   : > { %v1962_v51 = vpop.permute.xlu0 %1961  ;;  %v2024_v13 = vpop.permute.xlu1 %2023  ;;  %1864 = vmatprep.subr.bf16.mxu1 %v1846_v9  ;;  %1739 = vmatprep.mubr.bf16.mxu1 %v5407_v3 }
 0x3e3   : > { %v1964_v22 = vsel %vm756_vm11, %v4793_v29, %v1962_v51  ;;  %v4883_v29 = vld [vmem:[%s5396_s3 + $0x8] sm:$0xf] }
 0x3e4   : > { %4035 = vmatmul.mubr.msk.bf16.vlgmr.msra.gmra.mxu0 %vm1250_vm4, %v1221_v11  ;;  %v4921_v11 = vld [vmem:[%s5396_s3 + $0x18] sm:$0xf] }
 0x3e5   : > { %1805 = vmatprep.mubr.bf16.mxu0 %v5407_v3 }
 0x3e6   : > { %v1759_v55 = vpop.permute.xlu0 %1758  ;;  %v2078_v17 = vpop.permute.xlu1 %2077 }
 0x3e7   : > { %v1762_v19 = vsel %vm1160_vm1, %v4776_v7, %v1759_v55  ;;  %v1763_v20 = vsel %vm1160_vm1, %v1759_v55, %v1761_v1  ;;  %v1902_v7 = vsel %vm682_vm10, %v4765_v48, %v4780_v16  ;;  %v4863_v16 = vld [vmem:[%s5396_s3] sm:$0xf]  ;;  %v4873_v48 = vld [vmem:[%s5396_s3 + $0x4] sm:$0xf]  ;;  %v4930_v55 = vld [vmem:[%s5396_s3 + $0x1c] sm:$0xf] }
 0x3e8   : > { %v1768_v15 = vsel %vm1254_vm2, %v1762_v19, 0  ;;  %4037 = vmatmul.mubr.msk.bf16.vlgmr.msra.gmra.mxu1 %vm1250_vm4, %v1222_v14  ;;  %4038 = vmatprep.subr.msk.bf16.mxu0 %vm1254_vm2, %v1763_v20 }
 0x3e9   : > { %1865 = vmatpush1.bf16.msra.mxu1 %v1845_v21  ;;  %1788 = vmatpush1.bf16.msra.mxu0 %v1768_v15 }
 0x3ea   : > { %1984 = vmatprep.subr.bf16.mxu1 %v1964_v22  ;;  %v2022_v18 = vpop.permute.xlu0 %2021  ;;  %1922 = vmatprep.subr.bf16.mxu0 %v1902_v7  ;;  %v2076_v25 = vpop.permute.xlu1 %2075  ;;  %v4944_v22 = vld [vmem:[%s5396_s3 + $0x20] sm:$0xf] }
 0x3eb   : > { %1882 = vmatprep.mubr.bf16.mxu1 %v5407_v3  ;;  %v2026_v27 = vsel %vm830_vm13, %v2022_v18, %v2024_v13  ;;  %v2081_v42 = vsel %vm887_vm12, %v2076_v25, %v2078_v17 }
 0x3ec   : > { %4039 = vmatmul.mubr.msk.bf16.vlgmr.msra.gmra.mxu0 %vm1250_vm4, %v1223_v24 }
 0x3ed   : > { %1923 = vmatpush1.bf16.msra.mxu0 %v1901_v26  ;;  %1940 = vmatprep.mubr.bf16.mxu0 %v5407_v3 }
 0x3ee   : > { %v2020_v28 = vpop.permute.xlu0 %2019  ;;  %2046 = vmatprep.subr.bf16.mxu0 %v2026_v27  ;;  %v2142_v30 = vpop.permute.xlu1 %2141 }
 0x3ef   : > { %v2025_v37 = vsel %vm830_vm13, %v2020_v28, %v2022_v18 }
 0x3f0   : > { %4040 = vmatmul.mubr.msk.bf16.vlgmr.msra.gmra.mxu1 %vm525_vm3, %v4863_v16 }
 0x3f1   : > { %1985 = vmatpush1.bf16.msra.mxu1 %v1963_v32  ;;  %2002 = vmatprep.mubr.bf16.mxu1 %v5407_v3 }
 0x3f2   : > { %v2080_v33 = vpop.permute.xlu0 %2079  ;;  %v2202_v35 = vpop.permute.xlu1 %2201 }
 0x3f3   : > { %v2082_v36 = vsel %vm887_vm12, %v2078_v17, %v2080_v33 }
 0x3f4   : > { %4041 = vmatmul.mubr.msk.bf16.vlgmr.msra.gmra.mxu0 %vm525_vm3, %v4873_v48  ;;  %2102 = vmatprep.subr.bf16.mxu1 %v2082_v36 }
 0x3f5   : > { %2047 = vmatpush1.bf16.msra.mxu0 %v2025_v37  ;;  %2064 = vmatprep.mubr.bf16.mxu0 %v5407_v3 }
 0x3f6   : > { %v2140_v38 = vpop.permute.xlu0 %2139  ;;  %v2200_v39 = vpop.permute.xlu1 %2199 }
 0x3f7   : > { %v2144_v41 = vsel %vm959_vm14, %v2140_v38, %v2142_v30  ;;  %v2205_v6 = vsel %vm1031_vm0, %v2200_v39, %v2202_v35 }
 0x3f8   : > { %4042 = vmatmul.mubr.msk.bf16.vlgmr.msra.gmra.mxu1 %vm525_vm3, %v4883_v29  ;;  %2164 = vmatprep.subr.bf16.mxu0 %v2144_v41 }
 0x3f9   : > { %2103 = vmatpush1.bf16.msra.mxu1 %v2081_v42  ;;  %2120 = vmatprep.mubr.bf16.mxu1 %v5407_v3 }
 0x3fa   : > { %v2138_v50 = vpop.permute.xlu0 %2137  ;;  %v2260_v56 = vpop.permute.xlu1 %2259 }
 0x3fb   : > { %v2143_v10 = vsel %vm959_vm14, %v2138_v50, %v2140_v38 }
 0x3fc   : > { %4043 = vmatmul.mubr.msk.bf16.vlgmr.msra.gmra.mxu0 %vm525_vm3, %v4893_v43 }
 0x3fd   : > { %2165 = vmatpush1.bf16.msra.mxu0 %v2143_v10  ;;  %2182 = vmatprep.mubr.bf16.mxu0 %v5407_v3 }
 0x3fe   : > { %v2204_v62 = vpop.permute.xlu0 %2203  ;;  %v2320_v58 = vpop.permute.xlu1 %2319 }
 0x3ff   : > { %v2206_v1 = vsel %vm1031_vm0, %v2202_v35, %v2204_v62  ;;  %v4933_v17 = vpop.f32.mrf.mxu0 }
 0x400   : > { %4044 = vmatmul.mubr.msk.bf16.vlgmr.msra.gmra.mxu1 %vm525_vm3, %v4902_v61  ;;  %2226 = vmatprep.subr.bf16.mxu1 %v2206_v1 }
 0x401   : > { %2227 = vmatpush1.bf16.msra.mxu1 %v2205_v6  ;;  %2244 = vmatprep.mubr.bf16.mxu1 %v5407_v3  ;;  %v4936_v21 = vpop.f32.mrf.mxu0 }
 0x402   : > { %v2258_v52 = vpop.permute.xlu0 %2257  ;;  %v2318_v14 = vpop.permute.xlu1 %2317 }
 0x403   : > { %v2262_v9 = vsel %vm1088_vm15, %v2258_v52, %v2260_v56  ;;  %v2323_v15 = vsel %vm1160_vm1, %v2318_v14, %v2320_v58  ;;  %v1299_v7 = vpop.f32.mrf.mxu0 }
 0x404   : > { %4045 = vmatmul.mubr.msk.bf16.vlgmr.msra.gmra.mxu0 %vm525_vm3, %v4912_v8  ;;  %2282 = vmatprep.subr.bf16.mxu0 %v2262_v9 }
 0x405   : > { %2300 = vmatprep.mubr.bf16.mxu0 %v5407_v3  ;;  %v1300_v24 = vpop.f32.mrf.mxu0 }
 0x406   : > { %v2256_v51 = vpop.permute.xlu0 %2255 }
 0x407   : > { %v2261_v13 = vsel %vm1088_vm15, %v2256_v51, %v2258_v52 }
 0x408   : > { %4046 = vmatmul.mubr.msk.bf16.vlgmr.msra.gmra.mxu1 %vm525_vm3, %v4921_v11  ;;  %2283 = vmatpush1.bf16.msra.mxu0 %v2261_v13 }
 0x409   : > { %2362 = vmatprep.mubr.bf16.mxu1 %v5407_v3 }
 0x40a   : > { %v2322_v19 = vpop.permute.xlu0 %2321 }
 0x40b   : > { %v2324_v20 = vsel %vm1160_vm1, %v2320_v58, %v2322_v19 }
 0x40c   : > { %4047 = vmatmul.mubr.msk.bf16.vlgmr.msra.gmra.mxu0 %vm525_vm3, %v4930_v55  ;;  %2344 = vmatprep.subr.bf16.mxu1 %v2324_v20 }
 0x40d   : > { %2345 = vmatpush1.bf16.msra.mxu1 %v2323_v15  ;;  %2453 = vmatprep.mubr.bf16.mxu0 %v5407_v3 }
 0x410   : > { %4048 = vmatmul.mubr.msk.bf16.vlgmr.msra.gmra.mxu1 %vm525_vm3, %v4944_v22 }
 0x411   : > { %2515 = vmatprep.mubr.bf16.mxu1 %v5407_v3 }
 0x417   : > { %v4982_v3 = vpop.permute.xlu0 %1842 }
 0x480   : > { %v4950_v18 = vpop.f32.mrf.mxu1 }
 0x482   : > { %v4952_v25 = vpop.f32.mrf.mxu1 }
 0x484   : > { %v1361_v26 = vpop.f32.mrf.mxu1 }
 0x486   : > { %v1362_v27 = vpop.f32.mrf.mxu1 }
 0x494   : > { %v4954_v28 = vpop.f32.mrf.mxu0 }
 0x495   : > { %5411 = vst [vmem:[#allocation4_spill] sm:$0xff] %v4954_v28 }
 0x496   : > { %v4956_v30 = vpop.f32.mrf.mxu0 }
 0x497   : > { %5412 = vst [vmem:[#allocation5_spill] sm:$0xff] %v4956_v30 }
 0x498   : > { %v1427_v32 = vpop.f32.mrf.mxu0  ;;  %v4958_v33 = vpop.f32.mrf.mxu1 }
 0x499   : > { %5413 = vst [vmem:[#allocation6_spill] sm:$0xff] %v4958_v33 }
 0x49a   : > { %v1428_v35 = vpop.f32.mrf.mxu0  ;;  %v4960_v36 = vpop.f32.mrf.mxu1 }
 0x49b   : > { %5414 = vst [vmem:[#allocation7_spill] sm:$0xff] %v4960_v36 }
 0x49c   : > { %v1493_v37 = vpop.f32.mrf.mxu1  ;;  %v4962_v38 = vpop.f32.mrf.mxu0 }
 0x49d   : > { %5415 = vst [vmem:[#allocation8_spill] sm:$0xff] %v4962_v38 }
 0x49e   : > { %v1494_v39 = vpop.f32.mrf.mxu1  ;;  %v4964_v41 = vpop.f32.mrf.mxu0 }
 0x49f   : > { %5416 = vst [vmem:[#allocation9_spill] sm:$0xff] %v4964_v41 }
 0x4a0   : > { %v1553_v42 = vpop.f32.mrf.mxu0  ;;  %v4966_v50 = vpop.f32.mrf.mxu1 }
 0x4a1   : > { %5417 = vst [vmem:[#allocation10_spill] sm:$0xff] %v4966_v50 }
 0x4a2   : > { %v1554_v10 = vpop.f32.mrf.mxu0  ;;  %v4968_v56 = vpop.f32.mrf.mxu1 }
 0x4a3   : > { %5418 = vst [vmem:[#allocation11_spill] sm:$0xff] %v4968_v56 }
 0x4a4   : > { %v1619_v62 = vpop.f32.mrf.mxu1  ;;  %v4970_v1 = vpop.f32.mrf.mxu0 }
 0x4a5   : > { %5419 = vst [vmem:[#allocation12_spill] sm:$0xff] %v4970_v1 }
 0x4a6   : > { %v1620_v6 = vpop.f32.mrf.mxu1  ;;  %v4972_v52 = vpop.f32.mrf.mxu0 }
 0x4a7   : > { %5420 = vst [vmem:[#allocation13_spill] sm:$0xff] %v4972_v52 }
 0x4a8   : > { %v1685_v58 = vpop.f32.mrf.mxu0  ;;  %v4974_v9 = vpop.f32.mrf.mxu1 }
 0x4a9   : > { %5421 = vst [vmem:[#allocation14_spill] sm:$0xff] %v4974_v9 }
 0x4aa   : > { %v1686_v51 = vpop.f32.mrf.mxu0  ;;  %v4976_v13 = vpop.f32.mrf.mxu1 }
 0x4ab   : > { %5422 = vst [vmem:[#allocation15_spill] sm:$0xff] %v4976_v13 }
 0x4ac   : > { %v1745_v14 = vpop.f32.mrf.mxu1  ;;  %v4978_v19 = vpop.f32.mrf.mxu0 }
 0x4ad   : > { %5423 = vst [vmem:[#allocation16_spill] sm:$0xff] %v4978_v19 }
 0x4ae   : > { %v1746_v20 = vpop.f32.mrf.mxu1  ;;  %v4980_v15 = vpop.f32.mrf.mxu0 }
 0x4af   : > { %5424 = vst [vmem:[#allocation17_spill] sm:$0xff] %v4980_v15 }
 0x4b0   : > { %v1811_v7 = vpop.f32.mrf.mxu0  ;;  %v1884_v24 = vpop.f32.mrf.mxu1 }
 0x4b1   : > { %v1891_v7 = vadd.f32 %v1884_v24, %v4982_v3 }
 0x4b2   : > { %v1812_v26 = vpop.f32.mrf.mxu0  ;;  %v1886_v27 = vpop.f32.mrf.mxu1 }
 0x4b4   : > { %v1888_v32 = vpop.f32.mrf.mxu1  ;;  %v1942_v35 = vpop.f32.mrf.mxu0 }
 0x4b5   : > { %v1892_v32 = vadd.f32 %v1886_v27, %v4982_v3 }
 0x4b6   : > { %v1889_v37 = vpop.f32.mrf.mxu1  ;;  %v1944_v39 = vpop.f32.mrf.mxu0 }
 0x4b7   : > { %v1949_v37 = vadd.f32 %v1942_v35, %v1891_v7  ;;  %v1950_v13 = vadd.f32 %v1944_v39, %v1892_v32 }
 0x4b8   : > { %v1946_v42 = vpop.f32.mrf.mxu0  ;;  %v2004_v10 = vpop.f32.mrf.mxu1 }
 0x4ba   : > { %v1947_v62 = vpop.f32.mrf.mxu0  ;;  %v2006_v6 = vpop.f32.mrf.mxu1 }
 0x4bb   : > { %v2011_v62 = vadd.f32 %v2004_v10, %v1949_v37  ;;  %v2012_v52 = vadd.f32 %v2006_v6, %v1950_v13  ;;  %v515_v13 = vand.u32 3, %v4411_v4  ;;  %v5425_v37 = vmov 0.0  }
 0x4bc   : > { %v2008_v58 = vpop.f32.mrf.mxu1  ;;  %v2066_v51 = vpop.f32.mrf.mxu0 }
 0x4bd   : > { %vm524_vm6 = vcmp.ne.s32.totalorder %v515_v13, 3  ;;  %vm523_vm7 = vcmp.ne.s32.totalorder %v515_v13, 0  ;;  %v5015_v13 = vld [vmem:[%s5398_s5] sm:$0x1] }
 0x4be   : > { %v2009_v14 = vpop.f32.mrf.mxu1  ;;  %v2068_v2 = vpop.f32.mrf.mxu0 }
 0x4bf   : > { %v2073_v14 = vadd.f32 %v2066_v51, %v2011_v62  ;;  %v2074_v50 = vadd.f32 %v2068_v2, %v2012_v52  ;;  %v474_v52 = vld [vmem:[%s453_s17] sm:$0xff] }
 0x4c0   : > { %v2070_v20 = vpop.f32.mrf.mxu0  ;;  %v2122_v12 = vpop.f32.mrf.mxu1 }
 0x4c1   : > { %v2129_v20 = vadd.f32 %v2122_v12, %v2073_v14  ;;  %v4069_v14 = vsel %vm523_vm7, 1.0, %v5425_v37 }
 0x4c2   : > { %v2071_v26 = vpop.f32.mrf.mxu0  ;;  %v2124_v15 = vpop.f32.mrf.mxu1 }
 0x4c3   : > { %v2130_v24 = vadd.f32 %v2124_v15, %v2074_v50 }
 0x4c4   : > { %v2126_v19 = vpop.f32.mrf.mxu1  ;;  %v2184_v42 = vpop.f32.mrf.mxu0 }
 0x4c5   : > { %v2191_v26 = vadd.f32 %v2184_v42, %v2129_v20  ;;  %v4070_v42 = vsel %vm524_vm6, 1.0, %v5425_v37 }
 0x4c6   : > { %v2127_v9 = vpop.f32.mrf.mxu1  ;;  %v2186_v58 = vpop.f32.mrf.mxu0  ;;  %v3006_v20 = vpack.c.bf16 %v4070_v42, %v4070_v42 }
 0x4c7   : > { %v2192_v35 = vadd.f32 %v2186_v58, %v2130_v24  ;;  %v4997_v24 = vpack.c.bf16 %v4069_v14, %v4069_v14 }
 0x4c8   : > { %v2188_v1 = vpop.f32.mrf.mxu0  ;;  %v2246_v56 = vpop.f32.mrf.mxu1 }
 0x4c9   : > { %v2253_v19 = vadd.f32 %v2246_v56, %v2191_v26 }
 0x4ca   : > { %v2189_v41 = vpop.f32.mrf.mxu0  ;;  %v2248_v38 = vpop.f32.mrf.mxu1 }
 0x4cb   : > { %v2254_v10 = vadd.f32 %v2248_v38, %v2192_v35  ;;  %v475_v38 = vld [vmem:[%s453_s17 + $0x8] sm:$0xff] }
 0x4cc   : > { %v2250_v36 = vpop.f32.mrf.mxu1  ;;  %v2302_v27 = vpop.f32.mrf.mxu0  ;;  %v476_v58 = vpack.c.bf16 %v475_v38, %v474_v52 }
 0x4cd   : > { %v2309_v9 = vadd.f32 %v2302_v27, %v2253_v19 }
 0x4ce   : > { %v2251_v7 = vpop.f32.mrf.mxu1  ;;  %v2304_v39 = vpop.f32.mrf.mxu0 }
 0x4cf   : > { %v2310_v51 = vadd.f32 %v2304_v39, %v2254_v10 }
 0x4d0   : > { %v2306_v6 = vpop.f32.mrf.mxu0  ;;  %v2364_v1 = vpop.f32.mrf.mxu1 }
 0x4d1   : > { %v2371_v2 = vadd.f32 %v2364_v1, %v2309_v9  ;;  %v5426_v6 = vmov 0  }
 0x4d2   : > { %v2307_v12 = vpop.f32.mrf.mxu0  ;;  %v2366_v36 = vpop.f32.mrf.mxu1 }
 0x4d3   : > { %v2373_v41 = vmax.f32 %v2371_v2, 0.0  ;;  %v2372_v50 = vadd.f32 %v2366_v36, %v2310_v51 }
 0x4d4   : > { %v2368_v56 = vpop.f32.mrf.mxu1 }
 0x4d5   : > { %v2375_v15 = vpack.c.bf16 %v2373_v41, %v2373_v41  ;;  %v2374_v32 = vmax.f32 %v2372_v50, 0.0 }
 0x4d6   : > { %v2369_v4 = vpop.f32.mrf.mxu1 }
 0x4d7   : > { %v2376_v62 = vpack.c.bf16 %v2374_v32, %v2374_v32  ;;  %2389 = vrot.lane.b32.xlu1 %v2375_v15, %s4306_s20 }
 0x4d9   : > { %2391 = vrot.lane.b32.xlu0 %v2376_v62, %s4306_s20 }
 0x4db   : > { %2989 = vrot.lane.b32.xlu1 %v476_v58, %s4315_s29 }
 0x4dd   : > { %3095 = vrot.lane.b32.xlu0 %v3006_v20, %s4301_s15 }
 0x4df   : > { %3145 = vrot.lane.b32.xlu1 %v4997_v24, %s4316_s18 }
 0x4e1   : > { %3238 = vrot.lane.b32.xlu0 %v3006_v20, %s4317_s19 }
 0x4e3   : > { %3287 = vrot.lane.b32.xlu1 %v4997_v24, %s4318_s23 }
 0x4e5   : > { %3380 = vrot.lane.b32.xlu0 %v3006_v20, %s4319_s24 }
 0x549   : > { %v2390_v26 = vpop.permute.xlu1 %2389 }
 0x54a   : > { %v2396_v27 = vsel %vm590_vm5, 0, %v2390_v26 }
 0x54b   : > { %2466 = vrot.lane.b32.xlu0 %v2396_v27, %s4308_s22  ;;  %v2392_v35 = vpop.permute.xlu0 %2391  ;;  %v2410_v19 = vmul.bf16 %v2396_v27, %v4446_v31  ;;  %v2526_v9 = vmul.bf16 %v2396_v27, %v4458_v34  ;;  %v2718_v1 = vmul.bf16 %v2396_v27, %v4487_v45  ;;  %v2784_v2 = vmul.bf16 %v2396_v27, %v4503_v49 }
 0x54c   : > { %v2393_v7 = vsel %vm590_vm5, %v2390_v26, %v2392_v35  ;;  %v2399_v31 = vsel %vm590_vm5, %v2392_v35, 0  ;;  %vm2991_vm5 = vcmask 39936   ;;  %v5098_v35 = vld [vmem:[%s5398_s5 + $0x1] sm:$0x1] }
 0x54d   : > { %2468 = vrot.lane.b32.xlu1 %v2393_v7, %s4308_s22  ;;  %v2411_v39 = vmul.bf16 %v2393_v7, %v4439_v23  ;;  %v2416_v10 = vsel %vm1254_vm2, %v2410_v19, 0  ;;  %v2592_v23 = vmul.bf16 %v2396_v27, %v4474_v40  ;;  %v2527_v34 = vmul.bf16 %v2393_v7, %v4492_v46 }
 0x54e   : > { %v2593_v40 = vmul.bf16 %v2393_v7, %v4519_v54  ;;  %v2528_v51 = vmul.bf16 %v2399_v31, %v4483_v44  ;;  %v2594_v46 = vmul.bf16 %v2399_v31, %v4499_v47  ;;  %v2719_v45 = vmul.bf16 %v2393_v7, %v4539_v60  ;;  %v2990_v54 = vpop.permute.xlu1 %2989 }
 0x54f   : > { %2658 = vrot.lane.b32.xlu0 %v2396_v27, %s4307_s21  ;;  %4049 = vmatprep.subr.msk.bf16.mxu0 %vm1254_vm2, %v2411_v39  ;;  %v2720_v44 = vmul.bf16 %v2399_v31, %v4513_v53  ;;  %v2786_v49 = vmul.bf16 %v2399_v31, %v4528_v57  ;;  %v2785_v47 = vmul.bf16 %v2393_v7, %v4534_v59  ;;  %v2993_v12 = vsel %vm2991_vm5, 0, %v2990_v54  ;;  %v5055_v36 = vpop.permute.xlu0 %3095 }
 0x550   : > { %2436 = vmatpush1.bf16.msra.mxu0 %v2416_v10  ;;  %v2910_v60 = vmul.bf16 %v2396_v27, %v4547_v63  ;;  %v5053_v53 = vsel %vm2994_vm8, %v2993_v12, 0  ;;  %v2912_v57 = vmul.bf16 %v2399_v31, %v4551_v0  ;;  %v2911_v63 = vmul.bf16 %v2393_v7, %v4557_v5  ;;  %v5125_v12 = vld [vmem:[%s5398_s5 + $0x3] sm:$0x1] }
 0x551   : > { %2532 = vrot.lane.b32.xlu1 %v2526_v9, %s4309_s6  ;;  %v3098_v59 = vmul.bf16 %v5055_v36, %v5053_v53 }
 0x552   : > { %v5059_v41 = vpop.permute.xlu1 %3145 }
 0x553   : > { %2470 = vrot.lane.b32.xlu0 %v2399_v31, %s4308_s22  ;;  %4050 = vmatmul.mubr.msk.bf16.vlgmr.msra.gmra.mxu0 %vm1250_vm4, %v5015_v13  ;;  %v5066_v50 = vpop.permute.xlu0 %3238  ;;  %v3148_v0 = vmul.bf16 %v5059_v41, %v5053_v53 }
 0x554   : > { %2581 = vmatprep.mubr.bf16.mxu0 %v5426_v6  ;;  %v3241_v38 = vmul.bf16 %v5066_v50, %v5053_v53 }
 0x555   : > { %2598 = vrot.lane.b32.xlu1 %v2592_v23, %s4310_s10 }
 0x556   : > { %v5069_v56 = vpop.permute.xlu1 %3287 }
 0x557   : > { %2662 = vrot.lane.b32.xlu0 %v2399_v31, %s4307_s21  ;;  %v3290_v5 = vmul.bf16 %v5069_v56, %v5053_v53  ;;  %v5079_v52 = vpop.permute.xlu0 %3380 }
 0x558   : > { %v3383_v15 = vmul.bf16 %v5079_v52, %v5053_v53 }
 0x559   : > { %2660 = vrot.lane.b32.xlu1 %v2393_v7, %s4307_s21  ;;  %s4320_s21 = smov 123  }
 0x55b   : > { %2534 = vrot.lane.b32.xlu0 %v2527_v34, %s4309_s6 }
 0x55d   : > { %2724 = vrot.lane.b32.xlu1 %v2718_v1, %s4311_s27 }
 0x55f   : > { %2600 = vrot.lane.b32.xlu0 %v2593_v40, %s4310_s10 }
 0x561   : > { %2536 = vrot.lane.b32.xlu1 %v2528_v51, %s4309_s6 }
 0x563   : > { %2790 = vrot.lane.b32.xlu0 %v2784_v2, %s4312_s28 }
 0x565   : > { %2602 = vrot.lane.b32.xlu1 %v2594_v46, %s4310_s10  ;;  %s4321_s10 = smov 124  }
 0x567   : > { %2726 = vrot.lane.b32.xlu0 %v2719_v45, %s4311_s27  ;;  %v5113_v45 = vld [vmem:[%s5398_s5 + $0x2] sm:$0x1] }
 0x569   : > { %2850 = vrot.lane.b32.xlu1 %v2396_v27, %s4313_s30 }
 0x56b   : > { %2852 = vrot.lane.b32.xlu0 %v2393_v7, %s4313_s30 }
 0x56d   : > { %2728 = vrot.lane.b32.xlu1 %v2720_v44, %s4311_s27  ;;  %s4322_s27 = smov 120  }
 0x56f   : > { %2794 = vrot.lane.b32.xlu0 %v2786_v49, %s4312_s28 }
 0x571   : > { %2792 = vrot.lane.b32.xlu1 %v2785_v47, %s4312_s28  ;;  %s4323_s28 = smov 122  }
 0x573   : > { %2916 = vrot.lane.b32.xlu0 %v2910_v60, %s4314_s13 }
 0x575   : > { %2854 = vrot.lane.b32.xlu1 %v2399_v31, %s4313_s30  ;;  %s4324_s30 = smov 118  }
 0x577   : > { %2920 = vrot.lane.b32.xlu0 %v2912_v57, %s4314_s13 }
 0x579   : > { %2918 = vrot.lane.b32.xlu1 %v2911_v63, %s4314_s13  ;;  %s4325_s13 = smov 119  }
 0x57b   : > { %3100 = vrot.lane.b32.xlu0 %v3098_v59, %s4309_s6 }
 0x57d   : > { %3050 = vrot.lane.b32.xlu1 %v5053_v53, %s4308_s22 }
 0x57f   : > { %3194 = vrot.lane.b32.xlu0 %v5053_v53, %s4320_s21 }
 0x581   : > { %3150 = vrot.lane.b32.xlu1 %v3148_v0, %s4321_s10  ;;  %v5134_v0 = vld [vmem:[%s5398_s5 + $0x4] sm:$0x1] }
 0x583   : > { %3292 = vrot.lane.b32.xlu0 %v3290_v5, %s4322_s27 }
 0x585   : > { %3243 = vrot.lane.b32.xlu1 %v3241_v38, %s4323_s28 }
 0x587   : > { %3385 = vrot.lane.b32.xlu0 %v3383_v15, %s4324_s30 }
 0x589   : > { %3336 = vrot.lane.b32.xlu1 %v5053_v53, %s4325_s13 }
 0x5bd   : > { %v2467_v32 = vpop.permute.xlu0 %2466 }
 0x5bf   : > { %v2469_v4 = vpop.permute.xlu1 %2468 }
 0x5c0   : > { %v2472_v58 = vsel %vm682_vm10, %v2467_v32, %v2469_v4 }
 0x5c1   : > { %v2659_v42 = vpop.permute.xlu0 %2658  ;;  %v2478_v26 = vsel %vm1254_vm2, %v2472_v58, 0 }
 0x5c3   : > { %v2533_v62 = vpop.permute.xlu1 %2532 }
 0x5c5   : > { %v2471_v14 = vpop.permute.xlu0 %2470 }
 0x5c6   : > { %v2473_v20 = vsel %vm682_vm10, %v2469_v4, %v2471_v14  ;;  %v5145_v4 = vld [vmem:[%s5398_s5 + $0x5] sm:$0x1]  ;;  %vm3889_vm10 = vcmask 122880  }
 0x5c7   : > { %v2599_v27 = vpop.permute.xlu1 %2598  ;;  %4051 = vmatprep.subr.msk.bf16.mxu1 %vm1254_vm2, %v2473_v20 }
 0x5c8   : > { %2498 = vmatpush1.bf16.msra.mxu1 %v2478_v26 }
 0x5c9   : > { %v2663_v19 = vpop.permute.xlu0 %2662 }
 0x5cb   : > { %v2661_v7 = vpop.permute.xlu1 %2660  ;;  %4052 = vmatmul.mubr.msk.bf16.vlgmr.msra.gmra.mxu1 %vm1250_vm4, %v5098_v35 }
 0x5cc   : > { %2647 = vmatprep.mubr.bf16.mxu1 %v5426_v6  ;;  %v2664_v51 = vsel %vm887_vm12, %v2659_v42, %v2661_v7  ;;  %v2665_v2 = vsel %vm887_vm12, %v2661_v7, %v2663_v19 }
 0x5cd   : > { %v2535_v39 = vpop.permute.xlu0 %2534  ;;  %v2670_v54 = vsel %vm1254_vm2, %v2664_v51, 0 }
 0x5ce   : > { %v2538_v31 = vsel %vm756_vm11, %v2533_v62, %v2535_v39 }
 0x5cf   : > { %v2725_v10 = vpop.permute.xlu1 %2724  ;;  %v2544_v1 = vsel %vm1254_vm2, %v2538_v31, 0 }
 0x5d1   : > { %v2601_v9 = vpop.permute.xlu0 %2600 }
 0x5d2   : > { %v2604_v46 = vsel %vm830_vm13, %v2599_v27, %v2601_v9  ;;  %v5158_v27 = vld [vmem:[%s5398_s5 + $0x6] sm:$0x1] }
 0x5d3   : > { %v2537_v23 = vpop.permute.xlu1 %2536  ;;  %v2610_v47 = vsel %vm1254_vm2, %v2604_v46, 0 }
 0x5d4   : > { %v2539_v34 = vsel %vm756_vm11, %v2535_v39, %v2537_v23 }
 0x5d5   : > { %4053 = vmatprep.subr.msk.bf16.mxu0 %vm1254_vm2, %v2539_v34  ;;  %v2791_v40 = vpop.permute.xlu0 %2790 }
 0x5d6   : > { %2564 = vmatpush1.bf16.msra.mxu0 %v2544_v1  ;;  %v3007_v1 = vmul.bf16 %v4997_v24, %v5053_v53 }
 0x5d7   : > { %v2603_v44 = vpop.permute.xlu1 %2602  ;;  %4057 = vmatprep.subr.msk.bf16.mxu0 %vm1254_vm2, %v2665_v2 }
 0x5d8   : > { %v2605_v49 = vsel %vm830_vm13, %v2601_v9, %v2603_v44 }
 0x5d9   : > { %4054 = vmatmul.mubr.msk.bf16.vlgmr.msra.gmra.mxu0 %vm1250_vm4, %v5113_v45  ;;  %4055 = vmatprep.subr.msk.bf16.mxu1 %vm1254_vm2, %v2605_v49  ;;  %v2727_v60 = vpop.permute.xlu0 %2726 }
 0x5da   : > { %2630 = vmatpush1.bf16.msra.mxu1 %v2610_v47  ;;  %2690 = vmatpush1.bf16.msra.mxu0 %v2670_v54  ;;  %v2730_v63 = vsel %vm959_vm14, %v2725_v10, %v2727_v60  ;;  %v5169_v10 = vld [vmem:[%s5398_s5 + $0x7] sm:$0x1] }
 0x5db   : > { %v2851_v57 = vpop.permute.xlu1 %2850  ;;  %2707 = vmatprep.mubr.bf16.mxu0 %v5426_v6  ;;  %v2736_v15 = vsel %vm1254_vm2, %v2730_v63, 0 }
 0x5dd   : > { %4056 = vmatmul.mubr.msk.bf16.vlgmr.msra.gmra.mxu1 %vm1250_vm4, %v5125_v12  ;;  %v2853_v59 = vpop.permute.xlu0 %2852 }
 0x5de   : > { %2773 = vmatprep.mubr.bf16.mxu1 %v5426_v6  ;;  %v2856_v26 = vsel %vm1088_vm15, %v2851_v57, %v2853_v59 }
 0x5df   : > { %v2729_v5 = vpop.permute.xlu1 %2728  ;;  %v2862_v39 = vsel %vm1254_vm2, %v2856_v26, 0 }
 0x5e0   : > { %v2731_v38 = vsel %vm959_vm14, %v2727_v60, %v2729_v5 }
 0x5e1   : > { %4058 = vmatmul.mubr.msk.bf16.vlgmr.msra.gmra.mxu0 %vm1250_vm4, %v5134_v0  ;;  %4059 = vmatprep.subr.msk.bf16.mxu1 %vm1254_vm2, %v2731_v38  ;;  %v2795_v32 = vpop.permute.xlu0 %2794 }
 0x5e2   : > { %2756 = vmatpush1.bf16.msra.mxu1 %v2736_v15  ;;  %2839 = vmatprep.mubr.bf16.mxu0 %v5426_v6 }
 0x5e3   : > { %v2793_v42 = vpop.permute.xlu1 %2792 }
 0x5e4   : > { %v2796_v62 = vsel %vm1031_vm0, %v2791_v40, %v2793_v42  ;;  %v2797_v58 = vsel %vm1031_vm0, %v2793_v42, %v2795_v32 }
 0x5e5   : > { %v2802_v14 = vsel %vm1254_vm2, %v2796_v62, 0  ;;  %4060 = vmatmul.mubr.msk.bf16.vlgmr.msra.gmra.mxu1 %vm1250_vm4, %v5145_v4  ;;  %4061 = vmatprep.subr.msk.bf16.mxu0 %vm1254_vm2, %v2797_v58  ;;  %v2917_v20 = vpop.permute.xlu0 %2916 }
 0x5e6   : > { %2822 = vmatpush1.bf16.msra.mxu0 %v2802_v14  ;;  %2899 = vmatprep.mubr.bf16.mxu1 %v5426_v6 }
 0x5e7   : > { %v2855_v19 = vpop.permute.xlu1 %2854 }
 0x5e8   : > { %v2857_v7 = vsel %vm1088_vm15, %v2853_v59, %v2855_v19 }
 0x5e9   : > { %4062 = vmatmul.mubr.msk.bf16.vlgmr.msra.gmra.mxu0 %vm1250_vm4, %v5158_v27  ;;  %4063 = vmatprep.subr.msk.bf16.mxu1 %vm1254_vm2, %v2857_v7  ;;  %v2921_v9 = vpop.permute.xlu0 %2920 }
 0x5ea   : > { %2882 = vmatpush1.bf16.msra.mxu1 %v2862_v39  ;;  %2965 = vmatprep.mubr.bf16.mxu0 %v5426_v6  ;;  %v5184_v6 = vld [vmem:[%s5398_s5 + $0x8] sm:$0x1] }
 0x5eb   : > { %v2919_v31 = vpop.permute.xlu1 %2918  ;;  %4133 = vmatprep.subr.bf16.mxu1 %v5425_v37 }
 0x5ec   : > { %v2922_v23 = vsel %vm1160_vm1, %v2917_v20, %v2919_v31  ;;  %v2923_v34 = vsel %vm1160_vm1, %v2919_v31, %v2921_v9 }
 0x5ed   : > { %v2928_v40 = vsel %vm1254_vm2, %v2922_v23, 0  ;;  %4064 = vmatmul.mubr.msk.bf16.vlgmr.msra.gmra.mxu1 %vm1250_vm4, %v5169_v10  ;;  %4065 = vmatprep.subr.msk.bf16.mxu0 %vm1254_vm2, %v2923_v34  ;;  %v3101_v51 = vpop.permute.xlu0 %3100 }
 0x5ee   : > { %2948 = vmatpush1.bf16.msra.mxu0 %v2928_v40  ;;  %4134 = vmatpush3.bf16.msra.mxu1 %v3007_v1 }
 0x5ef   : > { %4135 = vmatprep.mubr.msk.bf16.mxu1 %vm4326_vm9, %v5425_v37  ;;  %4139 = vmatprep.subr.bf16.mxu0 %v5425_v37  ;;  %v3051_v53 = vpop.permute.xlu1 %3050 }
 0x5f0   : > { %4145 = vmatprep.subr.bf16.mxu1 %v5425_v37 }
 0x5f1   : > { %4066 = vmatmul.mubr.msk.bf16.vlgmr.msra.gmra.mxu0 %vm1250_vm4, %v5184_v6  ;;  %v3195_v46 = vpop.permute.xlu0 %3194 }
 0x5f2   : > { %4140 = vmatpush3.bf16.msra.mxu0 %v3051_v53  ;;  %4141 = vmatprep.mubr.msk.bf16.mxu0 %vm4326_vm9, %v5425_v37 }
 0x5f3   : > { %4151 = vmatprep.subr.bf16.mxu0 %v5425_v37  ;;  %v3151_v2 = vpop.permute.xlu1 %3150 }
 0x5f5   : > { %4136 = vmatmul.mubr.msk.bf16.vlgmr.msra.gmra.mxu1 %vm525_vm3, %v4863_v16 }
 0x5f6   : > { %4146 = vmatpush3.bf16.msra.mxu1 %v3101_v51  ;;  %4147 = vmatprep.mubr.msk.bf16.mxu1 %vm4326_vm9, %v5425_v37 }
 0x5f7   : > { %4157 = vmatprep.subr.bf16.mxu1 %v5425_v37  ;;  %v3244_v16 = vpop.permute.xlu1 %3243 }
 0x5f9   : > { %4142 = vmatmul.mubr.msk.bf16.vlgmr.msra.gmra.mxu0 %vm525_vm3, %v4873_v48  ;;  %v3293_v48 = vpop.permute.xlu0 %3292 }
 0x5fa   : > { %4152 = vmatpush3.bf16.msra.mxu0 %v3151_v2  ;;  %4153 = vmatprep.mubr.msk.bf16.mxu0 %vm4326_vm9, %v5425_v37 }
 0x5fb   : > { %4163 = vmatprep.subr.bf16.mxu0 %v5425_v37 }
 0x5fd   : > { %4148 = vmatmul.mubr.msk.bf16.vlgmr.msra.gmra.mxu1 %vm525_vm3, %v4883_v29  ;;  %v3337_v29 = vpop.permute.xlu1 %3336 }
 0x5fe   : > { %4158 = vmatpush3.bf16.msra.mxu1 %v3195_v46  ;;  %4159 = vmatprep.mubr.msk.bf16.mxu1 %vm4326_vm9, %v5425_v37 }
 0x5ff   : > { %4169 = vmatprep.subr.bf16.mxu1 %v5425_v37 }
 0x601   : > { %4154 = vmatmul.mubr.msk.bf16.vlgmr.msra.gmra.mxu0 %vm525_vm3, %v4893_v43  ;;  %v3386_v43 = vpop.permute.xlu0 %3385 }
 0x602   : > { %4164 = vmatpush3.bf16.msra.mxu0 %v3244_v16  ;;  %4165 = vmatprep.mubr.msk.bf16.mxu0 %vm4326_vm9, %v5425_v37 }
 0x603   : > { %4175 = vmatprep.subr.bf16.mxu0 %v5425_v37 }
 0x605   : > { %4160 = vmatmul.mubr.msk.bf16.vlgmr.msra.gmra.mxu1 %vm525_vm3, %v4902_v61 }
 0x606   : > { %4170 = vmatpush3.bf16.msra.mxu1 %v3293_v48  ;;  %4171 = vmatprep.mubr.msk.bf16.mxu1 %vm4326_vm9, %v5425_v37 }
 0x607   : > { %4181 = vmatprep.subr.bf16.mxu1 %v5425_v37 }
 0x609   : > { %4166 = vmatmul.mubr.msk.bf16.vlgmr.msra.gmra.mxu0 %vm525_vm3, %v4912_v8 }
 0x60a   : > { %4176 = vmatpush3.bf16.msra.mxu0 %v3337_v29  ;;  %4177 = vmatprep.mubr.msk.bf16.mxu0 %vm4326_vm9, %v5425_v37 }
 0x60b   : > { %4187 = vmatprep.subr.bf16.mxu0 %v5425_v37 }
 0x60d   : > { %4172 = vmatmul.mubr.msk.bf16.vlgmr.msra.gmra.mxu1 %vm525_vm3, %v4921_v11 }
 0x60e   : > { %4182 = vmatpush3.bf16.msra.mxu1 %v3386_v43  ;;  %4183 = vmatprep.mubr.msk.bf16.mxu1 %vm4326_vm9, %v5425_v37 }
 0x60f   : > { %4193 = vmatprep.subr.bf16.mxu1 %v5425_v37 }
 0x611   : > { %4178 = vmatmul.mubr.msk.bf16.vlgmr.msra.gmra.mxu0 %vm525_vm3, %v4930_v55 }
 0x612   : > { %4189 = vmatprep.mubr.msk.bf16.mxu0 %vm4326_vm9, %v5425_v37 }
 0x613   : > { %v5234_v61 = vpop.f32.mrf.mxu0 }
 0x615   : > { %4184 = vmatmul.mubr.msk.bf16.vlgmr.msra.gmra.mxu1 %vm525_vm3, %v4944_v22  ;;  %v5238_v8 = vpop.f32.mrf.mxu0  ;;  %vm3874_vm3 = vcmask 1040384  }
 0x616   : > { %4195 = vmatprep.mubr.msk.bf16.mxu1 %vm4326_vm9, %v5425_v37 }
 0x617   : > { %v2459_v11 = vpop.f32.mrf.mxu0 }
 0x619   : > { %v2460_v44 = vpop.f32.mrf.mxu0 }
 0x68b   : > { %v5242_v49 = vpop.f32.mrf.mxu1 }
 0x68d   : > { %v5244_v54 = vpop.f32.mrf.mxu1 }
 0x68f   : > { %v2521_v55 = vpop.f32.mrf.mxu1 }
 0x691   : > { %v2522_v47 = vpop.f32.mrf.mxu1 }
 0x699   : > { %v5246_v60 = vpop.f32.mrf.mxu0 }
 0x69b   : > { %v5248_v57 = vpop.f32.mrf.mxu0 }
 0x69d   : > { %v2587_v59 = vpop.f32.mrf.mxu0  ;;  %v5250_v63 = vpop.f32.mrf.mxu1 }
 0x69f   : > { %v2588_v22 = vpop.f32.mrf.mxu0  ;;  %v5252_v5 = vpop.f32.mrf.mxu1 }
 0x6a1   : > { %v2653_v38 = vpop.f32.mrf.mxu1  ;;  %v5254_v15 = vpop.f32.mrf.mxu0 }
 0x6a3   : > { %v2654_v32 = vpop.f32.mrf.mxu1  ;;  %v5256_v42 = vpop.f32.mrf.mxu0 }
 0x6a5   : > { %v2713_v62 = vpop.f32.mrf.mxu0  ;;  %v5258_v58 = vpop.f32.mrf.mxu1 }
 0x6a7   : > { %v2714_v14 = vpop.f32.mrf.mxu0  ;;  %v5260_v20 = vpop.f32.mrf.mxu1 }
 0x6a9   : > { %v2779_v26 = vpop.f32.mrf.mxu1  ;;  %v5262_v19 = vpop.f32.mrf.mxu0 }
 0x6ab   : > { %v2780_v7 = vpop.f32.mrf.mxu1  ;;  %v5264_v39 = vpop.f32.mrf.mxu0 }
 0x6ad   : > { %v2845_v9 = vpop.f32.mrf.mxu0  ;;  %v5266_v31 = vpop.f32.mrf.mxu1 }
 0x6af   : > { %v2846_v23 = vpop.f32.mrf.mxu0  ;;  %v5268_v34 = vpop.f32.mrf.mxu1 }
 0x6b1   : > { %v2905_v1 = vpop.f32.mrf.mxu1  ;;  %v5270_v40 = vpop.f32.mrf.mxu0 }
 0x6b3   : > { %v2906_v53 = vpop.f32.mrf.mxu1  ;;  %v5272_v51 = vpop.f32.mrf.mxu0 }
 0x6b5   : > { %v2971_v2 = vpop.f32.mrf.mxu0  ;;  %v3042_v46 = vpop.f32.mrf.mxu1 }
 0x6b6   : > { %v3048_v9 = vadd.f32 %v3042_v46, %v4982_v3 }
 0x6b7   : > { %v2972_v16 = vpop.f32.mrf.mxu0  ;;  %v4137_v48 = vpop.f32.mrf.mxu1 }
 0x6b9   : > { %v3045_v29 = vpop.f32.mrf.mxu1  ;;  %v3087_v43 = vpop.f32.mrf.mxu0 }
 0x6ba   : > { %v3093_v53 = vadd.f32 %v3087_v43, %v3048_v9 }
 0x6bb   : > { %v4138_v11 = vpop.f32.mrf.mxu1  ;;  %v4143_v44 = vpop.f32.mrf.mxu0 }
 0x6bd   : > { %v3090_v55 = vpop.f32.mrf.mxu0  ;;  %v3137_v47 = vpop.f32.mrf.mxu1 }
 0x6be   : > { %v3143_v48 = vadd.f32 %v3137_v47, %v3093_v53 }
 0x6bf   : > { %v4144_v59 = vpop.f32.mrf.mxu0  ;;  %v4149_v22 = vpop.f32.mrf.mxu1 }
 0x6c1   : > { %v3140_v38 = vpop.f32.mrf.mxu1  ;;  %v3187_v32 = vpop.f32.mrf.mxu0 }
 0x6c2   : > { %v3193_v44 = vadd.f32 %v3187_v32, %v3143_v48 }
 0x6c3   : > { %v4150_v62 = vpop.f32.mrf.mxu1  ;;  %v4155_v14 = vpop.f32.mrf.mxu0 }
 0x6c5   : > { %v3190_v26 = vpop.f32.mrf.mxu0  ;;  %v3231_v7 = vpop.f32.mrf.mxu1 }
 0x6c6   : > { %v3237_v22 = vadd.f32 %v3231_v7, %v3193_v44  ;;  %v2386_v44 = vld [vmem:[#allocation2] sm:$0x1] }
 0x6c7   : > { %v4156_v23 = vpop.f32.mrf.mxu0  ;;  %v4161_v1 = vpop.f32.mrf.mxu1 }
 0x6c9   : > { %v3234_v2 = vpop.f32.mrf.mxu1  ;;  %v3280_v16 = vpop.f32.mrf.mxu0 }
 0x6ca   : > { %v3286_v62 = vadd.f32 %v3280_v16, %v3237_v22 }
 0x6cb   : > { %v4162_v29 = vpop.f32.mrf.mxu1  ;;  %v4167_v11 = vpop.f32.mrf.mxu0 }
 0x6cd   : > { %v3283_v55 = vpop.f32.mrf.mxu0  ;;  %v3329_v59 = vpop.f32.mrf.mxu1 }
 0x6ce   : > { %v3335_v30 = vadd.f32 %v3329_v59, %v3286_v62  ;;  %v1224_v55 = vld [vmem:[#allocation3] sm:$0x1] }
 0x6cf   : > { %v4168_v38 = vpop.f32.mrf.mxu0  ;;  %v4173_v33 = vpop.f32.mrf.mxu1 }
 0x6d1   : > { %v3332_v14 = vpop.f32.mrf.mxu1  ;;  %v3373_v26 = vpop.f32.mrf.mxu0 }
 0x6d2   : > { %v3379_v46 = vadd.f32 %v3373_v26, %v3335_v30 }
 0x6d3   : > { %v4174_v28 = vpop.f32.mrf.mxu1  ;;  %v4179_v3 = vpop.f32.mrf.mxu0 }
 0x6d5   : > { %v3376_v23 = vpop.f32.mrf.mxu0  ;;  %v3422_v43 = vpop.f32.mrf.mxu1 }
 0x6d6   : > { %v3428_v9 = vadd.f32 %v3422_v43, %v3379_v46  ;;  %v5427_v46 = vlaneseq }
 0x6d7   : > { %v4180_v1 = vpop.f32.mrf.mxu0  ;;  %v4185_v47 = vpop.f32.mrf.mxu1 }
 0x6d8   : > { %v3429_v53 = vmax.f32 %v3428_v9, 0.0 }
 0x6d9   : > { %v3425_v2 = vpop.f32.mrf.mxu1 }
 0x6da   : > { %v3430_v32 = vpack.c.bf16 %v3429_v53, %v3429_v53 }
 0x6db   : > { %v4186_v48 = vpop.f32.mrf.mxu1 }
 0x6dc   : > { %3432 = vrot.lane.b32.xlu1 %v3430_v32, %s4315_s29 }
 0x74e   : > { %v3433_v7 = vpop.permute.xlu1 %3432 }
 0x74f   : > { %v3435_v33 = vsel %vm2991_vm5, 0, %v3433_v7 }
 0x750   : > { %v3436_v16 = vsel %vm2994_vm8, %v3435_v33, 0 }
 0x751   : > { %3484 = vrot.lane.b32.xlu0 %v3436_v16, %s4308_s22  ;;  %v3530_v28 = vmul.bf16 %v3436_v16, %v5055_v36  ;;  %v3438_v30 = vmul.bf16 %v3436_v16, %v4997_v24  ;;  %v3578_v11 = vmul.bf16 %v3436_v16, %v5059_v41  ;;  %v3672_v36 = vmul.bf16 %v3436_v16, %v5066_v50  ;;  %s4096_s22 = sshll.u32 %s5443_s26, 2 }
 0x752   : > { %v3720_v24 = vmul.bf16 %v3436_v16, %v5069_v56  ;;  %v3814_v41 = vmul.bf16 %v3436_v16, %v5079_v52 }
 0x753   : > { %3532 = vrot.lane.b32.xlu1 %v3530_v28, %s4309_s6  ;;  %v3440_v29 = vsel %vm1254_vm2, %v3438_v30, 0 }
 0x754   : > { %4188 = vmatpush3.bf16.msra.mxu0 %v3440_v29  ;;  %v5430_v29 = vld [vmem:[#allocation6_spill] sm:$0xff] }
 0x755   : > { %3580 = vrot.lane.b32.xlu0 %v3578_v11, %s4321_s10  ;;  %4199 = vmatprep.subr.bf16.mxu0 %v5425_v37  ;;  %v5431_v11 = vld [vmem:[#allocation7_spill] sm:$0xff] }
 0x757   : > { %3626 = vrot.lane.b32.xlu1 %v3436_v16, %s4320_s21  ;;  %4190 = vmatmul.mubr.msk.bf16.vlgmr.msra.gmra.mxu0 %vm1250_vm4, %v5015_v13  ;;  %s463_s21 = scalar_lea.vmem %s5403_s11, %s4096_s22 }
 0x758   : > { %4201 = vmatprep.mubr.msk.bf16.mxu0 %vm4326_vm9, %v5425_v37 }
 0x759   : > { %3674 = vrot.lane.b32.xlu0 %v3672_v36, %s4323_s28  ;;  %s466_s28 = scalar_lea.vmem %s5404_s12, %s5443_s26 }
 0x75b   : > { %3722 = vrot.lane.b32.xlu1 %v3720_v24, %s4322_s27 }
 0x75d   : > { %3768 = vrot.lane.b32.xlu0 %v3436_v16, %s4325_s13 }
 0x75f   : > { %3816 = vrot.lane.b32.xlu1 %v3814_v41, %s4324_s30  ;;  %v5432_v41 = vld [vmem:[#allocation8_spill] sm:$0xff] }
 0x761   : > { %2403 = vperm.xlu0 %4277, %v2386_v44  }
 0x763   : > { %1241 = vperm.xlu1 %4278, %v1224_v55   ;;  %v5433_v55 = vld [vmem:[#allocation9_spill] sm:$0xff] }
 0x7c3   : > { %v3485_v13 = vpop.permute.xlu0 %3484 }
 0x7c4   : > { %v3487_v50 = vsel %vm1254_vm2, %v3485_v13, 0 }
 0x7c5   : > { %4194 = vmatpush3.bf16.msra.mxu1 %v3487_v50  ;;  %v3533_v59 = vpop.permute.xlu1 %3532  ;;  %v5435_v50 = vld [vmem:[#allocation11_spill] sm:$0xff] }
 0x7c6   : > { %v3535_v22 = vsel %vm1254_vm2, %v3533_v59, 0  ;;  %4205 = vmatprep.subr.bf16.mxu1 %v5425_v37 }
 0x7c7   : > { %v3581_v56 = vpop.permute.xlu0 %3580  ;;  %4200 = vmatpush3.bf16.msra.mxu0 %v3535_v22  ;;  %v5436_v22 = vld [vmem:[#allocation12_spill] sm:$0xff] }
 0x7c8   : > { %v3583_v38 = vsel %vm1254_vm2, %v3581_v56, 0  ;;  %4196 = vmatmul.mubr.msk.bf16.vlgmr.msra.gmra.mxu1 %vm1250_vm4, %v5098_v35  ;;  %4211 = vmatprep.subr.bf16.mxu0 %v5425_v37 }
 0x7c9   : > { %4206 = vmatpush3.bf16.msra.mxu1 %v3583_v38  ;;  %v3627_v52 = vpop.permute.xlu1 %3626  ;;  %4207 = vmatprep.mubr.msk.bf16.mxu1 %vm4326_vm9, %v5425_v37  ;;  %v5437_v38 = vld [vmem:[#allocation13_spill] sm:$0xff] }
 0x7ca   : > { %v3629_v62 = vsel %vm1254_vm2, %v3627_v52, 0  ;;  %4202 = vmatmul.mubr.msk.bf16.vlgmr.msra.gmra.mxu0 %vm1250_vm4, %v5113_v45  ;;  %4217 = vmatprep.subr.bf16.mxu1 %v5425_v37 }
 0x7cb   : > { %4212 = vmatpush3.bf16.msra.mxu0 %v3629_v62  ;;  %4213 = vmatprep.mubr.msk.bf16.mxu0 %vm4326_vm9, %v5425_v37  ;;  %v3675_v35 = vpop.permute.xlu0 %3674  ;;  %v5438_v62 = vld [vmem:[#allocation14_spill] sm:$0xff] }
 0x7cc   : > { %4223 = vmatprep.subr.bf16.mxu0 %v5425_v37  ;;  %v3677_v26 = vsel %vm1254_vm2, %v3675_v35, 0 }
 0x7cd   : > { %v3723_v14 = vpop.permute.xlu1 %3722 }
 0x7ce   : > { %v3725_v45 = vsel %vm1254_vm2, %v3723_v14, 0  ;;  %v5439_v14 = vld [vmem:[#allocation15_spill] sm:$0xff] }
 0x7cf   : > { %v3769_v3 = vpop.permute.xlu0 %3768 }
 0x7d0   : > { %4208 = vmatmul.mubr.msk.bf16.vlgmr.msra.gmra.mxu1 %vm1250_vm4, %v5125_v12  ;;  %v1245_v12 = vshrl.u32 %v5427_v46, 7  ;;  %v3771_v43 = vsel %vm1254_vm2, %v3769_v3, 0 }
 0x7d1   : > { %4218 = vmatpush3.bf16.msra.mxu1 %v3677_v26  ;;  %4219 = vmatprep.mubr.msk.bf16.mxu1 %vm4326_vm9, %v5425_v37  ;;  %v3817_v23 = vpop.permute.xlu1 %3816 }
 0x7d2   : > { %4214 = vmatmul.mubr.msk.bf16.vlgmr.msra.gmra.mxu0 %vm1250_vm4, %v5134_v0  ;;  %4229 = vmatprep.subr.bf16.mxu1 %v5425_v37  ;;  %v1246_v9 = vsub.s32 0, %v1245_v12  ;;  %v3819_v0 = vsel %vm1254_vm2, %v3817_v23, 0  ;;  %v5440_v12 = vld [vmem:[#allocation16_spill] sm:$0xff] }
 0x7d3   : > { %4224 = vmatpush3.bf16.msra.mxu0 %v3725_v45  ;;  %4225 = vmatprep.mubr.msk.bf16.mxu0 %vm4326_vm9, %v5425_v37 }
 0x7d4   : > { %4235 = vmatprep.subr.bf16.mxu0 %v5425_v37 }
 0x7d8   : > { %4220 = vmatmul.mubr.msk.bf16.vlgmr.msra.gmra.mxu1 %vm1250_vm4, %v5145_v4 }
 0x7d9   : > { %4230 = vmatpush3.bf16.msra.mxu1 %v3771_v43  ;;  %4231 = vmatprep.mubr.msk.bf16.mxu1 %vm4326_vm9, %v5425_v37 }
 0x7da   : > { %4226 = vmatmul.mubr.msk.bf16.vlgmr.msra.gmra.mxu0 %vm1250_vm4, %v5158_v27 }
 0x7db   : > { %4236 = vmatpush3.bf16.msra.mxu0 %v3819_v0  ;;  %4237 = vmatprep.mubr.msk.bf16.mxu0 %vm4326_vm9, %v5425_v37 }
 0x7dc   : > { %v2404_v1 = vpop.permute.xlu0 %2403 }
 0x7dd   : > { %v5337_v47 = vrot.slane %v2404_v1, %v1246_v9 }
 0x7df   : > { %v2462_v4 = vadd.f32 %v5234_v61, %v5337_v47  ;;  %v2463_v53 = vadd.f32 %v5238_v8, %v5337_v47 }
 0x7e0   : > { %4232 = vmatmul.mubr.msk.bf16.vlgmr.msra.gmra.mxu1 %vm1250_vm4, %v5169_v10 }
 0x7e1   : > { %v2524_v2 = vadd.f32 %v5242_v49, %v2462_v4  ;;  %v2525_v27 = vadd.f32 %v5244_v54, %v2463_v53  ;;  %v1242_v54 = vpop.permute.xlu1 %1241 }
 0x7e2   : > { %4238 = vmatmul.mubr.msk.bf16.vlgmr.msra.gmra.mxu0 %vm1250_vm4, %v5184_v6 }
 0x7e3   : > { %v2590_v37 = vadd.f32 %v5246_v60, %v2524_v2  ;;  %v2591_v32 = vadd.f32 %v5248_v57, %v2525_v27 }
 0x7e5   : > { %v2656_v48 = vadd.f32 %v5250_v63, %v2590_v37  ;;  %v2657_v61 = vadd.f32 %v5252_v5, %v2591_v32  ;;  %v1247_v63 = vrot.slane %v1242_v54, %v1246_v9  ;;  %v5441_v9 = vld [vmem:[#allocation17_spill] sm:$0xff] }
 0x7e7   : > { %v2716_v8 = vadd.f32 %v5254_v15, %v2656_v48  ;;  %v2717_v7 = vadd.f32 %v5256_v42, %v2657_v61 }
 0x7e9   : > { %v2782_v10 = vadd.f32 %v5258_v58, %v2716_v8  ;;  %v2783_v49 = vadd.f32 %v5260_v20, %v2717_v7  ;;  %v1302_v58 = vadd.f32 %v4933_v17, %v1247_v63  ;;  %v1303_v20 = vadd.f32 %v4936_v21, %v1247_v63 }
 0x7eb   : > { %v2848_v33 = vadd.f32 %v5262_v19, %v2782_v10  ;;  %v2849_v6 = vadd.f32 %v5264_v39, %v2783_v49  ;;  %v1364_v19 = vadd.f32 %v4950_v18, %v1302_v58  ;;  %v1365_v39 = vadd.f32 %v4952_v25, %v1303_v20  ;;  %v5434_v18 = vld [vmem:[#allocation10_spill] sm:$0xff] }
 0x7ed   : > { %v2908_v60 = vadd.f32 %v5266_v31, %v2848_v33  ;;  %v2909_v57 = vadd.f32 %v5268_v34, %v2849_v6  ;;  %v5428_v31 = vld [vmem:[#allocation4_spill] sm:$0xff]  ;;  %v5429_v34 = vld [vmem:[#allocation5_spill] sm:$0xff] }
 0x7ee   : > { %v1430_v28 = vadd.f32 %v5428_v31, %v1364_v19  ;;  %v1431_v30 = vadd.f32 %v5429_v34, %v1365_v39 }
 0x7ef   : > { %v2974_v5 = vadd.f32 %v5270_v40, %v2908_v60  ;;  %v2975_v15 = vadd.f32 %v5272_v51, %v2909_v57 }
 0x7f0   : > { %v1496_v40 = vadd.f32 %v5430_v29, %v1430_v28  ;;  %v1497_v51 = vadd.f32 %v5431_v11, %v1431_v30 }
 0x7f1   : > { %v4067_v16 = vmul.f32 -1.442695, %v2974_v5  ;;  %v4068_v42 = vmul.f32 -1.442695, %v2975_v15 }
 0x7f2   : > { %v1556_v21 = vadd.f32 %v5432_v41, %v1496_v40  ;;  %v1557_v13 = vadd.f32 %v5433_v55, %v1497_v51 }
 0x7f3   : > { %4279 = vpow2.f32 %v4067_v16 }
 0x7f4   : > { %4281 = vpow2.f32 %v4068_v42  ;;  %v1622_v25 = vadd.f32 %v5434_v18, %v1556_v21  ;;  %v1623_v59 = vadd.f32 %v5435_v50, %v1557_v13 }
 0x7f6   : > { %v1688_v56 = vadd.f32 %v5436_v22, %v1622_v25  ;;  %v1689_v52 = vadd.f32 %v5437_v38, %v1623_v59 }
 0x7f8   : > { %v1748_v35 = vadd.f32 %v5438_v62, %v1688_v56  ;;  %v1749_v26 = vadd.f32 %v5439_v14, %v1689_v52 }
 0x7fa   : > { %v1814_v23 = vadd.f32 %v5440_v12, %v1748_v35  ;;  %v1815_v0 = vadd.f32 %v5441_v9, %v1749_v26 }
 0x800   : > { %v4280_v36 = vpop.eup %4279 }
 0x801   : > { %v4282_v24 = vpop.eup %4281  ;;  %v2982_v17 = vadd.f32 1.0, %v4280_v36 }
 0x802   : > { %v2983_v44 = vadd.f32 1.0, %v4282_v24 }
 0x803   : > { %4283 = vrcp.f32 %v2982_v17 }
 0x804   : > { %4285 = vrcp.f32 %v2983_v44 }
 0x810   : > { %v4284_v45 = vpop.eup %4283 }
 0x811   : > { %v4286_v3 = vpop.eup %4285  ;;  %v3870_v46 = vrot.slane %v4284_v45, 7 }
 0x812   : > { %v3871_v43 = vrot.slane %v4286_v3, 7 }
 0x813   : > { %v3875_v1 = vsel %vm3874_vm3, %v1814_v23, %v3870_v46 }
 0x814   : > { %v3876_v4 = vsel %vm3874_vm3, %v1815_v0, %v3871_v43 }
 0x815   : > { %v3879_v53 = vcombine.low %v3875_v1, %v3876_v4 }
 0x817   : > { %4090 = vst.sshfl [vmem:[%s463_s21] sm:$0x33 pattern:$0x76325410] %v3879_v53  ;;  %v3476_v2 = vpop.f32.mrf.mxu0 }
 0x818   : > { %v3482_v27 = vadd.f32 %v3476_v2, %v5337_v47 }
 0x819   : > { %v4191_v37 = vpop.f32.mrf.mxu0 }
 0x81b   : > { %v3479_v32 = vpop.f32.mrf.mxu0 }
 0x81d   : > { %v4192_v48 = vpop.f32.mrf.mxu0 }
 0x888   : > { %v3523_v61 = vpop.f32.mrf.mxu1 }
 0x889   : > { %v3529_v6 = vadd.f32 %v3523_v61, %v3482_v27 }
 0x88a   : > { %v4197_v8 = vpop.f32.mrf.mxu1  ;;  %v3571_v7 = vpop.f32.mrf.mxu0 }
 0x88b   : > { %v3577_v15 = vadd.f32 %v3571_v7, %v3529_v6 }
 0x88c   : > { %v3526_v10 = vpop.f32.mrf.mxu1  ;;  %v4203_v49 = vpop.f32.mrf.mxu0 }
 0x88e   : > { %v4198_v54 = vpop.f32.mrf.mxu1  ;;  %v3574_v33 = vpop.f32.mrf.mxu0 }
 0x890   : > { %v4204_v60 = vpop.f32.mrf.mxu0  ;;  %v3619_v57 = vpop.f32.mrf.mxu1 }
 0x891   : > { %v3625_v58 = vadd.f32 %v3619_v57, %v3577_v15 }
 0x892   : > { %v4209_v63 = vpop.f32.mrf.mxu1  ;;  %v3665_v5 = vpop.f32.mrf.mxu0 }
 0x893   : > { %v3671_v31 = vadd.f32 %v3665_v5, %v3625_v58 }
 0x894   : > { %v3622_v16 = vpop.f32.mrf.mxu1  ;;  %v4215_v42 = vpop.f32.mrf.mxu0 }
 0x896   : > { %v4210_v47 = vpop.f32.mrf.mxu1  ;;  %v3668_v20 = vpop.f32.mrf.mxu0 }
 0x898   : > { %v4216_v19 = vpop.f32.mrf.mxu0  ;;  %v3713_v39 = vpop.f32.mrf.mxu1 }
 0x899   : > { %v3719_v30 = vadd.f32 %v3713_v39, %v3671_v31 }
 0x89a   : > { %v4221_v28 = vpop.f32.mrf.mxu1  ;;  %v3761_v34 = vpop.f32.mrf.mxu0 }
 0x89b   : > { %v3767_v36 = vadd.f32 %v3761_v34, %v3719_v30 }
 0x89c   : > { %v3716_v29 = vpop.f32.mrf.mxu1  ;;  %v4227_v40 = vpop.f32.mrf.mxu0 }
 0x89e   : > { %v4222_v11 = vpop.f32.mrf.mxu1  ;;  %v3764_v51 = vpop.f32.mrf.mxu0 }
 0x8a0   : > { %v4228_v24 = vpop.f32.mrf.mxu0  ;;  %v3807_v17 = vpop.f32.mrf.mxu1 }
 0x8a1   : > { %v3813_v41 = vadd.f32 %v3807_v17, %v3767_v36 }
 0x8a2   : > { %v4233_v21 = vpop.f32.mrf.mxu1  ;;  %v3855_v44 = vpop.f32.mrf.mxu0 }
 0x8a3   : > { %v3861_v55 = vadd.f32 %v3855_v44, %v3813_v41 }
 0x8a4   : > { %v3810_v13 = vpop.f32.mrf.mxu1  ;;  %v4239_v18 = vpop.f32.mrf.mxu0 }
 0x8a5   : > { %v4089_v25 = vmul.f32 -1.442695, %v3861_v55 }
 0x8a6   : > { %v4234_v50 = vpop.f32.mrf.mxu1  ;;  %v3858_v59 = vpop.f32.mrf.mxu0 }
 0x8a7   : > { %4287 = vpow2.f32 %v4089_v25 }
 0x8a8   : > { %v4240_v22 = vpop.f32.mrf.mxu0 }
 0x8b4   : > { %v4288_v56 = vpop.eup %4287 }
 0x8b5   : > { %v3865_v38 = vadd.f32 1.0, %v4288_v56 }
 0x8b7   : > { %4289 = vrcp.f32 %v3865_v38 }
 0x8c4   : > { %v4290_v52 = vpop.eup %4289 }
 0x8c5   : > { %3890 = vst.msk [vmem:[%s466_s28] sm:$0x1] %vm3889_vm10, %v4290_v52 }
 0x8c6 PF: > { %s27_s25 = sadd.s32 1, %s4297_s25  }
 0x8c7   : > { %p24_p4 = scmp.ge.s32.totalorder %s27_s25, 4  }
 0x8c9   :  { %26 = sbr.rel (!%p24_p4) target bundleno = 3 (0x3), region = 112 }

</bundles_post_ra>
